<compile_context>
chip_gen: v6e
topology: v6e:2x2x1
jax: 0.10.0
libtpu: 0.0.40
codegen_flags: <defaults>
</compile_context>

<pallas_src>
from functools import partial

import jax
import jax.numpy as jnp
from jax import lax
from jax.experimental import pallas as pl
from jax.experimental.pallas import tpu as pltpu


def attention_kernel(x_ref, wqkv_ref, wproj_ref, bproj_ref, o_ref, ctx_ref,
                     *, bb, seq_len, num_heads, head_dim):
    """One grid step handles `bb` batch elements.

    x_ref:     (bb, N, C)   bf16
    wqkv_ref:  (C, 3*D)     bf16 (softmax scale already folded into Q columns)
    wproj_ref: (D, C)       bf16
    bproj_ref: (1, C)       f32
    o_ref:     (bb, N, C)   output dtype
    ctx_ref:   (bb, N, D)   f32 VMEM scratch (per-head attention outputs)
    """
    N = seq_len
    D = num_heads * head_dim
    BN = bb * N
    C = x_ref.shape[-1]

    # Fused qkv projection for all bb batch elements: one big MXU matmul.
    x = x_ref[...].reshape(BN, C)                                         # bf16
    qkv = jnp.dot(x, wqkv_ref[...], preferred_element_type=jnp.float32)   # (BN, 3D) f32
    qkv = qkv.reshape(bb, N, 3 * D).astype(jnp.bfloat16)                  # (bb, N, 3D)

    # Per-head scaled-dot-product attention, batched across the bb batch
    # elements (static unroll over heads; num_heads is small).  Results land
    # in the ctx VMEM scratch so no concatenation / relayout is needed.
    for h in range(num_heads):
        cq = slice(h * head_dim, (h + 1) * head_dim)
        ck = slice(D + h * head_dim, D + (h + 1) * head_dim)
        cv = slice(2 * D + h * head_dim, 2 * D + (h + 1) * head_dim)

        qh = qkv[:, :, cq]                                                # (bb, N, hd)
        kh = qkv[:, :, ck]                                                # (bb, N, hd)
        vh = qkv[:, :, cv]                                                # (bb, N, hd)

        # scores = q @ k^T, contracting the head dim (no explicit transpose).
        s = jnp.einsum('bqd,bkd->bqk', qh, kh,
                       preferred_element_type=jnp.float32)                # (bb, N, N) f32

        s = s - jnp.max(s, axis=-1, keepdims=True)
        p = jnp.exp(s)
        inv = pl.reciprocal(jnp.sum(p, axis=-1, keepdims=True), approx=True)
        p = (p * inv).astype(jnp.bfloat16)                                # softmax(dim=-1)

        ctx_ref[:, :, cq] = jnp.einsum('bqk,bkd->bqd', p, vh,
                                       preferred_element_type=jnp.float32)

    # Output projection for all bb batch elements in one matmul, plus bias.
    ctx = ctx_ref[...].astype(jnp.bfloat16).reshape(BN, D)                # (BN, D)
    y = jnp.dot(ctx, wproj_ref[...], preferred_element_type=jnp.float32)  # (BN, C)
    y = y + bproj_ref[...]
    o_ref[...] = y.reshape(bb, N, C).astype(o_ref.dtype)


def attention_forward(x, w_qkv, w_proj, b_proj, num_heads, *, batch_block=None):
    """x: (B, N, C); w_qkv: (3*D, C); w_proj: (C, D); b_proj: (C,)."""
    B, N, C = x.shape
    D = w_qkv.shape[0] // 3
    head_dim = D // num_heads
    scale = head_dim ** (-0.5)

    # Grid policy: one grid step holding the whole batch on single-TC chips
    # (v5e/v6e); split the batch across two parallel grid steps on dual-TC
    # chips (v7x-class) so both TensorCores are used.
    if batch_block is None:
        batch_block = B
        try:
            kind = jax.devices()[0].device_kind.lower()
            if ("v7" in kind or "7x" in kind) and B >= 2 and B % 2 == 0:
                batch_block = B // 2
        except Exception:
            pass
    assert B % batch_block == 0, (B, batch_block)
    bb = batch_block
    grid = (B // bb,)

    # One-time wrapper-side prep: transpose weights for row-major MXU matmuls,
    # fold the softmax scale into the Q columns of the qkv weight, cast MXU
    # operands to bf16 (accumulation inside the kernel is f32).
    wqkv_t = jnp.transpose(w_qkv).astype(jnp.float32)                     # (C, 3D)
    scale_vec = jnp.concatenate([jnp.full((D,), scale, jnp.float32),
                                 jnp.ones((2 * D,), jnp.float32)])
    wqkv_bf = (wqkv_t * scale_vec[None, :]).astype(jnp.bfloat16)
    wproj_bf = jnp.transpose(w_proj).astype(jnp.bfloat16)                 # (D, C)
    bproj2 = b_proj.reshape(1, C).astype(jnp.float32)
    x_bf = x.astype(jnp.bfloat16)

    kernel = partial(attention_kernel, bb=bb, seq_len=N,
                     num_heads=num_heads, head_dim=head_dim)

    # VMEM budget sized from the actual resident buffers (with headroom),
    # clamped to stay below v7x's 64 MiB physical VMEM per core.
    BN = bb * N
    est = (2 * BN * C * 2            # x blocks (bf16, double-buffered)
           + 2 * BN * C * 4          # out blocks (f32, double-buffered)
           + 2 * (C * 3 * D + D * C) * 2 + 2 * C * 4   # weights / bias
           + BN * D * 4              # ctx scratch
           + BN * 3 * D * (4 + 2)    # qkv f32 + bf16 copy
           + 4 * BN * N * 4)         # score / softmax temporaries
    vmem_limit = int(min(max(2 * est, 32 * 1024 * 1024), 64 * 1024 * 1024))

    return pl.pallas_call(
        kernel,
        out_shape=jax.ShapeDtypeStruct((B, N, C), x.dtype),
        grid_spec=pltpu.PrefetchScalarGridSpec(
            num_scalar_prefetch=0,
            grid=grid,
            in_specs=[
                pl.BlockSpec((bb, N, C), lambda i: (i, 0, 0)),    # x (bb batches/step)
                pl.BlockSpec((C, 3 * D), lambda i: (0, 0)),       # qkv weight (full)
                pl.BlockSpec((D, C), lambda i: (0, 0)),           # proj weight (full)
                pl.BlockSpec((1, C), lambda i: (0, 0)),           # proj bias
            ],
            out_specs=pl.BlockSpec((bb, N, C), lambda i: (i, 0, 0)),
            scratch_shapes=[pltpu.VMEM((bb, N, D), jnp.float32)],
        ),
        compiler_params=pltpu.CompilerParams(
            dimension_semantics=("parallel",),
            vmem_limit_bytes=vmem_limit),
    )(x_bf, wqkv_bf, wproj_bf, bproj2)


def reference_attention(x, w_qkv, w_proj, b_proj, num_heads):
    """Pure-JAX transcription of the PyTorch forward for verification."""
    B, N, C = x.shape
    D = w_qkv.shape[0] // 3
    hd = D // num_heads
    qkv = x @ w_qkv.T                                               # (B, N, 3D)
    qkv = qkv.reshape(B, N, 3, num_heads, hd).transpose(2, 0, 3, 1, 4)
    q, k, v = qkv[0], qkv[1], qkv[2]                                # (B, H, N, hd)
    q = q * (hd ** -0.5)
    attn = jax.nn.softmax(q @ jnp.swapaxes(k, -2, -1), axis=-1)     # (B, H, N, N)
    y = (attn @ v).transpose(0, 2, 1, 3).reshape(B, N, D)
    return y @ w_proj.T + b_proj


if __name__ == "__main__":
    # Small shapes consistent with the module: dim=32, num_heads=4 -> head_dim=8
    B, N, dim = 2, 128, 32
    num_heads = 4
    all_head_dim = dim  # attn_head_dim=None -> head_dim = dim // num_heads

    key = jax.random.PRNGKey(0)
    kx, kqkv, kproj, kb = jax.random.split(key, 4)

    x = jax.random.normal(kx, (B, N, dim), dtype=jnp.float32)
    # nn.Linear(dim, all_head_dim*3, bias=False): weight (3*D, dim); qkv_bias=False
    w_qkv = jax.random.normal(kqkv, (3 * all_head_dim, dim), dtype=jnp.float32) * 0.05
    # nn.Linear(all_head_dim, dim): weight (dim, D), bias (dim,)
    w_proj = jax.random.normal(kproj, (dim, all_head_dim), dtype=jnp.float32) * 0.05
    b_proj = jax.random.normal(kb, (dim,), dtype=jnp.float32) * 0.05

    out = attention_forward(x, w_qkv, w_proj, b_proj, num_heads)
    out = jax.block_until_ready(out)

    ref = reference_attention(x, w_qkv, w_proj, b_proj, num_heads)
    assert out.shape == (B, N, dim), out.shape
    # bf16 MXU inputs with f32 accumulation -> loosened tolerance vs f32 ref.
    assert jnp.allclose(out, ref, atol=2e-2, rtol=2e-2), \
        float(jnp.max(jnp.abs(out - ref)))

    print("KERNEL_OK")
</pallas_src>

<mosaic_0001>
module attributes {stable_mosaic.version = 11 : i64} {
  func.func @attention_kernel(%arg0: i32, %arg1: memref<2x128x32xbf16, #tpu.memory_space<vmem>>, %arg2: memref<32x96xbf16, #tpu.memory_space<vmem>>, %arg3: memref<32x32xbf16, #tpu.memory_space<vmem>>, %arg4: memref<1x32xf32, #tpu.memory_space<vmem>>, %arg5: memref<2x128x32xf32, #tpu.memory_space<vmem>>, %arg6: memref<2x128x32xf32, #tpu.memory_space<vmem>>) attributes {dimension_semantics = [#tpu.dimension_semantics<parallel>], iteration_bounds = array<i64: 1>, scalar_prefetch = 0 : i64, scratch_operands = 1 : i64, tpu.core_type = #tpu.core_type<tc>, window_params = [{transform_indices = @transform_0, window_bounds = array<i64: 2, 128, 32>}, {pipeline_mode = #tpu.pipeline_mode<synchronous>, transform_indices = @transform_1, window_bounds = array<i64: 32, 96>}, {pipeline_mode = #tpu.pipeline_mode<synchronous>, transform_indices = @transform_2, window_bounds = array<i64: 32, 32>}, {pipeline_mode = #tpu.pipeline_mode<synchronous>, transform_indices = @transform_3, window_bounds = array<i64: 1, 32>}, {transform_indices = @transform_4, window_bounds = array<i64: 2, 128, 32>}]} {
    %c0 = arith.constant 0 : index
    %c0_0 = arith.constant 0 : index
    %c0_1 = arith.constant 0 : index
    %0 = vector.load %arg1[%c0, %c0_0, %c0_1] : memref<2x128x32xbf16, #tpu.memory_space<vmem>>, vector<2x128x32xbf16>
    %1 = vector.shape_cast %0 : vector<2x128x32xbf16> to vector<256x32xbf16>
    %c0_2 = arith.constant 0 : index
    %c0_3 = arith.constant 0 : index
    %2 = vector.load %arg2[%c0_2, %c0_3] : memref<32x96xbf16, #tpu.memory_space<vmem>>, vector<32x96xbf16>
    %cst = arith.constant dense<0.000000e+00> : vector<256x96xf32>
    %3 = tpu.matmul %1, %2, %cst {dimension_numbers = #tpu.dot_dimension_numbers<[1], [0], [0], [1], [0, 0, 1, 1], [], []>} : vector<256x32xbf16>, vector<32x96xbf16>, vector<256x96xf32> -> vector<256x96xf32>
    %4 = vector.shape_cast %3 : vector<256x96xf32> to vector<2x128x96xf32>
    %5 = arith.truncf %4 : vector<2x128x96xf32> to vector<2x128x96xbf16>
    %6 = vector.extract_strided_slice %5 {offsets = [0, 0, 0], sizes = [2, 128, 8], strides = [1, 1, 1]} : vector<2x128x96xbf16> to vector<2x128x8xbf16>
    %7 = vector.extract_strided_slice %5 {offsets = [0, 0, 32], sizes = [2, 128, 8], strides = [1, 1, 1]} : vector<2x128x96xbf16> to vector<2x128x8xbf16>
    %8 = vector.extract_strided_slice %5 {offsets = [0, 0, 64], sizes = [2, 128, 8], strides = [1, 1, 1]} : vector<2x128x96xbf16> to vector<2x128x8xbf16>
    "tpu.trace_start"() <{level = 10 : i32, message = "bqd,bkd->bqk"}> : () -> ()
    %cst_4 = arith.constant dense<0.000000e+00> : vector<2x128x128xf32>
    %9 = tpu.matmul %6, %7, %cst_4 {dimension_numbers = #tpu.dot_dimension_numbers<[2], [2], [1], [1], [0, 0, 0, 1, 1, 1], [0], [0]>} : vector<2x128x8xbf16>, vector<2x128x8xbf16>, vector<2x128x128xf32> -> vector<2x128x128xf32>
    "tpu.trace_stop"() : () -> ()
    %cst_5 = arith.constant dense<0xFF800000> : vector<2x128xf32>
    %10 = vector.multi_reduction <maximumf>, %9, %cst_5 [2] : vector<2x128x128xf32> to vector<2x128xf32>
    %11 = vector.shape_cast %10 : vector<2x128xf32> to vector<2x128x1xf32>
    %12 = vector.broadcast %11 : vector<2x128x1xf32> to vector<2x128x128xf32>
    %13 = arith.subf %9, %12 : vector<2x128x128xf32>
    %14 = math.exp %13 : vector<2x128x128xf32>
    %cst_6 = arith.constant dense<0.000000e+00> : vector<2x128xf32>
    %15 = vector.multi_reduction <add>, %14, %cst_6 [2] : vector<2x128x128xf32> to vector<2x128xf32>
    %16 = vector.shape_cast %15 : vector<2x128xf32> to vector<2x128x1xf32>
    %17 = tpu.reciprocal %16 {approx = true} : vector<2x128x1xf32> -> vector<2x128x1xf32>
    %18 = vector.broadcast %17 : vector<2x128x1xf32> to vector<2x128x128xf32>
    %19 = arith.mulf %14, %18 : vector<2x128x128xf32>
    %20 = arith.truncf %19 : vector<2x128x128xf32> to vector<2x128x128xbf16>
    "tpu.trace_start"() <{level = 10 : i32, message = "bqk,bkd->bqd"}> : () -> ()
    %cst_7 = arith.constant dense<0.000000e+00> : vector<2x128x8xf32>
    %21 = tpu.matmul %20, %8, %cst_7 {dimension_numbers = #tpu.dot_dimension_numbers<[2], [1], [1], [2], [0, 0, 0, 1, 1, 2], [0], [0]>} : vector<2x128x128xbf16>, vector<2x128x8xbf16>, vector<2x128x8xf32> -> vector<2x128x8xf32>
    "tpu.trace_stop"() : () -> ()
    %c0_8 = arith.constant 0 : index
    %c0_9 = arith.constant 0 : index
    %c0_10 = arith.constant 0 : index
    %22 = vector.load %arg6[%c0_8, %c0_9, %c0_10] : memref<2x128x32xf32, #tpu.memory_space<vmem>>, vector<2x128x8xf32>
    tpu.vector_store %arg6[%c0_8, %c0_9, %c0_10], %21 {strides = array<i32>} : memref<2x128x32xf32, #tpu.memory_space<vmem>>, vector<2x128x8xf32>,
    %23 = vector.extract_strided_slice %5 {offsets = [0, 0, 8], sizes = [2, 128, 8], strides = [1, 1, 1]} : vector<2x128x96xbf16> to vector<2x128x8xbf16>
    %24 = vector.extract_strided_slice %5 {offsets = [0, 0, 40], sizes = [2, 128, 8], strides = [1, 1, 1]} : vector<2x128x96xbf16> to vector<2x128x8xbf16>
    %25 = vector.extract_strided_slice %5 {offsets = [0, 0, 72], sizes = [2, 128, 8], strides = [1, 1, 1]} : vector<2x128x96xbf16> to vector<2x128x8xbf16>
    "tpu.trace_start"() <{level = 10 : i32, message = "bqd,bkd->bqk"}> : () -> ()
    %cst_11 = arith.constant dense<0.000000e+00> : vector<2x128x128xf32>
    %26 = tpu.matmul %23, %24, %cst_11 {dimension_numbers = #tpu.dot_dimension_numbers<[2], [2], [1], [1], [0, 0, 0, 1, 1, 1], [0], [0]>} : vector<2x128x8xbf16>, vector<2x128x8xbf16>, vector<2x128x128xf32> -> vector<2x128x128xf32>
    "tpu.trace_stop"() : () -> ()
    %cst_12 = arith.constant dense<0xFF800000> : vector<2x128xf32>
    %27 = vector.multi_reduction <maximumf>, %26, %cst_12 [2] : vector<2x128x128xf32> to vector<2x128xf32>
    %28 = vector.shape_cast %27 : vector<2x128xf32> to vector<2x128x1xf32>
    %29 = vector.broadcast %28 : vector<2x128x1xf32> to vector<2x128x128xf32>
    %30 = arith.subf %26, %29 : vector<2x128x128xf32>
    %31 = math.exp %30 : vector<2x128x128xf32>
    %cst_13 = arith.constant dense<0.000000e+00> : vector<2x128xf32>
    %32 = vector.multi_reduction <add>, %31, %cst_13 [2] : vector<2x128x128xf32> to vector<2x128xf32>
    %33 = vector.shape_cast %32 : vector<2x128xf32> to vector<2x128x1xf32>
    %34 = tpu.reciprocal %33 {approx = true} : vector<2x128x1xf32> -> vector<2x128x1xf32>
    %35 = vector.broadcast %34 : vector<2x128x1xf32> to vector<2x128x128xf32>
    %36 = arith.mulf %31, %35 : vector<2x128x128xf32>
    %37 = arith.truncf %36 : vector<2x128x128xf32> to vector<2x128x128xbf16>
    "tpu.trace_start"() <{level = 10 : i32, message = "bqk,bkd->bqd"}> : () -> ()
    %cst_14 = arith.constant dense<0.000000e+00> : vector<2x128x8xf32>
    %38 = tpu.matmul %37, %25, %cst_14 {dimension_numbers = #tpu.dot_dimension_numbers<[2], [1], [1], [2], [0, 0, 0, 1, 1, 2], [0], [0]>} : vector<2x128x128xbf16>, vector<2x128x8xbf16>, vector<2x128x8xf32> -> vector<2x128x8xf32>
    "tpu.trace_stop"() : () -> ()
    %c0_15 = arith.constant 0 : index
    %c0_16 = arith.constant 0 : index
    %c8 = arith.constant 8 : index
    %39 = vector.load %arg6[%c0_15, %c0_16, %c8] : memref<2x128x32xf32, #tpu.memory_space<vmem>>, vector<2x128x8xf32>
    tpu.vector_store %arg6[%c0_15, %c0_16, %c8], %38 {strides = array<i32>} : memref<2x128x32xf32, #tpu.memory_space<vmem>>, vector<2x128x8xf32>,
    %40 = vector.extract_strided_slice %5 {offsets = [0, 0, 16], sizes = [2, 128, 8], strides = [1, 1, 1]} : vector<2x128x96xbf16> to vector<2x128x8xbf16>
    %41 = vector.extract_strided_slice %5 {offsets = [0, 0, 48], sizes = [2, 128, 8], strides = [1, 1, 1]} : vector<2x128x96xbf16> to vector<2x128x8xbf16>
    %42 = vector.extract_strided_slice %5 {offsets = [0, 0, 80], sizes = [2, 128, 8], strides = [1, 1, 1]} : vector<2x128x96xbf16> to vector<2x128x8xbf16>
    "tpu.trace_start"() <{level = 10 : i32, message = "bqd,bkd->bqk"}> : () -> ()
    %cst_17 = arith.constant dense<0.000000e+00> : vector<2x128x128xf32>
    %43 = tpu.matmul %40, %41, %cst_17 {dimension_numbers = #tpu.dot_dimension_numbers<[2], [2], [1], [1], [0, 0, 0, 1, 1, 1], [0], [0]>} : vector<2x128x8xbf16>, vector<2x128x8xbf16>, vector<2x128x128xf32> -> vector<2x128x128xf32>
    "tpu.trace_stop"() : () -> ()
    %cst_18 = arith.constant dense<0xFF800000> : vector<2x128xf32>
    %44 = vector.multi_reduction <maximumf>, %43, %cst_18 [2] : vector<2x128x128xf32> to vector<2x128xf32>
    %45 = vector.shape_cast %44 : vector<2x128xf32> to vector<2x128x1xf32>
    %46 = vector.broadcast %45 : vector<2x128x1xf32> to vector<2x128x128xf32>
    %47 = arith.subf %43, %46 : vector<2x128x128xf32>
    %48 = math.exp %47 : vector<2x128x128xf32>
    %cst_19 = arith.constant dense<0.000000e+00> : vector<2x128xf32>
    %49 = vector.multi_reduction <add>, %48, %cst_19 [2] : vector<2x128x128xf32> to vector<2x128xf32>
    %50 = vector.shape_cast %49 : vector<2x128xf32> to vector<2x128x1xf32>
    %51 = tpu.reciprocal %50 {approx = true} : vector<2x128x1xf32> -> vector<2x128x1xf32>
    %52 = vector.broadcast %51 : vector<2x128x1xf32> to vector<2x128x128xf32>
    %53 = arith.mulf %48, %52 : vector<2x128x128xf32>
    %54 = arith.truncf %53 : vector<2x128x128xf32> to vector<2x128x128xbf16>
    "tpu.trace_start"() <{level = 10 : i32, message = "bqk,bkd->bqd"}> : () -> ()
    %cst_20 = arith.constant dense<0.000000e+00> : vector<2x128x8xf32>
    %55 = tpu.matmul %54, %42, %cst_20 {dimension_numbers = #tpu.dot_dimension_numbers<[2], [1], [1], [2], [0, 0, 0, 1, 1, 2], [0], [0]>} : vector<2x128x128xbf16>, vector<2x128x8xbf16>, vector<2x128x8xf32> -> vector<2x128x8xf32>
    "tpu.trace_stop"() : () -> ()
    %c0_21 = arith.constant 0 : index
    %c0_22 = arith.constant 0 : index
    %c16 = arith.constant 16 : index
    %56 = vector.load %arg6[%c0_21, %c0_22, %c16] : memref<2x128x32xf32, #tpu.memory_space<vmem>>, vector<2x128x8xf32>
    tpu.vector_store %arg6[%c0_21, %c0_22, %c16], %55 {strides = array<i32>} : memref<2x128x32xf32, #tpu.memory_space<vmem>>, vector<2x128x8xf32>,
    %57 = vector.extract_strided_slice %5 {offsets = [0, 0, 24], sizes = [2, 128, 8], strides = [1, 1, 1]} : vector<2x128x96xbf16> to vector<2x128x8xbf16>
    %58 = vector.extract_strided_slice %5 {offsets = [0, 0, 56], sizes = [2, 128, 8], strides = [1, 1, 1]} : vector<2x128x96xbf16> to vector<2x128x8xbf16>
    %59 = vector.extract_strided_slice %5 {offsets = [0, 0, 88], sizes = [2, 128, 8], strides = [1, 1, 1]} : vector<2x128x96xbf16> to vector<2x128x8xbf16>
    "tpu.trace_start"() <{level = 10 : i32, message = "bqd,bkd->bqk"}> : () -> ()
    %cst_23 = arith.constant dense<0.000000e+00> : vector<2x128x128xf32>
    %60 = tpu.matmul %57, %58, %cst_23 {dimension_numbers = #tpu.dot_dimension_numbers<[2], [2], [1], [1], [0, 0, 0, 1, 1, 1], [0], [0]>} : vector<2x128x8xbf16>, vector<2x128x8xbf16>, vector<2x128x128xf32> -> vector<2x128x128xf32>
    "tpu.trace_stop"() : () -> ()
    %cst_24 = arith.constant dense<0xFF800000> : vector<2x128xf32>
    %61 = vector.multi_reduction <maximumf>, %60, %cst_24 [2] : vector<2x128x128xf32> to vector<2x128xf32>
    %62 = vector.shape_cast %61 : vector<2x128xf32> to vector<2x128x1xf32>
    %63 = vector.broadcast %62 : vector<2x128x1xf32> to vector<2x128x128xf32>
    %64 = arith.subf %60, %63 : vector<2x128x128xf32>
    %65 = math.exp %64 : vector<2x128x128xf32>
    %cst_25 = arith.constant dense<0.000000e+00> : vector<2x128xf32>
    %66 = vector.multi_reduction <add>, %65, %cst_25 [2] : vector<2x128x128xf32> to vector<2x128xf32>
    %67 = vector.shape_cast %66 : vector<2x128xf32> to vector<2x128x1xf32>
    %68 = tpu.reciprocal %67 {approx = true} : vector<2x128x1xf32> -> vector<2x128x1xf32>
    %69 = vector.broadcast %68 : vector<2x128x1xf32> to vector<2x128x128xf32>
    %70 = arith.mulf %65, %69 : vector<2x128x128xf32>
    %71 = arith.truncf %70 : vector<2x128x128xf32> to vector<2x128x128xbf16>
    "tpu.trace_start"() <{level = 10 : i32, message = "bqk,bkd->bqd"}> : () -> ()
    %cst_26 = arith.constant dense<0.000000e+00> : vector<2x128x8xf32>
    %72 = tpu.matmul %71, %59, %cst_26 {dimension_numbers = #tpu.dot_dimension_numbers<[2], [1], [1], [2], [0, 0, 0, 1, 1, 2], [0], [0]>} : vector<2x128x128xbf16>, vector<2x128x8xbf16>, vector<2x128x8xf32> -> vector<2x128x8xf32>
    "tpu.trace_stop"() : () -> ()
    %c0_27 = arith.constant 0 : index
    %c0_28 = arith.constant 0 : index
    %c24 = arith.constant 24 : index
    %73 = vector.load %arg6[%c0_27, %c0_28, %c24] : memref<2x128x32xf32, #tpu.memory_space<vmem>>, vector<2x128x8xf32>
    tpu.vector_store %arg6[%c0_27, %c0_28, %c24], %72 {strides = array<i32>} : memref<2x128x32xf32, #tpu.memory_space<vmem>>, vector<2x128x8xf32>,
    %c0_29 = arith.constant 0 : index
    %c0_30 = arith.constant 0 : index
    %c0_31 = arith.constant 0 : index
    %74 = vector.load %arg6[%c0_29, %c0_30, %c0_31] : memref<2x128x32xf32, #tpu.memory_space<vmem>>, vector<2x128x32xf32>
    %75 = arith.truncf %74 : vector<2x128x32xf32> to vector<2x128x32xbf16>
    %76 = vector.shape_cast %75 : vector<2x128x32xbf16> to vector<256x32xbf16>
    %c0_32 = arith.constant 0 : index
    %c0_33 = arith.constant 0 : index
    %77 = vector.load %arg3[%c0_32, %c0_33] : memref<32x32xbf16, #tpu.memory_space<vmem>>, vector<32x32xbf16>
    %cst_34 = arith.constant dense<0.000000e+00> : vector<256x32xf32>
    %78 = tpu.matmul %76, %77, %cst_34 {dimension_numbers = #tpu.dot_dimension_numbers<[1], [0], [0], [1], [0, 0, 1, 1], [], []>} : vector<256x32xbf16>, vector<32x32xbf16>, vector<256x32xf32> -> vector<256x32xf32>
    %c0_35 = arith.constant 0 : index
    %c0_36 = arith.constant 0 : index
    %79 = vector.load %arg4[%c0_35, %c0_36] : memref<1x32xf32, #tpu.memory_space<vmem>>, vector<1x32xf32>
    %80 = vector.broadcast %79 : vector<1x32xf32> to vector<256x32xf32>
    %81 = arith.addf %78, %80 : vector<256x32xf32>
    %82 = vector.shape_cast %81 : vector<256x32xf32> to vector<2x128x32xf32>
    %c0_37 = arith.constant 0 : index
    %c0_38 = arith.constant 0 : index
    %c0_39 = arith.constant 0 : index
    %83 = vector.load %arg5[%c0_37, %c0_38, %c0_39] : memref<2x128x32xf32, #tpu.memory_space<vmem>>, vector<2x128x32xf32>
    tpu.vector_store %arg5[%c0_37, %c0_38, %c0_39], %82 {strides = array<i32>} : memref<2x128x32xf32, #tpu.memory_space<vmem>>, vector<2x128x32xf32>,
    return
  }
  func.func @transform_0(%arg0: i32) -> (i32, i32, i32) {
    %c0_i32 = arith.constant 0 : i32
    %c0_i32_0 = arith.constant 0 : i32
    %c0_i32_1 = arith.constant 0 : i32
    return %arg0, %c0_i32, %c0_i32_0 : i32, i32, i32
  }
  func.func @transform_1(%arg0: i32) -> (i32, i32) {
    %c0_i32 = arith.constant 0 : i32
    %c0_i32_0 = arith.constant 0 : i32
    %c0_i32_1 = arith.constant 0 : i32
    return %c0_i32, %c0_i32_0 : i32, i32
  }
  func.func @transform_2(%arg0: i32) -> (i32, i32) {
    %c0_i32 = arith.constant 0 : i32
    %c0_i32_0 = arith.constant 0 : i32
    %c0_i32_1 = arith.constant 0 : i32
    return %c0_i32, %c0_i32_0 : i32, i32
  }
  func.func @transform_3(%arg0: i32) -> (i32, i32) {
    %c0_i32 = arith.constant 0 : i32
    %c0_i32_0 = arith.constant 0 : i32
    %c0_i32_1 = arith.constant 0 : i32
    return %c0_i32, %c0_i32_0 : i32, i32
  }
  func.func @transform_4(%arg0: i32) -> (i32, i32, i32) {
    %c0_i32 = arith.constant 0 : i32
    %c0_i32_0 = arith.constant 0 : i32
    %c0_i32_1 = arith.constant 0 : i32
    return %arg0, %c0_i32, %c0_i32_0 : i32, i32, i32
  }
}

</mosaic_0001>

<bundles_post_ra>
// kernel: tpu_custom_call.1
= control target key start
LH: loop header
LB: loop body
LE: loop exit
PB: predicated region body
PF: predicated region fallthrough
CT: control target
= control target key end

     0   :  { %vm146_vm0 = vcmask 261120   ;;  %vm396_vm1 = vcmask 64512   ;;  %s6392_s24 = smov 64   ;;  %s6394_s25 = smov 120   ;;  %vm2317_vm2 = vcmask 130112   ;;  %vm3378_vm3 = vcmask 195712   ;;  %s8988_s1 = inlined_call_operand.vmem [shape: bf16[32,96], index: 1, kind: input, shape index: {}]   ;;  %s8989_s0 = inlined_call_operand.vmem [shape: bf16[2,128,32], index: 0, kind: input, shape index: {}]   ;;  %s8990_s2 = inlined_call_operand.vmem [shape: bf16[32,32], index: 2, kind: input, shape index: {}]   ;;  %s8991_s3 = inlined_call_operand.vmem [shape: f32[1,32], index: 3, kind: input, shape index: {}]   ;;  %s8992_s4 = inlined_call_operand.vmem [shape: f32[2,128,32], index: 4, kind: output, shape index: {}]  }
   0x1   :  { %v5859_v0 = vld [vmem:[%s8988_s1 + $0x8] sm:$0xff]   ;;  %v5860_v1 = vld [vmem:[%s8988_s1] sm:$0xff]   ;;  %v5863_v4 = vld [vmem:[%s8989_s0 + $0x10] sm:$0xff]   ;;  %s6393_s1 = smov 88   ;;  %s6395_s26 = smov 56   ;;  %vm4439_vm4 = vcmask 261312  }
   0x2   :  { %5197 = vmatprep.subr.bf16.mxu0 %v5859_v0  ;;  %v5861_v2 = vld [vmem:[%s8989_s0] sm:$0xff]   ;;  %v5862_v3 = vld [vmem:[%s8989_s0 + $0x8] sm:$0xff]   ;;  %v5864_v5 = vld [vmem:[%s8989_s0 + $0x18] sm:$0xff]   ;;  %s6396_s27 = smov 80   ;;  %s6397_s28 = smov 112  }
   0x3   :  { %5198 = vmatpush3.bf16.msra.mxu0 %v5859_v0  ;;  %5201 = vmatprep.mubr.msk.bf16.mxu0 %vm146_vm0, %v5861_v2  ;;  %v5865_v6 = vld [vmem:[%s8989_s0 + $0x20] sm:$0xff]   ;;  %v5866_v7 = vld [vmem:[%s8989_s0 + $0x28] sm:$0xff]   ;;  %v5867_v8 = vld [vmem:[%s8989_s0 + $0x30] sm:$0xff]   ;;  %s6398_s29 = smov 48   ;;  %s6399_s30 = smov 72  }
   0x4   :  { %5199 = vmatprep.subr.bf16.mxu0 %v5860_v1  ;;  %v5868_v9 = vld [vmem:[%s8989_s0 + $0x38] sm:$0xff]   ;;  %v5869_v10 = vld [vmem:[%s8989_s0 + $0x40] sm:$0xff]   ;;  %v5870_v11 = vld [vmem:[%s8989_s0 + $0x48] sm:$0xff]   ;;  %s6400_s5 = smov 104   ;;  %s6401_s6 = smov 40  }
   0x5   :  { %v5871_v12 = vld [vmem:[%s8989_s0 + $0x50] sm:$0xff]   ;;  %v5872_v13 = vld [vmem:[%s8989_s0 + $0x58] sm:$0xff]   ;;  %v5873_v14 = vld [vmem:[%s8989_s0 + $0x60] sm:$0xff]   ;;  %s6402_s7 = smov 8   ;;  %s6403_s8 = smov 16  }
   0x6   :  { %v5874_v15 = vld [vmem:[%s8989_s0 + $0x68] sm:$0xff]   ;;  %v5875_v16 = vld [vmem:[%s8989_s0 + $0x70] sm:$0xff]   ;;  %v5876_v17 = vld [vmem:[%s8989_s0 + $0x78] sm:$0xff]   ;;  %s6391_s0 = smov 96   ;;  %s6404_s11 = smov 24  }
   0x7   :  { %5200 = vmatpush3.bf16.msra.mxu0 %v5860_v1 }
   0xa   :  { %5202 = vmatmul.mubr.msk.bf16.vlgmr.msra.gmra.mxu0 %vm146_vm0, %v5862_v3 }
   0xb   :  { %5205 = vmatprep.mubr.msk.bf16.mxu0 %vm146_vm0, %v5863_v4 }
  0x12   :  { %5206 = vmatmul.mubr.msk.bf16.gmra.mxu0 %vm146_vm0, %v5864_v5 }
  0x13   :  { %5209 = vmatprep.mubr.msk.bf16.mxu0 %vm146_vm0, %v5865_v6 }
  0x1a   :  { %5210 = vmatmul.mubr.msk.bf16.gmra.mxu0 %vm146_vm0, %v5866_v7 }
  0x1b   :  { %5213 = vmatprep.mubr.msk.bf16.mxu0 %vm146_vm0, %v5867_v8 }
  0x22   :  { %5214 = vmatmul.mubr.msk.bf16.gmra.mxu0 %vm146_vm0, %v5868_v9 }
  0x23   :  { %5217 = vmatprep.mubr.msk.bf16.mxu0 %vm146_vm0, %v5869_v10 }
  0x2a   :  { %5218 = vmatmul.mubr.msk.bf16.gmra.mxu0 %vm146_vm0, %v5870_v11 }
  0x2b   :  { %5221 = vmatprep.mubr.msk.bf16.mxu0 %vm146_vm0, %v5871_v12 }
  0x32   :  { %5222 = vmatmul.mubr.msk.bf16.gmra.mxu0 %vm146_vm0, %v5872_v13 }
  0x33   :  { %5225 = vmatprep.mubr.msk.bf16.mxu0 %vm146_vm0, %v5873_v14 }
  0x3a   :  { %5226 = vmatmul.mubr.msk.bf16.gmra.mxu0 %vm146_vm0, %v5874_v15 }
  0x3b   :  { %5229 = vmatprep.mubr.msk.bf16.mxu0 %vm146_vm0, %v5875_v16 }
  0x42   :  { %5230 = vmatmul.mubr.msk.bf16.gmra.mxu0 %vm146_vm0, %v5876_v17 }
  0xca   :  { %v5203_v18 = vpop.f32.mrf.mxu0 }
  0xcc   :  { %v229_v19 = vpop.f32.mrf.mxu0 }
  0xce   :  { %v5204_v20 = vpop.f32.mrf.mxu0 }
  0xcf   :  { %v6532_v49 = vpack.c.bf16 %v5204_v20, %v5203_v18 }
  0xd0   :  { %v232_v21 = vpop.f32.mrf.mxu0 }
  0xd1   :  { %v6500_v22 = vpack.c.bf16 %v232_v21, %v229_v19 }
  0xd2   :  { %v5207_v23 = vpop.f32.mrf.mxu0 }
  0xd3   :  { %5249 = vmatprep.mubr.msk.bf16.mxu1 %vm396_vm1, %v6500_v22 }
  0xd4   :  { %v245_v24 = vpop.f32.mrf.mxu0 }
  0xd6   :  { %v5208_v25 = vpop.f32.mrf.mxu0 }
  0xd7   :  { %v6520_v42 = vpack.c.bf16 %v5208_v25, %v5207_v23 }
  0xd8   :  { %v248_v26 = vpop.f32.mrf.mxu0 }
  0xd9   :  { %9040 = vst [vmem:[#allocation3_spill] sm:$0xff] %v6520_v42  ;;  %v6526_v46 = vpack.c.bf16 %v248_v26, %v245_v24 }
  0xda   :  { %v5211_v27 = vpop.f32.mrf.mxu0 }
  0xdc   :  { %v261_v28 = vpop.f32.mrf.mxu0 }
  0xde   :  { %v5212_v29 = vpop.f32.mrf.mxu0 }
  0xdf   :  { %v6504_v30 = vpack.c.bf16 %v5212_v29, %v5211_v27 }
  0xe0   :  { %v264_v31 = vpop.f32.mrf.mxu0 }
  0xe1   :  { %390 = vrot.lane.b32.xlu1 %v6504_v30, %s6391_s0  ;;  %v6508_v33 = vpack.c.bf16 %v264_v31, %v261_v28 }
  0xe2   :  { %v5215_v32 = vpop.f32.mrf.mxu0 }
  0xe4   :  { %v277_v34 = vpop.f32.mrf.mxu0 }
  0xe5   :  { %388 = vrot.lane.b32.xlu1 %v6508_v33, %s6391_s0 }
  0xe6   :  { %v5216_v35 = vpop.f32.mrf.mxu0 }
  0xe7   :  { %v6512_v36 = vpack.c.bf16 %v5216_v35, %v5215_v32 }
  0xe8   :  { %v280_v37 = vpop.f32.mrf.mxu0 }
  0xe9   :  { %394 = vrot.lane.b32.xlu0 %v6512_v36, %s6391_s0  ;;  %v6516_v39 = vpack.c.bf16 %v280_v37, %v277_v34 }
  0xea   :  { %v5219_v38 = vpop.f32.mrf.mxu0 }
  0xec   :  { %v293_v40 = vpop.f32.mrf.mxu0 }
  0xed   :  { %392 = vrot.lane.b32.xlu0 %v6516_v39, %s6391_s0 }
  0xee   :  { %v5220_v41 = vpop.f32.mrf.mxu0 }
  0xef   :  { %v6542_v57 = vpack.c.bf16 %v5220_v41, %v5219_v38 }
  0xf0   :  { %v296_v43 = vpop.f32.mrf.mxu0 }
  0xf1   :  { %v6522_v44 = vpack.c.bf16 %v296_v43, %v293_v40  ;;  %386 = vrot.lane.b32.xlu0 %v6520_v42, %s6391_s0  ;;  %9043 = vst [vmem:[#allocation6_spill] sm:$0xff] %v6542_v57 }
  0xf2   :  { %v5223_v45 = vpop.f32.mrf.mxu0 }
  0xf3   :  { %9041 = vst [vmem:[#allocation4_spill] sm:$0xff] %v6522_v44  ;;  %5281 = vmatprep.mubr.msk.bf16.mxu0 %vm396_vm1, %v6522_v44 }
  0xf4   :  { %v309_v47 = vpop.f32.mrf.mxu0 }
  0xf5   :  { %384 = vrot.lane.b32.xlu0 %v6526_v46, %s6391_s0 }
  0xf6   :  { %v5224_v48 = vpop.f32.mrf.mxu0 }
  0xf7   :  { %v6538_v54 = vpack.c.bf16 %v5224_v48, %v5223_v45 }
  0xf8   :  { %v312_v50 = vpop.f32.mrf.mxu0 }
  0xf9   :  { %382 = vrot.lane.b32.xlu0 %v6532_v49, %s6391_s0  ;;  %9042 = vst [vmem:[#allocation5_spill] sm:$0xff] %v6538_v54  ;;  %v6570_v1 = vpack.c.bf16 %v312_v50, %v309_v47 }
  0xfa   :  { %v5227_v51 = vpop.f32.mrf.mxu0 }
  0xfb   :  { %9047 = vst [vmem:[#allocation10_spill] sm:$0xff] %v6570_v1 }
  0xfc   :  { %v325_v52 = vpop.f32.mrf.mxu0 }
  0xfd   :  { %380 = vrot.lane.b32.xlu0 %v6500_v22, %s6391_s0 }
  0xfe   :  { %v5228_v53 = vpop.f32.mrf.mxu0 }
  0xff   :  { %v6558_v63 = vpack.c.bf16 %v5228_v53, %v5227_v51 }
 0x100   :  { %v328_v55 = vpop.f32.mrf.mxu0 }
 0x101   :  { %556 = vrot.lane.b32.xlu0 %v6538_v54, %s6391_s0  ;;  %9045 = vst [vmem:[#allocation8_spill] sm:$0xff] %v6558_v63  ;;  %v6564_v0 = vpack.c.bf16 %v328_v55, %v325_v52 }
 0x102   :  { %v5231_v56 = vpop.f32.mrf.mxu0 }
 0x103   :  { %9046 = vst [vmem:[#allocation9_spill] sm:$0xff] %v6564_v0 }
 0x104   :  { %v341_v58 = vpop.f32.mrf.mxu0 }
 0x105   :  { %552 = vrot.lane.b32.xlu0 %v6542_v57, %s6391_s0 }
 0x106   :  { %v5232_v59 = vpop.f32.mrf.mxu0 }
 0x107   :  { %v6546_v60 = vpack.c.bf16 %v5232_v59, %v5231_v56 }
 0x108   :  { %v344_v61 = vpop.f32.mrf.mxu0 }
 0x109   :  { %1027 = vrot.lane.b32.xlu0 %v6516_v39, %s6392_s24  ;;  %564 = vrot.lane.b32.xlu1 %v6546_v60, %s6391_s0  ;;  %v6552_v62 = vpack.c.bf16 %v344_v61, %v341_v58 }
 0x10b   :  { %9044 = vst [vmem:[#allocation7_spill] sm:$0xff] %v6552_v62 }
 0x10d   :  { %1025 = vrot.lane.b32.xlu0 %v6504_v30, %s6392_s24  ;;  %562 = vrot.lane.b32.xlu1 %v6552_v62, %s6391_s0 }
 0x111   :  { %1019 = vrot.lane.b32.xlu0 %v6526_v46, %s6392_s24  ;;  %560 = vrot.lane.b32.xlu1 %v6558_v63, %s6391_s0 }
 0x115   :  { %1017 = vrot.lane.b32.xlu0 %v6532_v49, %s6392_s24  ;;  %558 = vrot.lane.b32.xlu1 %v6564_v0, %s6391_s0 }
 0x119   :  { %1146 = vrot.lane.b32.xlu0 %v6558_v63, %s6392_s24  ;;  %554 = vrot.lane.b32.xlu1 %v6570_v1, %s6391_s0 }
 0x11d   :  { %1317 = vrot.lane.b32.xlu0 %v6516_v39, %s6393_s1  ;;  %550 = vrot.lane.b32.xlu1 %v6522_v44, %s6391_s0 }
 0x121   :  { %1142 = vrot.lane.b32.xlu0 %v6538_v54, %s6392_s24  ;;  %1029 = vrot.lane.b32.xlu1 %v6512_v36, %s6392_s24 }
 0x125   :  { %1315 = vrot.lane.b32.xlu0 %v6504_v30, %s6393_s1  ;;  %1023 = vrot.lane.b32.xlu1 %v6508_v33, %s6392_s24 }
 0x129   :  { %1140 = vrot.lane.b32.xlu0 %v6570_v1, %s6392_s24  ;;  %1021 = vrot.lane.b32.xlu1 %v6520_v42, %s6392_s24 }
 0x12d   :  { %1138 = vrot.lane.b32.xlu0 %v6542_v57, %s6392_s24  ;;  %1015 = vrot.lane.b32.xlu1 %v6500_v22, %s6392_s24 }
 0x131   :  { %1136 = vrot.lane.b32.xlu0 %v6522_v44, %s6392_s24  ;;  %1150 = vrot.lane.b32.xlu1 %v6546_v60, %s6392_s24 }
 0x135   :  { %1496 = vrot.lane.b32.xlu0 %v6546_v60, %s6393_s1  ;;  %1319 = vrot.lane.b32.xlu1 %v6512_v36, %s6393_s1 }
 0x139   :  { %1307 = vrot.lane.b32.xlu0 %v6532_v49, %s6393_s1  ;;  %1144 = vrot.lane.b32.xlu1 %v6564_v0, %s6392_s24 }
 0x13d   :  { %1305 = vrot.lane.b32.xlu0 %v6500_v22, %s6393_s1  ;;  %1313 = vrot.lane.b32.xlu1 %v6508_v33, %s6393_s1 }
 0x141   :  { %1289 = vrot.lane.b32.xlu0 %v6500_v22, %s6394_s25  ;;  %1311 = vrot.lane.b32.xlu1 %v6520_v42, %s6393_s1 }
 0x145   :  { %1486 = vrot.lane.b32.xlu0 %v6570_v1, %s6393_s1  ;;  %1309 = vrot.lane.b32.xlu1 %v6526_v46, %s6393_s1 }
 0x149   :  { %1482 = vrot.lane.b32.xlu0 %v6522_v44, %s6393_s1  ;;  %1492 = vrot.lane.b32.xlu1 %v6558_v63, %s6393_s1 }
 0x14d   :  { %1468 = vrot.lane.b32.xlu0 %v6542_v57, %s6394_s25  ;;  %1490 = vrot.lane.b32.xlu1 %v6564_v0, %s6393_s1 }
 0x151   :  { %1295 = vrot.lane.b32.xlu0 %v6520_v42, %s6394_s25  ;;  %1291 = vrot.lane.b32.xlu1 %v6532_v49, %s6394_s25 }
 0x153   :  { %v391_v7 = vpop.permute.xlu1 %390 }
 0x154   :  { %v437_v10 = vsel %vm396_vm1, %v391_v7, 0 }
 0x155   :  { %1299 = vrot.lane.b32.xlu0 %v6504_v30, %s6394_s25  ;;  %1488 = vrot.lane.b32.xlu1 %v6538_v54, %s6393_s1 }
 0x157   :  { %v389_v11 = vpop.permute.xlu1 %388 }
 0x158   :  { %v434_v14 = vsel %vm396_vm1, %v389_v11, 0 }
 0x159   :  { %1303 = vrot.lane.b32.xlu0 %v6512_v36, %s6394_s25  ;;  %1484 = vrot.lane.b32.xlu1 %v6542_v57, %s6393_s1 }
 0x15b   :  { %v395_v2 = vpop.permute.xlu0 %394 }
 0x15c   :  { %5781 = vmatprep.subr.msk.bf16.mxu1 %vm396_vm1, %v395_v2  ;;  %v443_v3 = vsel %vm396_vm1, %v395_v2, 0 }
 0x15d   :  { %5234 = vmatpush3.bf16.xpose.msra.mxu1 %v443_v3  ;;  %1472 = vrot.lane.b32.xlu0 %v6538_v54, %s6394_s25 }
 0x15e   :  { %1466 = vrot.lane.b32.xlu1 %v6522_v44, %s6394_s25 }
 0x15f   :  { %v393_v4 = vpop.permute.xlu0 %392 }
 0x160   :  { %5782 = vmatprep.subr.msk.bf16.mxu1 %vm396_vm1, %v393_v4  ;;  %v440_v6 = vsel %vm396_vm1, %v393_v4, 0 }
 0x161   :  { %1148 = vrot.lane.b32.xlu0 %v6552_v62, %s6392_s24 }
 0x162   :  { %1293 = vrot.lane.b32.xlu1 %v6526_v46, %s6394_s25 }
 0x163   :  { %v387_v5 = vpop.permute.xlu0 %386 }
 0x164   :  { %v431_v18 = vsel %vm396_vm1, %v387_v5, 0 }
 0x165   :  { %5236 = vmatpush3.bf16.xpose.msra.mxu1 %v440_v6  ;;  %1494 = vrot.lane.b32.xlu0 %v6552_v62, %s6393_s1 }
 0x166   :  { %1297 = vrot.lane.b32.xlu1 %v6508_v33, %s6394_s25  ;;  %5783 = vmatprep.subr.msk.bf16.mxu1 %vm396_vm1, %v391_v7 }
 0x167   :  { %v385_v8 = vpop.permute.xlu0 %384 }
 0x168   :  { %v428_v25 = vsel %vm396_vm1, %v385_v8, 0 }
 0x16a   :  { %1301 = vrot.lane.b32.xlu1 %v6516_v39, %s6394_s25 }
 0x16b   :  { %v383_v9 = vpop.permute.xlu0 %382 }
 0x16c   :  { %v425_v32 = vsel %vm396_vm1, %v383_v9, 0 }
 0x16d   :  { %5238 = vmatpush3.bf16.xpose.msra.mxu1 %v437_v10 }
 0x16e   :  { %1470 = vrot.lane.b32.xlu1 %v6570_v1, %s6394_s25  ;;  %5784 = vmatprep.subr.msk.bf16.mxu1 %vm396_vm1, %v389_v11 }
 0x16f   :  { %v381_v12 = vpop.permute.xlu0 %380 }
 0x170   :  { %v422_v41 = vsel %vm396_vm1, %v381_v12, 0 }
 0x173   :  { %v557_v13 = vpop.permute.xlu0 %556 }
 0x174   :  { %v600_v51 = vsel %vm396_vm1, %v557_v13, 0 }
 0x175   :  { %5240 = vmatpush3.bf16.xpose.msra.mxu1 %v434_v14 }
 0x176   :  { %5785 = vmatprep.subr.msk.bf16.mxu1 %vm396_vm1, %v387_v5 }
 0x177   :  { %v6665_v15 = vpop.permute.xlu0 %552 }
 0x178   :  { %v594_v5 = vsel %vm396_vm1, %v6665_v15, 0 }
 0x17b   :  { %v6667_v16 = vpop.permute.xlu0 %1027  ;;  %v565_v17 = vpop.permute.xlu1 %564 }
 0x17c   :  { %5789 = vmatprep.subr.msk.bf16.mxu0 %vm396_vm1, %v565_v17  ;;  %v612_v19 = vsel %vm396_vm1, %v565_v17, 0 }
 0x17d   :  { %5242 = vmatpush3.bf16.xpose.msra.mxu1 %v431_v18  ;;  %5266 = vmatpush3.bf16.xpose.msra.mxu0 %v612_v19 }
 0x17e   :  { %5786 = vmatprep.subr.msk.bf16.mxu1 %vm396_vm1, %v385_v8 }
 0x17f   :  { %v6673_v20 = vpop.permute.xlu0 %1025  ;;  %v563_v21 = vpop.permute.xlu1 %562 }
 0x180   :  { %5790 = vmatprep.subr.msk.bf16.mxu0 %vm396_vm1, %v563_v21  ;;  %v609_v26 = vsel %vm396_vm1, %v563_v21, 0 }
 0x183   :  { %v6676_v23 = vpop.permute.xlu0 %1019  ;;  %v561_v24 = vpop.permute.xlu1 %560 }
 0x184   :  { %v606_v34 = vsel %vm396_vm1, %v561_v24, 0 }
 0x185   :  { %5244 = vmatpush3.bf16.xpose.msra.mxu1 %v428_v25  ;;  %5268 = vmatpush3.bf16.xpose.msra.mxu0 %v609_v26 }
 0x186   :  { %5787 = vmatprep.subr.msk.bf16.mxu1 %vm396_vm1, %v383_v9  ;;  %5791 = vmatprep.subr.msk.bf16.mxu0 %vm396_vm1, %v561_v24 }
 0x187   :  { %v6682_v27 = vpop.permute.xlu0 %1017  ;;  %v559_v28 = vpop.permute.xlu1 %558 }
 0x188   :  { %v603_v43 = vsel %vm396_vm1, %v559_v28, 0 }
 0x18b   :  { %v6684_v29 = vpop.permute.xlu0 %1146  ;;  %v555_v31 = vpop.permute.xlu1 %554 }
 0x18c   :  { %v597_v58 = vsel %vm396_vm1, %v555_v31, 0 }
 0x18d   :  { %5246 = vmatpush3.bf16.xpose.msra.mxu1 %v425_v32  ;;  %5270 = vmatpush3.bf16.xpose.msra.mxu0 %v606_v34 }
 0x18e   :  { %5788 = vmatprep.subr.msk.bf16.mxu1 %vm396_vm1, %v381_v12  ;;  %5792 = vmatprep.subr.msk.bf16.mxu0 %vm396_vm1, %v559_v28 }
 0x18f   :  { %v1318_v35 = vpop.permute.xlu0 %1317  ;;  %v551_v37 = vpop.permute.xlu1 %550 }
 0x190   :  { %v1364_v7 = vsel %vm396_vm1, %v1318_v35, 0  ;;  %v591_v10 = vsel %vm396_vm1, %v551_v37, 0 }
 0x193   :  { %v6690_v38 = vpop.permute.xlu0 %1142  ;;  %v1030_v40 = vpop.permute.xlu1 %1029 }
 0x195   :  { %5248 = vmatpush3.bf16.xpose.msra.mxu1 %v422_v41  ;;  %5272 = vmatpush3.bf16.xpose.msra.mxu0 %v603_v43 }
 0x196   :  { %5793 = vmatprep.subr.msk.bf16.mxu0 %vm396_vm1, %v557_v13 }
 0x197   :  { %v1316_v45 = vpop.permute.xlu0 %1315  ;;  %v1024_v47 = vpop.permute.xlu1 %1023 }
 0x198   :  { %v1361_v12 = vsel %vm396_vm1, %v1316_v45, 0 }
 0x19b   :  { %v6695_v48 = vpop.permute.xlu0 %1140  ;;  %v6697_v50 = vpop.permute.xlu1 %1021 }
 0x19c   :  { %5250 = vmatmul.mubr.msk.bf16.vlgmr.msra.gmra.mxu1 %vm396_vm1, %v6532_v49 }
 0x19d   :  { %5253 = vmatprep.mubr.msk.bf16.mxu1 %vm396_vm1, %v6526_v46  ;;  %5274 = vmatpush3.bf16.xpose.msra.mxu0 %v600_v51 }
 0x19e   :  { %5794 = vmatprep.subr.msk.bf16.mxu0 %vm396_vm1, %v555_v31 }
 0x19f   :  { %v6705_v52 = vpop.permute.xlu0 %1138  ;;  %v6707_v53 = vpop.permute.xlu1 %1015 }
 0x1a3   :  { %v6709_v55 = vpop.permute.xlu0 %1136  ;;  %v6711_v56 = vpop.permute.xlu1 %1150 }
 0x1a4   :  { %9048 = vst [vmem:[#allocation11_spill] sm:$0xff] %v6709_v55  ;;  %5254 = vmatmul.mubr.msk.bf16.gmra.mxu1 %vm396_vm1, %v6520_v42 }
 0x1a5   :  { %5257 = vmatprep.mubr.msk.bf16.mxu1 %vm396_vm1, %v6508_v33  ;;  %5276 = vmatpush3.bf16.xpose.msra.mxu0 %v597_v58 }
 0x1a6   :  { %5795 = vmatprep.subr.msk.bf16.mxu0 %vm396_vm1, %v6665_v15 }
 0x1a7   :  { %v6720_v59 = vpop.permute.xlu0 %1496  ;;  %v1320_v61 = vpop.permute.xlu1 %1319 }
 0x1a8   :  { %9049 = vst [vmem:[#allocation12_spill] sm:$0xff] %v6720_v59  ;;  %5797 = vmatprep.subr.msk.bf16.mxu1 %vm396_vm1, %v1320_v61  ;;  %v1367_v2 = vsel %vm396_vm1, %v1320_v61, 0 }
 0x1a9   :  { %5362 = vmatpush3.bf16.xpose.msra.mxu1 %v1367_v2 }
 0x1aa   :  { %5798 = vmatprep.subr.msk.bf16.mxu1 %vm396_vm1, %v1318_v35 }
 0x1ab   :  { %v1308_v3 = vpop.permute.xlu0 %1307  ;;  %v6725_v4 = vpop.permute.xlu1 %1144 }
 0x1ac   :  { %5258 = vmatmul.mubr.msk.bf16.gmra.mxu1 %vm396_vm1, %v6504_v30  ;;  %v1349_v21 = vsel %vm396_vm1, %v1308_v3, 0 }
 0x1ad   :  { %5261 = vmatprep.mubr.msk.bf16.mxu1 %vm396_vm1, %v6516_v39  ;;  %5278 = vmatpush3.bf16.xpose.msra.mxu0 %v594_v5 }
 0x1ae   :  { %5796 = vmatprep.subr.msk.bf16.mxu0 %vm396_vm1, %v551_v37 }
 0x1af   :  { %v1306_v6 = vpop.permute.xlu0 %1305  ;;  %v1314_v8 = vpop.permute.xlu1 %1313 }
 0x1b0   :  { %v1358_v14 = vsel %vm396_vm1, %v1314_v8, 0  ;;  %v1346_v25 = vsel %vm396_vm1, %v1306_v6, 0 }
 0x1b1   :  { %5364 = vmatpush3.bf16.xpose.msra.mxu1 %v1364_v7 }
 0x1b2   :  { %5799 = vmatprep.subr.msk.bf16.mxu1 %vm396_vm1, %v1316_v45 }
 0x1b3   :  { %v1290_v9 = vpop.permute.xlu0 %1289  ;;  %v1312_v11 = vpop.permute.xlu1 %1311 }
 0x1b4   :  { %5262 = vmatmul.mubr.msk.bf16.gmra.mxu1 %vm396_vm1, %v6512_v36  ;;  %v1355_v17 = vsel %vm396_vm1, %v1312_v11, 0 }
 0x1b5   :  { %5280 = vmatpush3.bf16.xpose.msra.mxu0 %v591_v10  ;;  %5377 = vmatprep.mubr.msk.bf16.mxu1 %vm396_vm1, %v1290_v9 }
 0x1b6   :  { %5297 = vmatprep.subr.bf16.mxu0 %v1030_v40 }
 0x1b7   :  { %v1310_v13 = vpop.permute.xlu1 %1309  ;;  %v6785_v24 = vpop.permute.xlu0 %1486 }
 0x1b8   :  { %v1352_v19 = vsel %vm396_vm1, %v1310_v13, 0  ;;  %9054 = vst [vmem:[#allocation17_spill] sm:$0xff] %v6785_v24 }
 0x1b9   :  { %5366 = vmatpush3.bf16.xpose.msra.mxu1 %v1361_v12 }
 0x1ba   :  { %5800 = vmatprep.subr.msk.bf16.mxu1 %vm396_vm1, %v1314_v8 }
 0x1bb   :  { %v6751_v15 = vpop.permute.xlu1 %1492 }
 0x1bc   :  { %5282 = vmatmul.mubr.msk.bf16.vlgmr.msra.gmra.mxu0 %vm396_vm1, %v6542_v57  ;;  %9050 = vst [vmem:[#allocation13_spill] sm:$0xff] %v6751_v15 }
 0x1bd   :  { %5285 = vmatprep.mubr.msk.bf16.mxu0 %vm396_vm1, %v6570_v1  ;;  %5298 = vmatpush3.bf16.msra.mxu0 %v1030_v40 }
 0x1be   :  { %5299 = vmatprep.subr.bf16.mxu0 %v6667_v16 }
 0x1c1   :  { %5300 = vmatpush3.bf16.msra.mxu0 %v6667_v16  ;;  %5368 = vmatpush3.bf16.xpose.msra.mxu1 %v1358_v14  ;;  %v6759_v16 = vpop.permute.xlu1 %1490 }
 0x1c2   :  { %5301 = vmatprep.subr.bf16.mxu0 %v6673_v20  ;;  %5801 = vmatprep.subr.msk.bf16.mxu1 %vm396_vm1, %v1312_v11  ;;  %9051 = vst [vmem:[#allocation14_spill] sm:$0xff] %v6759_v16 }
 0x1c4   :  { %5286 = vmatmul.mubr.msk.bf16.gmra.mxu0 %vm396_vm1, %v6538_v54 }
 0x1c5   :  { %5289 = vmatprep.mubr.msk.bf16.mxu0 %vm396_vm1, %v6564_v0  ;;  %5302 = vmatpush3.bf16.msra.mxu0 %v6673_v20  ;;  %v1292_v18 = vpop.permute.xlu1 %1291 }
 0x1c6   :  { %5303 = vmatprep.subr.bf16.mxu0 %v1024_v47 }
 0x1c9   :  { %5304 = vmatpush3.bf16.msra.mxu0 %v1024_v47  ;;  %5370 = vmatpush3.bf16.xpose.msra.mxu1 %v1355_v17  ;;  %v6776_v20 = vpop.permute.xlu1 %1488 }
 0x1ca   :  { %5305 = vmatprep.subr.bf16.mxu0 %v6697_v50  ;;  %5802 = vmatprep.subr.msk.bf16.mxu1 %vm396_vm1, %v1310_v13  ;;  %9052 = vst [vmem:[#allocation15_spill] sm:$0xff] %v6776_v20 }
 0x1cc   :  { %5290 = vmatmul.mubr.msk.bf16.gmra.mxu0 %vm396_vm1, %v6558_v63 }
 0x1cd   :  { %5293 = vmatprep.mubr.msk.bf16.mxu0 %vm396_vm1, %v6552_v62  ;;  %5306 = vmatpush3.bf16.msra.mxu0 %v6697_v50 }
 0x1ce   :  { %5307 = vmatprep.subr.bf16.mxu0 %v6676_v23 }
 0x1d1   :  { %5308 = vmatpush3.bf16.msra.mxu0 %v6676_v23  ;;  %5372 = vmatpush3.bf16.xpose.msra.mxu1 %v1352_v19  ;;  %v6783_v23 = vpop.permute.xlu1 %1484 }
 0x1d2   :  { %5309 = vmatprep.subr.bf16.mxu0 %v6682_v27  ;;  %5803 = vmatprep.subr.msk.bf16.mxu1 %vm396_vm1, %v1308_v3  ;;  %9053 = vst [vmem:[#allocation16_spill] sm:$0xff] %v6783_v23 }
 0x1d4   :  { %5294 = vmatmul.mubr.msk.bf16.gmra.mxu0 %vm396_vm1, %v6546_v60 }
 0x1d5   :  { %5310 = vmatpush3.bf16.msra.mxu0 %v6682_v27  ;;  %v6788_v26 = vpop.permute.xlu1 %1466  ;;  %v6790_v27 = vpop.permute.xlu0 %1482 }
 0x1d6   :  { %5311 = vmatprep.subr.bf16.mxu0 %v6707_v53  ;;  %9055 = vst [vmem:[#allocation18_spill] sm:$0xff] %v6788_v26  ;;  %9056 = vst [vmem:[#allocation19_spill] sm:$0xff] %v6790_v27 }
 0x1d9   :  { %5312 = vmatpush3.bf16.msra.mxu0 %v6707_v53  ;;  %5374 = vmatpush3.bf16.xpose.msra.mxu1 %v1349_v21  ;;  %v1294_v28 = vpop.permute.xlu1 %1293  ;;  %v6793_v31 = vpop.permute.xlu0 %1468 }
 0x1da   :  { %5329 = vmatprep.subr.bf16.mxu0 %v6711_v56  ;;  %5804 = vmatprep.subr.msk.bf16.mxu1 %vm396_vm1, %v1306_v6  ;;  %9057 = vst [vmem:[#allocation20_spill] sm:$0xff] %v6793_v31 }
 0x1dd   :  { %v1296_v32 = vpop.permute.xlu0 %1295  ;;  %v1298_v34 = vpop.permute.xlu1 %1297 }
 0x1e1   :  { %5376 = vmatpush3.bf16.xpose.msra.mxu1 %v1346_v25  ;;  %v1300_v35 = vpop.permute.xlu0 %1299  ;;  %v1302_v37 = vpop.permute.xlu1 %1301 }
 0x1e5   :  { %v1304_v40 = vpop.permute.xlu0 %1303  ;;  %v6906_v57 = vpop.permute.xlu1 %1470 }
 0x1e6   :  { %9060 = vst [vmem:[#allocation23_spill] sm:$0xff] %v6906_v57 }
 0x1e8   :  { %5378 = vmatmul.mubr.msk.bf16.vlgmr.msra.gmra.mxu1 %vm396_vm1, %v1292_v18 }
 0x1e9   :  { %5381 = vmatprep.mubr.msk.bf16.mxu1 %vm396_vm1, %v1294_v28  ;;  %v6899_v44 = vpop.permute.xlu0 %1472 }
 0x1ea   :  { %9058 = vst [vmem:[#allocation21_spill] sm:$0xff] %v6899_v44 }
 0x1ed   :  { %v6901_v31 = vpop.permute.xlu0 %1148 }
 0x1f0   :  { %5382 = vmatmul.mubr.msk.bf16.gmra.mxu1 %vm396_vm1, %v1296_v32 }
 0x1f1   :  { %5385 = vmatprep.mubr.msk.bf16.mxu1 %vm396_vm1, %v1298_v34  ;;  %v6903_v26 = vpop.permute.xlu0 %1494 }
 0x1f2   :  { %9059 = vst [vmem:[#allocation22_spill] sm:$0xff] %v6903_v26 }
 0x1f8   :  { %5386 = vmatmul.mubr.msk.bf16.gmra.mxu1 %vm396_vm1, %v1300_v35 }
 0x1f9   :  { %5389 = vmatprep.mubr.msk.bf16.mxu1 %vm396_vm1, %v1302_v37 }
 0x200   :  { %5390 = vmatmul.mubr.msk.bf16.gmra.mxu1 %vm396_vm1, %v1304_v40 }
 0x25c   :  { %v6801_v41 = vpop.f32.mrf.mxu1 }
 0x25d   :  { %715 = vmax.xlane.f32.xlu0 %v6801_v41 }
 0x25e   :  { %v6804_v43 = vpop.f32.mrf.mxu1 }
 0x260   :  { %v6806_v45 = vpop.f32.mrf.mxu1 }
 0x261   :  { %711 = vmax.xlane.f32.xlu0 %v6804_v43 }
 0x262   :  { %v6809_v47 = vpop.f32.mrf.mxu1 }
 0x263   :  { %713 = vmax.xlane.f32.xlu1 %v6809_v47 }
 0x264   :  { %v6812_v50 = vpop.f32.mrf.mxu1 }
 0x265   :  { %717 = vmax.xlane.f32.xlu0 %v6806_v45 }
 0x266   :  { %v6815_v51 = vpop.f32.mrf.mxu1 }
 0x267   :  { %723 = vmax.xlane.f32.xlu1 %v6812_v50 }
 0x268   :  { %v6818_v53 = vpop.f32.mrf.mxu1 }
 0x269   :  { %725 = vmax.xlane.f32.xlu0 %v6818_v53 }
 0x26a   :  { %v6821_v58 = vpop.f32.mrf.mxu1 }
 0x26b   :  { %719 = vmax.xlane.f32.xlu1 %v6815_v51 }
 0x26c   :  { %v6824_v61 = vpop.f32.mrf.mxu1 }
 0x26d   :  { %721 = vmax.xlane.f32.xlu0 %v6821_v58 }
 0x26e   :  { %v6827_v2 = vpop.f32.mrf.mxu1 }
 0x26f   :  { %731 = vmax.xlane.f32.xlu1 %v6824_v61 }
 0x270   :  { %v6830_v3 = vpop.f32.mrf.mxu1 }
 0x271   :  { %733 = vmax.xlane.f32.xlu0 %v6830_v3 }
 0x272   :  { %v6833_v5 = vpop.f32.mrf.mxu1 }
 0x273   :  { %727 = vmax.xlane.f32.xlu1 %v6827_v2 }
 0x274   :  { %v6836_v6 = vpop.f32.mrf.mxu1 }
 0x275   :  { %729 = vmax.xlane.f32.xlu0 %v6833_v5 }
 0x276   :  { %v6839_v7 = vpop.f32.mrf.mxu1 }
 0x277   :  { %739 = vmax.xlane.f32.xlu1 %v6836_v6 }
 0x278   :  { %v6842_v8 = vpop.f32.mrf.mxu1 }
 0x279   :  { %741 = vmax.xlane.f32.xlu0 %v6842_v8 }
 0x27a   :  { %v6846_v9 = vpop.f32.mrf.mxu1 }
 0x27b   :  { %735 = vmax.xlane.f32.xlu1 %v6839_v7 }
 0x27c   :  { %v6848_v10 = vpop.f32.mrf.mxu0 }
 0x27d   :  { %737 = vmax.xlane.f32.xlu0 %v6846_v9 }
 0x27e   :  { %v6851_v11 = vpop.f32.mrf.mxu0 }
 0x27f   :  { %747 = vmax.xlane.f32.xlu1 %v6848_v10 }
 0x280   :  { %v6854_v12 = vpop.f32.mrf.mxu0 }
 0x281   :  { %749 = vmax.xlane.f32.xlu0 %v6854_v12 }
 0x282   :  { %v6857_v13 = vpop.f32.mrf.mxu0 }
 0x283   :  { %743 = vmax.xlane.f32.xlu1 %v6851_v11 }
 0x284   :  { %v6860_v14 = vpop.f32.mrf.mxu0 }
 0x285   :  { %745 = vmax.xlane.f32.xlu0 %v6857_v13 }
 0x286   :  { %v6863_v17 = vpop.f32.mrf.mxu0 }
 0x288   :  { %v6865_v18 = vpop.f32.mrf.mxu0 }
 0x289   :  { %757 = vmax.xlane.f32.xlu0 %v6865_v18 }
 0x28a   :  { %v6868_v19 = vpop.f32.mrf.mxu0 }
 0x28c   :  { %v6870_v21 = vpop.f32.mrf.mxu0 }
 0x28d   :  { %753 = vmax.xlane.f32.xlu0 %v6868_v19 }
 0x28e   :  { %v6873_v25 = vpop.f32.mrf.mxu0 }
 0x290   :  { %v6875_v28 = vpop.f32.mrf.mxu0 }
 0x291   :  { %765 = vmax.xlane.f32.xlu0 %v6875_v28 }
 0x292   :  { %v6878_v32 = vpop.f32.mrf.mxu0 }
 0x294   :  { %1474 = vrot.lane.b32.xlu1 %v6564_v0, %s6394_s25  ;;  %v6883_v34 = vpop.f32.mrf.mxu0 }
 0x295   :  { %761 = vmax.xlane.f32.xlu0 %v6878_v32 }
 0x296   :  { %v6886_v35 = vpop.f32.mrf.mxu0 }
 0x298   :  { %v6889_v37 = vpop.f32.mrf.mxu0 }
 0x299   :  { %771 = vmax.xlane.f32.xlu0 %v6883_v34 }
 0x29a   :  { %v6892_v40 = vpop.f32.mrf.mxu0 }
 0x29d   :  { %767 = vmax.xlane.f32.xlu0 %v6886_v35 }
 0x2a1   :  { %773 = vmax.xlane.f32.xlu0 %v6889_v37 }
 0x2a5   :  { %769 = vmax.xlane.f32.xlu0 %v6892_v40 }
 0x2b8   :  { %755 = vmax.xlane.f32.xlu1 %v6860_v14 }
 0x2bc   :  { %751 = vmax.xlane.f32.xlu1 %v6863_v17 }
 0x2c0   :  { %763 = vmax.xlane.f32.xlu1 %v6870_v21 }
 0x2c4   :  { %759 = vmax.xlane.f32.xlu1 %v6873_v25 }
 0x2e6   :  { %v716_v27 = vpop.xlane.xlu0 %715 }
 0x2e7   :  { %v777_v23 = vsub.f32 %v6801_v41, %v716_v27 }
 0x2e9   :  { %v811_v24 = vmul.f32 1.442695, %v777_v23 }
 0x2ea   :  { %v712_v0 = vpop.xlane.xlu0 %711 }
 0x2eb   :  { %5879 = vpow2.f32 %v811_v24  ;;  %v775_v20 = vsub.f32 %v6804_v43, %v712_v0 }
 0x2ec   :  { %v714_v42 = vpop.xlane.xlu1 %713 }
 0x2ed   :  { %v807_v16 = vmul.f32 1.442695, %v775_v20  ;;  %v776_v44 = vsub.f32 %v6809_v47, %v714_v42 }
 0x2ee   :  { %v718_v1 = vpop.xlane.xlu0 %717 }
 0x2ef   :  { %5881 = vpow2.f32 %v807_v16  ;;  %v778_v15 = vsub.f32 %v6806_v45, %v718_v1  ;;  %v809_v41 = vmul.f32 1.442695, %v776_v44 }
 0x2f0   :  { %v724_v54 = vpop.xlane.xlu1 %723 }
 0x2f1   :  { %v813_v26 = vmul.f32 1.442695, %v778_v15  ;;  %v781_v59 = vsub.f32 %v6812_v50, %v724_v54 }
 0x2f2   :  { %v726_v27 = vpop.xlane.xlu0 %725 }
 0x2f3   :  { %5883 = vpow2.f32 %v813_v26  ;;  %v819_v23 = vmul.f32 1.442695, %v781_v59  ;;  %v782_v0 = vsub.f32 %v6818_v53, %v726_v27 }
 0x2f4   :  { %v720_v57 = vpop.xlane.xlu1 %719 }
 0x2f5   :  { %5885 = vpow2.f32 %v819_v23  ;;  %v779_v20 = vsub.f32 %v6815_v51, %v720_v57  ;;  %v821_v43 = vmul.f32 1.442695, %v782_v0 }
 0x2f6   :  { %v722_v24 = vpop.xlane.xlu0 %721  ;;  %5887 = vpow2.f32 %v809_v41 }
 0x2f7   :  { %v815_v16 = vmul.f32 1.442695, %v779_v20  ;;  %v780_v42 = vsub.f32 %v6821_v58, %v722_v24 }
 0x2f8   :  { %v6915_v1 = vpop.eup %5879  ;;  %v732_v15 = vpop.xlane.xlu1 %731 }
 0x2f9   :  { %5889 = vpow2.f32 %v815_v16  ;;  %v817_v54 = vmul.f32 1.442695, %v780_v42  ;;  %v785_v44 = vsub.f32 %v6824_v61, %v732_v15  ;;  %875 = vadd.xlane.f32.xlu0 %v6915_v1 }
 0x2fa   :  { %v734_v59 = vpop.xlane.xlu0 %733 }
 0x2fb   :  { %5891 = vpow2.f32 %v817_v54  ;;  %v827_v26 = vmul.f32 1.442695, %v785_v44  ;;  %v786_v57 = vsub.f32 %v6830_v3, %v734_v59 }
 0x2fc   :  { %v6920_v45 = vpop.eup %5881  ;;  %v728_v47 = vpop.xlane.xlu1 %727  ;;  %5893 = vpow2.f32 %v821_v43 }
 0x2fd   :  { %v783_v50 = vsub.f32 %v6827_v2, %v728_v47  ;;  %871 = vadd.xlane.f32.xlu1 %v6920_v45  ;;  %5895 = vpow2.f32 %v827_v26  ;;  %v829_v53 = vmul.f32 1.442695, %v786_v57 }
 0x2fe   :  { %v730_v51 = vpop.xlane.xlu0 %729 }
 0x2ff   :  { %v823_v58 = vmul.f32 1.442695, %v783_v50  ;;  %v784_v61 = vsub.f32 %v6833_v5, %v730_v51 }
 0x300   :  { %v6925_v27 = vpop.eup %5883  ;;  %v740_v41 = vpop.xlane.xlu1 %739 }
 0x301   :  { %5897 = vpow2.f32 %v823_v58  ;;  %v789_v3 = vsub.f32 %v6836_v6, %v740_v41  ;;  %877 = vadd.xlane.f32.xlu0 %v6925_v27  ;;  %v825_v2 = vmul.f32 1.442695, %v784_v61 }
 0x302   :  { %v6929_v23 = vpop.eup %5885  ;;  %v742_v0 = vpop.xlane.xlu0 %741  ;;  %5899 = vpow2.f32 %v829_v53 }
 0x303   :  { %v835_v20 = vmul.f32 1.442695, %v789_v3  ;;  %883 = vadd.xlane.f32.xlu1 %v6929_v23  ;;  %v6932_v24 = vpop.eup %5887  ;;  %v790_v5 = vsub.f32 %v6842_v8, %v742_v0 }
 0x304   :  { %v736_v16 = vpop.xlane.xlu1 %735 }
 0x305   :  { %5901 = vpow2.f32 %v835_v20  ;;  %v787_v42 = vsub.f32 %v6839_v7, %v736_v16  ;;  %873 = vadd.xlane.f32.xlu0 %v6932_v24  ;;  %v837_v26 = vmul.f32 1.442695, %v790_v5 }
 0x306   :  { %v6937_v6 = vpop.eup %5889  ;;  %v738_v15 = vpop.xlane.xlu0 %737  ;;  %5903 = vpow2.f32 %v825_v2 }
 0x307   :  { %v831_v43 = vmul.f32 1.442695, %v787_v42  ;;  %v788_v54 = vsub.f32 %v6846_v9, %v738_v15  ;;  %879 = vadd.xlane.f32.xlu1 %v6937_v6 }
 0x308   :  { %v6941_v44 = vpop.eup %5891  ;;  %v748_v59 = vpop.xlane.xlu1 %747 }
 0x309   :  { %5905 = vpow2.f32 %v831_v43  ;;  %v833_v57 = vmul.f32 1.442695, %v788_v54  ;;  %v793_v8 = vsub.f32 %v6848_v10, %v748_v59  ;;  %881 = vadd.xlane.f32.xlu0 %v6941_v44  ;;  %v6945_v7 = vpop.eup %5893 }
 0x30a   :  { %v750_v47 = vpop.xlane.xlu0 %749  ;;  %v6948_v9 = vpop.eup %5895 }
 0x30b   :  { %5907 = vpow2.f32 %v833_v57  ;;  %v843_v50 = vmul.f32 1.442695, %v793_v8  ;;  %885 = vadd.xlane.f32.xlu1 %v6945_v7  ;;  %v794_v61 = vsub.f32 %v6854_v12, %v750_v47 }
 0x30c   :  { %v744_v51 = vpop.xlane.xlu1 %743  ;;  %5909 = vpow2.f32 %v837_v26 }
 0x30d   :  { %v791_v53 = vsub.f32 %v6851_v11, %v744_v51  ;;  %891 = vadd.xlane.f32.xlu0 %v6948_v9  ;;  %5911 = vpow2.f32 %v843_v50  ;;  %v845_v11 = vmul.f32 1.442695, %v794_v61 }
 0x30e   :  { %v6952_v58 = vpop.eup %5897  ;;  %v746_v10 = vpop.xlane.xlu0 %745 }
 0x30f   :  { %v839_v41 = vmul.f32 1.442695, %v791_v53  ;;  %v792_v3 = vsub.f32 %v6857_v13, %v746_v10  ;;  %887 = vadd.xlane.f32.xlu1 %v6952_v58  ;;  %v6957_v0 = vpop.eup %5899 }
 0x310   :  { %v6991_v8 = vpop.permute.xlu1 %1474 }
 0x311   :  { %v841_v2 = vmul.f32 1.442695, %v792_v3  ;;  %893 = vadd.xlane.f32.xlu0 %v6957_v0  ;;  %5913 = vpow2.f32 %v839_v41  ;;  %9063 = vst [vmem:[#allocation26_spill] sm:$0xff] %v6991_v8 }
 0x312   :  { %v6960_v20 = vpop.eup %5901  ;;  %v758_v59 = vpop.xlane.xlu0 %757 }
 0x313   :  { %5915 = vpow2.f32 %v841_v2  ;;  %899 = vadd.xlane.f32.xlu1 %v6960_v20  ;;  %v6963_v16 = vpop.eup %5903  ;;  %v798_v61 = vsub.f32 %v6865_v18, %v758_v59 }
 0x314   :  { %5917 = vpow2.f32 %v845_v11 }
 0x315   :  { %889 = vadd.xlane.f32.xlu0 %v6963_v16 }
 0x316   :  { %v6966_v12 = vpop.eup %5905  ;;  %v754_v26 = vpop.xlane.xlu0 %753 }
 0x317   :  { %895 = vadd.xlane.f32.xlu1 %v6966_v12  ;;  %v796_v3 = vsub.f32 %v6868_v19, %v754_v26 }
 0x318   :  { %v6969_v13 = vpop.eup %5907 }
 0x319   :  { %897 = vadd.xlane.f32.xlu0 %v6969_v13  ;;  %v6972_v5 = vpop.eup %5909  ;;  %v849_v8 = vmul.f32 1.442695, %v796_v3 }
 0x31a   :  { %v6975_v42 = vpop.eup %5911  ;;  %v766_v57 = vpop.xlane.xlu0 %765 }
 0x31b   :  { %901 = vadd.xlane.f32.xlu1 %v6972_v5  ;;  %9061 = vst [vmem:[#allocation24_spill] sm:$0xff] %v6975_v42  ;;  %v802_v18 = vsub.f32 %v6875_v28, %v766_v57 }
 0x31d   :  { %907 = vadd.xlane.f32.xlu0 %v6975_v42 }
 0x31e   :  { %v6978_v15 = vpop.eup %5913  ;;  %v762_v47 = vpop.xlane.xlu0 %761 }
 0x31f   :  { %v800_v26 = vsub.f32 %v6878_v32, %v762_v47 }
 0x320   :  { %v6980_v43 = vpop.eup %5915 }
 0x321   :  { %905 = vadd.xlane.f32.xlu1 %v6980_v43  ;;  %903 = vadd.xlane.f32.xlu0 %v6978_v15  ;;  %v6984_v54 = vpop.eup %5917 }
 0x322   :  { %9062 = vst [vmem:[#allocation25_spill] sm:$0xff] %v6984_v54  ;;  %v772_v51 = vpop.xlane.xlu0 %771 }
 0x325   :  { %909 = vadd.xlane.f32.xlu0 %v6984_v54 }
 0x326   :  { %v768_v54 = vpop.xlane.xlu0 %767 }
 0x32a   :  { %v774_v19 = vpop.xlane.xlu0 %773 }
 0x32e   :  { %v770_v28 = vpop.xlane.xlu0 %769 }
 0x332   :  { %1478 = vrot.lane.b32.xlu1 %v6552_v62, %s6394_s25  ;;  %v853_v62 = vmul.f32 1.442695, %v798_v61  ;;  %v803_v61 = vsub.f32 %v6886_v35, %v768_v54  ;;  %v804_v35 = vsub.f32 %v6892_v40, %v770_v28 }
 0x33b   :  { %1476 = vrot.lane.b32.xlu0 %v6558_v63, %s6394_s25  ;;  %v6997_v63 = vpop.f32.mrf.mxu1 }
 0x33d   :  { %v7002_v59 = vpop.f32.mrf.mxu1 }
 0x33e   :  { %9064 = vst [vmem:[#allocation27_spill] sm:$0xff] %v7002_v59 }
 0x341   :  { %v756_v50 = vpop.xlane.xlu1 %755 }
 0x342   :  { %v797_v53 = vsub.f32 %v6860_v14, %v756_v50 }
 0x344   :  { %v851_v2 = vmul.f32 1.442695, %v797_v53 }
 0x345   :  { %v752_v10 = vpop.xlane.xlu1 %751 }
 0x346   :  { %v795_v41 = vsub.f32 %v6863_v17, %v752_v10  ;;  %v861_v10 = vmul.f32 1.442695, %v802_v18 }
 0x348   :  { %v847_v11 = vmul.f32 1.442695, %v795_v41  ;;  %v7006_v41 = vpop.f32.mrf.mxu1 }
 0x349   :  { %v764_v42 = vpop.xlane.xlu1 %763  ;;  %9065 = vst [vmem:[#allocation28_spill] sm:$0xff] %v7006_v41 }
 0x34a   :  { %5919 = vpow2.f32 %v847_v11  ;;  %v801_v55 = vsub.f32 %v6870_v21, %v764_v42  ;;  %v857_v21 = vmul.f32 1.442695, %v800_v26  ;;  %v806_v42 = vsub.f32 %v6889_v37, %v774_v19  ;;  %v7012_v32 = vpop.f32.mrf.mxu1 }
 0x34b   :  { %5921 = vpow2.f32 %v851_v2  ;;  %v865_v37 = vmul.f32 1.442695, %v804_v35 }
 0x34c   :  { %5923 = vpow2.f32 %v853_v62  ;;  %v859_v50 = vmul.f32 1.442695, %v801_v55  ;;  %v805_v62 = vsub.f32 %v6883_v34, %v772_v51  ;;  %v869_v34 = vmul.f32 1.442695, %v806_v42  ;;  %v7021_v47 = vpop.f32.mrf.mxu1 }
 0x34d   :  { %v760_v14 = vpop.xlane.xlu1 %759  ;;  %5925 = vpow2.f32 %v849_v8 }
 0x34e   :  { %v799_v17 = vsub.f32 %v6873_v25, %v760_v14  ;;  %v863_v25 = vmul.f32 1.442695, %v803_v61  ;;  %v867_v55 = vmul.f32 1.442695, %v805_v62  ;;  %v7029_v3 = vpop.f32.mrf.mxu1 }
 0x350   :  { %v855_v53 = vmul.f32 1.442695, %v799_v17  ;;  %v7037_v14 = vpop.f32.mrf.mxu1 }
 0x351   :  { %9068 = vst [vmem:[#allocation31_spill] sm:$0xff] %v7037_v14 }
 0x352   :  { %5927 = vpow2.f32 %v855_v53  ;;  %v7045_v19 = vpop.f32.mrf.mxu1 }
 0x353   :  { %5929 = vpow2.f32 %v859_v50  ;;  %9070 = vst [vmem:[#allocation33_spill] sm:$0xff] %v7045_v19 }
 0x354   :  { %5931 = vpow2.f32 %v861_v10  ;;  %v7053_v53 = vpop.f32.mrf.mxu1 }
 0x355   :  { %5933 = vpow2.f32 %v857_v21 }
 0x356   :  { %5935 = vpow2.f32 %v863_v25  ;;  %v7059_v61 = vpop.f32.mrf.mxu1 }
 0x357   :  { %v7010_v57 = vpop.eup %5919  ;;  %5937 = vpow2.f32 %v867_v55 }
 0x358   :  { %911 = vadd.xlane.f32.xlu1 %v7010_v57  ;;  %v7016_v54 = vpop.eup %5921  ;;  %5939 = vpow2.f32 %v869_v34  ;;  %v7062_v21 = vpop.f32.mrf.mxu1 }
 0x359   :  { %v7019_v8 = vpop.eup %5923  ;;  %5941 = vpow2.f32 %v865_v37  ;;  %9074 = vst [vmem:[#allocation37_spill] sm:$0xff] %v7062_v21 }
 0x35a   :  { %915 = vadd.xlane.f32.xlu0 %v7016_v54  ;;  %v7024_v51 = vpop.eup %5925  ;;  %v7065_v62 = vpop.f32.mrf.mxu1 }
 0x35b   :  { %9075 = vst [vmem:[#allocation38_spill] sm:$0xff] %v7065_v62 }
 0x35c   :  { %917 = vadd.xlane.f32.xlu1 %v7019_v8  ;;  %v7068_v28 = vpop.f32.mrf.mxu1 }
 0x35e   :  { %913 = vadd.xlane.f32.xlu0 %v7024_v51  ;;  %v7071_v25 = vpop.f32.mrf.mxu1 }
 0x35f   :  { %v7027_v40 = vpop.eup %5927 }
 0x360   :  { %919 = vadd.xlane.f32.xlu1 %v7027_v40  ;;  %v7032_v2 = vpop.eup %5929  ;;  %v7074_v42 = vpop.f32.mrf.mxu1 }
 0x361   :  { %9066 = vst [vmem:[#allocation29_spill] sm:$0xff] %v7032_v2  ;;  %v7035_v11 = vpop.eup %5931  ;;  %9076 = vst [vmem:[#allocation39_spill] sm:$0xff] %v7074_v42 }
 0x362   :  { %923 = vadd.xlane.f32.xlu0 %v7032_v2  ;;  %9067 = vst [vmem:[#allocation30_spill] sm:$0xff] %v7035_v11  ;;  %v7040_v18 = vpop.eup %5933  ;;  %v7079_v35 = vpop.f32.mrf.mxu1 }
 0x363   :  { %v7043_v17 = vpop.eup %5935  ;;  %9077 = vst [vmem:[#allocation40_spill] sm:$0xff] %v7079_v35 }
 0x364   :  { %925 = vadd.xlane.f32.xlu1 %v7035_v11  ;;  %9069 = vst [vmem:[#allocation32_spill] sm:$0xff] %v7043_v17  ;;  %v7048_v26 = vpop.eup %5937 }
 0x365   :  { %9071 = vst [vmem:[#allocation34_spill] sm:$0xff] %v7048_v26  ;;  %v7051_v50 = vpop.eup %5939 }
 0x366   :  { %921 = vadd.xlane.f32.xlu0 %v7040_v18  ;;  %9072 = vst [vmem:[#allocation35_spill] sm:$0xff] %v7051_v50  ;;  %v7056_v10 = vpop.eup %5941 }
 0x367   :  { %9073 = vst [vmem:[#allocation36_spill] sm:$0xff] %v7056_v10 }
 0x368   :  { %927 = vadd.xlane.f32.xlu1 %v7043_v17 }
 0x36a   :  { %931 = vadd.xlane.f32.xlu0 %v7048_v26 }
 0x36c   :  { %933 = vadd.xlane.f32.xlu1 %v7051_v50 }
 0x36e   :  { %929 = vadd.xlane.f32.xlu0 %v7056_v10 }
 0x370   :  { %1643 = vmax.xlane.f32.xlu1 %v7002_v59 }
 0x374   :  { %1649 = vmax.xlane.f32.xlu1 %v7006_v41 }
 0x378   :  { %1653 = vmax.xlane.f32.xlu1 %v7045_v19 }
 0x37c   :  { %1657 = vmax.xlane.f32.xlu1 %v7037_v14 }
 0x380   :  { %1661 = vmax.xlane.f32.xlu1 %v7065_v62 }
 0x382   :  { %v876_v55 = vpop.xlane.xlu0 %875 }
 0x384   :  { %1480 = vrot.lane.b32.xlu0 %v6546_v60, %s6394_s25  ;;  %1665 = vmax.xlane.f32.xlu1 %v7062_v21 }
 0x386   :  { %v872_v34 = vpop.xlane.xlu1 %871 }
 0x388   :  { %1669 = vmax.xlane.f32.xlu1 %v7079_v35 }
 0x38a   :  { %v878_v37 = vpop.xlane.xlu0 %877 }
 0x38b   :  { %5943 = vrcp.f32 %v878_v37 }
 0x38c   :  { %1673 = vmax.xlane.f32.xlu1 %v7074_v42  ;;  %v884_v14 = vpop.xlane.xlu1 %883  ;;  %5945 = vrcp.f32 %v872_v34 }
 0x38d   :  { %5947 = vrcp.f32 %v876_v55 }
 0x38e   :  { %v874_v62 = vpop.xlane.xlu0 %873 }
 0x38f   :  { %5949 = vrcp.f32 %v874_v62 }
 0x390   :  { %v880_v19 = vpop.xlane.xlu1 %879 }
 0x391   :  { %5951 = vrcp.f32 %v880_v19 }
 0x392   :  { %v882_v41 = vpop.xlane.xlu0 %881 }
 0x393   :  { %5953 = vrcp.f32 %v882_v41 }
 0x394   :  { %v886_v21 = vpop.xlane.xlu1 %885 }
 0x395   :  { %5955 = vrcp.f32 %v886_v21 }
 0x396   :  { %5957 = vrcp.f32 %v884_v14  ;;  %v892_v59 = vpop.xlane.xlu0 %891 }
 0x398   :  { %v888_v26 = vpop.xlane.xlu1 %887  ;;  %v5944_v50 = vpop.eup %5943 }
 0x399   :  { %v5946_v35 = vpop.eup %5945  ;;  %v970_v55 = vmul.f32 %v5944_v50, %v6925_v27 }
 0x39a   :  { %v894_v10 = vpop.xlane.xlu0 %893  ;;  %v5948_v37 = vpop.eup %5947  ;;  %v967_v41 = vmul.f32 %v5946_v35, %v6920_v45 }
 0x39b   :  { %5959 = vrcp.f32 %v894_v10  ;;  %v969_v62 = vmul.f32 %v5948_v37, %v6915_v1 }
 0x39c   :  { %v5950_v17 = vpop.eup %5949  ;;  %v900_v42 = vpop.xlane.xlu1 %899  ;;  %5961 = vrcp.f32 %v888_v26 }
 0x39d   :  { %1959 = vrot.lane.b32.xlu1 %v6516_v39, %s6395_s26  ;;  %v968_v14 = vmul.f32 %v5950_v17, %v6932_v24  ;;  %5963 = vrcp.f32 %v892_v59  ;;  %v1000_v11 = vpack.c.bf16 %v970_v55, %v969_v62 }
 0x39e   :  { %v5952_v19 = vpop.eup %5951  ;;  %v890_v21 = vpop.xlane.xlu0 %889 }
 0x39f   :  { %5965 = vrcp.f32 %v890_v21  ;;  %v999_v34 = vpack.c.bf16 %v968_v14, %v967_v41  ;;  %v971_v27 = vmul.f32 %v5952_v19, %v6937_v6 }
 0x3a0   :  { %v5954_v10 = vpop.eup %5953  ;;  %v896_v2 = vpop.xlane.xlu1 %895 }
 0x3a1   :  { %5967 = vrcp.f32 %v896_v2  ;;  %1957 = vrot.lane.b32.xlu1 %v6504_v30, %s6395_s26  ;;  %5313 = vmatprep.mubr.bf16.mxu0 %v999_v34  ;;  %v972_v45 = vmul.f32 %v5954_v10, %v6941_v44 }
 0x3a2   :  { %v5956_v24 = vpop.eup %5955  ;;  %v898_v17 = vpop.xlane.xlu0 %897  ;;  %5314 = vmatmul.mubr.bf16.vlgmr.msra.gmra.mxu0 %v1000_v11 }
 0x3a3   :  { %v5958_v59 = vpop.eup %5957  ;;  %5969 = vrcp.f32 %v898_v17  ;;  %5330 = vmatpush3.bf16.msra.mxu0 %v6711_v56  ;;  %1645 = vmax.xlane.f32.xlu0 %v7012_v32  ;;  %v1001_v1 = vpack.c.bf16 %v972_v45, %v971_v27  ;;  %v974_v26 = vmul.f32 %v5956_v24, %v6945_v7  ;;  %v9079_v17 = vld [vmem:[#allocation7_spill] sm:$0xff] }
 0x3a4   :  { %5331 = vmatprep.subr.bf16.mxu0 %v6901_v31  ;;  %v902_v2 = vpop.xlane.xlu1 %901  ;;  %v973_v44 = vmul.f32 %v5958_v59, %v6929_v23  ;;  %v9080_v59 = vld [vmem:[#allocation24_spill] sm:$0xff] }
 0x3a5   :  { %5971 = vrcp.f32 %v902_v2  ;;  %1955 = vrot.lane.b32.xlu1 %v6508_v33, %s6395_s26  ;;  %5317 = vmatprep.mubr.bf16.mxu0 %v1001_v1  ;;  %v9081_v2 = vld [vmem:[#allocation25_spill] sm:$0xff] }
 0x3a6   :  { %5973 = vrcp.f32 %v900_v42  ;;  %v908_v6 = vpop.xlane.xlu0 %907  ;;  %v1002_v56 = vpack.c.bf16 %v974_v26, %v973_v44  ;;  %v9084_v44 = vld [vmem:[#allocation5_spill] sm:$0xff] }
 0x3a7   :  { %5332 = vmatpush3.bf16.msra.mxu0 %v6901_v31  ;;  %1647 = vmax.xlane.f32.xlu0 %v6997_v63 }
 0x3a8   :  { %5333 = vmatprep.subr.bf16.mxu0 %v6684_v29  ;;  %v5960_v11 = vpop.eup %5959 }
 0x3a9   :  { %1951 = vrot.lane.b32.xlu1 %v6526_v46, %s6395_s26  ;;  %v5962_v7 = vpop.eup %5961  ;;  %v978_v23 = vmul.f32 %v5960_v11, %v6957_v0  ;;  %v9085_v11 = vld [vmem:[#allocation13_spill] sm:$0xff] }
 0x3aa   :  { %v904_v50 = vpop.xlane.xlu0 %903  ;;  %5318 = vmatmul.mubr.bf16.gmra.mxu0 %v1002_v56  ;;  %v906_v35 = vpop.xlane.xlu1 %905  ;;  %v975_v42 = vmul.f32 %v5962_v7, %v6952_v58  ;;  %v9086_v7 = vld [vmem:[#allocation10_spill] sm:$0xff] }
 0x3ab   :  { %v5964_v37 = vpop.eup %5963  ;;  %5975 = vrcp.f32 %v904_v50  ;;  %5334 = vmatpush3.bf16.msra.mxu0 %v6684_v29  ;;  %1651 = vmax.xlane.f32.xlu0 %v7029_v3  ;;  %v1538_v50 = vsel %vm396_vm1, %v9085_v11, 0 }
 0x3ac   :  { %v5966_v31 = vpop.eup %5965  ;;  %5977 = vrcp.f32 %v906_v35  ;;  %5335 = vmatprep.subr.bf16.mxu0 %v6725_v4  ;;  %v977_v29 = vmul.f32 %v5964_v37, %v6948_v9  ;;  %v9087_v35 = vld [vmem:[#allocation14_spill] sm:$0xff]  ;;  %v9088_v37 = vld [vmem:[#allocation3_spill] sm:$0xff] }
 0x3ad   :  { %5979 = vrcp.f32 %v908_v6  ;;  %1949 = vrot.lane.b32.xlu1 %v6532_v49, %s6395_s26  ;;  %v976_v55 = vmul.f32 %v5966_v31, %v6963_v16  ;;  %v9083_v6 = vld [vmem:[#allocation22_spill] sm:$0xff]  ;;  %v1535_v31 = vsel %vm396_vm1, %v9087_v35, 0 }
 0x3ae   :  { %v5968_v41 = vpop.eup %5967  ;;  %v910_v14 = vpop.xlane.xlu0 %909  ;;  %v1004_v0 = vpack.c.bf16 %v978_v23, %v977_v29  ;;  %v1541_v56 = vsel %vm396_vm1, %v9083_v6, 0  ;;  %v9089_v23 = vld [vmem:[#allocation15_spill] sm:$0xff] }
 0x3af   :  { %5981 = vrcp.f32 %v910_v14  ;;  %5336 = vmatpush3.bf16.msra.mxu0 %v6725_v4  ;;  %1655 = vmax.xlane.f32.xlu0 %v7021_v47  ;;  %v1003_v19 = vpack.c.bf16 %v976_v55, %v975_v42  ;;  %v979_v58 = vmul.f32 %v5968_v41, %v6966_v12  ;;  %v7176_v42 = vpop.permute.xlu1 %1478  ;;  %v9090_v55 = vld [vmem:[#allocation8_spill] sm:$0xff]  ;;  %v9091_v14 = vld [vmem:[#allocation9_spill] sm:$0xff] }
 0x3b0   :  { %v5970_v21 = vpop.eup %5969  ;;  %5337 = vmatprep.subr.bf16.mxu0 %v6690_v38 }
 0x3b1   :  { %1947 = vrot.lane.b32.xlu1 %v6500_v22, %s6395_s26  ;;  %5321 = vmatprep.mubr.bf16.mxu0 %v1003_v19  ;;  %v980_v16 = vmul.f32 %v5970_v21, %v6969_v13  ;;  %v1532_v19 = vsel %vm396_vm1, %v9089_v23, 0 }
 0x3b2   :  { %v5972_v62 = vpop.eup %5971  ;;  %5322 = vmatmul.mubr.bf16.gmra.mxu0 %v1004_v0  ;;  %v7180_v41 = vpop.permute.xlu0 %1476  ;;  %v9092_v0 = vld [vmem:[#allocation17_spill] sm:$0xff] }
 0x3b3   :  { %v5974_v9 = vpop.eup %5973  ;;  %5338 = vmatpush3.bf16.msra.mxu0 %v6690_v38  ;;  %1659 = vmax.xlane.f32.xlu0 %v7059_v61  ;;  %v1005_v4 = vpack.c.bf16 %v980_v16, %v979_v58  ;;  %v982_v34 = vmul.f32 %v5972_v62, %v6972_v5  ;;  %v9093_v58 = vld [vmem:[#allocation6_spill] sm:$0xff] }
 0x3b4   :  { %5339 = vmatprep.subr.bf16.mxu0 %v6695_v48  ;;  %v981_v12 = vmul.f32 %v5974_v9, %v6960_v20  ;;  %v9078_v20 = vld [vmem:[#allocation11_spill] sm:$0xff] }
 0x3b5   :  { %2082 = vrot.lane.b32.xlu1 %v6546_v60, %s6395_s26  ;;  %5325 = vmatprep.mubr.bf16.mxu0 %v1005_v4  ;;  %v1529_v4 = vsel %vm396_vm1, %v9092_v0, 0 }
 0x3b6   :  { %v1006_v38 = vpack.c.bf16 %v982_v34, %v981_v12  ;;  %v9094_v12 = vld [vmem:[#allocation16_spill] sm:$0xff] }
 0x3b7   :  { %5340 = vmatpush3.bf16.msra.mxu0 %v6695_v48  ;;  %1663 = vmax.xlane.f32.xlu0 %v7053_v53 }
 0x3b8   :  { %v5976_v13 = vpop.eup %5975  ;;  %5341 = vmatprep.subr.bf16.mxu0 %v6705_v52 }
 0x3b9   :  { %v5978_v10 = vpop.eup %5977  ;;  %2380 = vrot.lane.b32.xlu1 %v6512_v36, %s6396_s27  ;;  %v983_v5 = vmul.f32 %v5976_v13, %v6978_v15 }
 0x3ba   :  { %v5980_v27 = vpop.eup %5979  ;;  %5326 = vmatmul.mubr.bf16.gmra.mxu0 %v1006_v38  ;;  %v984_v45 = vmul.f32 %v5978_v10, %v6980_v43 }
 0x3bb   :  { %5342 = vmatpush3.bf16.msra.mxu0 %v6705_v52  ;;  %1667 = vmax.xlane.f32.xlu0 %v7071_v25  ;;  %v985_v1 = vmul.f32 %v5980_v27, %v9080_v59  ;;  %v9082_v52 = vld [vmem:[#allocation12_spill] sm:$0xff]  ;;  %v1526_v27 = vsel %vm396_vm1, %v9094_v12, 0 }
 0x3bc   :  { %v5982_v48 = vpop.eup %5981  ;;  %5343 = vmatprep.subr.bf16.mxu0 %v9078_v20  ;;  %v1007_v24 = vpack.c.bf16 %v984_v45, %v983_v5  ;;  %v1544_v43 = vsel %vm396_vm1, %v9082_v52, 0 }
 0x3bd   :  { %2080 = vrot.lane.b32.xlu1 %v9079_v17, %s6395_s26  ;;  %v986_v26 = vmul.f32 %v5982_v48, %v9081_v2 }
 0x3be   :  { %5345 = vmatprep.mubr.bf16.mxu0 %v1007_v24  ;;  %v9095_v24 = vld [vmem:[#allocation19_spill] sm:$0xff] }
 0x3bf   :  { %5344 = vmatpush3.bf16.msra.mxu0 %v9078_v20  ;;  %1671 = vmax.xlane.f32.xlu0 %v7068_v28  ;;  %v1008_v15 = vpack.c.bf16 %v986_v26, %v985_v1 }
 0x3c0   :  { %5805 = vmatprep.subr.msk.bf16.mxu0 %vm396_vm1, %v9082_v52 }
 0x3c1   :  { %2378 = vrot.lane.b32.xlu1 %v6516_v39, %s6396_s27 }
 0x3c2   :  { %5346 = vmatmul.mubr.bf16.vlgmr.msra.gmra.mxu0 %v1008_v15 }
 0x3c3   :  { %5394 = vmatpush3.bf16.xpose.msra.mxu0 %v1544_v43 }
 0x3c4   :  { %5806 = vmatprep.subr.msk.bf16.mxu0 %vm396_vm1, %v9083_v6 }
 0x3c5   :  { %2074 = vrot.lane.b32.xlu1 %v9084_v44, %s6395_s26 }
 0x3c9   :  { %2376 = vrot.lane.b32.xlu1 %v6504_v30, %s6396_s27 }
 0x3cb   :  { %5396 = vmatpush3.bf16.xpose.msra.mxu0 %v1541_v56 }
 0x3cc   :  { %5807 = vmatprep.subr.msk.bf16.mxu0 %vm396_vm1, %v9085_v11 }
 0x3cd   :  { %2072 = vrot.lane.b32.xlu1 %v9086_v7, %s6395_s26 }
 0x3d1   :  { %2374 = vrot.lane.b32.xlu1 %v6508_v33, %s6396_s27 }
 0x3d3   :  { %5398 = vmatpush3.bf16.xpose.msra.mxu0 %v1538_v50  ;;  %v1523_v50 = vsel %vm396_vm1, %v9095_v24, 0 }
 0x3d4   :  { %5808 = vmatprep.subr.msk.bf16.mxu0 %vm396_vm1, %v9087_v35 }
 0x3d5   :  { %1961 = vrot.lane.b32.xlu0 %v6512_v36, %s6395_s26 }
 0x3d9   :  { %1953 = vrot.lane.b32.xlu0 %v9088_v37, %s6395_s26 }
 0x3db   :  { %5400 = vmatpush3.bf16.xpose.msra.mxu0 %v1535_v31 }
 0x3dc   :  { %5809 = vmatprep.subr.msk.bf16.mxu0 %vm396_vm1, %v9089_v23 }
 0x3dd   :  { %2078 = vrot.lane.b32.xlu0 %v9090_v55, %s6395_s26 }
 0x3e1   :  { %2076 = vrot.lane.b32.xlu0 %v9091_v14, %s6395_s26  ;;  %v912_v29 = vpop.xlane.xlu1 %911 }
 0x3e2   :  { %5983 = vrcp.f32 %v912_v29 }
 0x3e3   :  { %5402 = vmatpush3.bf16.xpose.msra.mxu0 %v1532_v19  ;;  %v916_v21 = vpop.xlane.xlu0 %915  ;;  %v9096_v19 = vld [vmem:[#allocation30_spill] sm:$0xff] }
 0x3e4   :  { %5810 = vmatprep.subr.msk.bf16.mxu0 %vm396_vm1, %v9092_v0  ;;  %v9097_v0 = vld [vmem:[#allocation29_spill] sm:$0xff] }
 0x3e5   :  { %2070 = vrot.lane.b32.xlu0 %v9093_v58, %s6395_s26  ;;  %v918_v16 = vpop.xlane.xlu1 %917 }
 0x3e6   :  { %5985 = vrcp.f32 %v918_v16 }
 0x3e7   :  { %5987 = vrcp.f32 %v916_v21  ;;  %v914_v62 = vpop.xlane.xlu0 %913 }
 0x3e8   :  { %5989 = vrcp.f32 %v914_v62 }
 0x3e9   :  { %v920_v9 = vpop.xlane.xlu1 %919 }
 0x3ea   :  { %5991 = vrcp.f32 %v920_v9 }
 0x3eb   :  { %5404 = vmatpush3.bf16.xpose.msra.mxu0 %v1529_v4  ;;  %v924_v34 = vpop.xlane.xlu0 %923 }
 0x3ec   :  { %5811 = vmatprep.subr.msk.bf16.mxu0 %vm396_vm1, %v9094_v12 }
 0x3ed   :  { %v926_v13 = vpop.xlane.xlu1 %925 }
 0x3ee   :  { %5993 = vrcp.f32 %v926_v13 }
 0x3ef   :  { %5995 = vrcp.f32 %v924_v34  ;;  %v922_v38 = vpop.xlane.xlu0 %921  ;;  %v5984_v5 = vpop.eup %5983 }
 0x3f0   :  { %5997 = vrcp.f32 %v922_v38  ;;  %v987_v2 = vmul.f32 %v5984_v5, %v7010_v57  ;;  %v9099_v5 = vld [vmem:[#allocation36_spill] sm:$0xff] }
 0x3f1   :  { %v928_v10 = vpop.xlane.xlu1 %927 }
 0x3f2   :  { %5999 = vrcp.f32 %v928_v10  ;;  %v9098_v10 = vld [vmem:[#allocation32_spill] sm:$0xff] }
 0x3f3   :  { %v5986_v45 = vpop.eup %5985  ;;  %5406 = vmatpush3.bf16.xpose.msra.mxu0 %v1526_v27  ;;  %v932_v48 = vpop.xlane.xlu0 %931  ;;  %v9100_v27 = vld [vmem:[#allocation35_spill] sm:$0xff] }
 0x3f4   :  { %v5988_v20 = vpop.eup %5987  ;;  %5812 = vmatprep.subr.msk.bf16.mxu0 %vm396_vm1, %v9095_v24  ;;  %v990_v15 = vmul.f32 %v5986_v45, %v7019_v8 }
 0x3f5   :  { %v5990_v59 = vpop.eup %5989  ;;  %v934_v1 = vpop.xlane.xlu1 %933  ;;  %v989_v6 = vmul.f32 %v5988_v20, %v7016_v54  ;;  %v9101_v20 = vld [vmem:[#allocation34_spill] sm:$0xff] }
 0x3f6   :  { %6001 = vrcp.f32 %v934_v1  ;;  %v988_v26 = vmul.f32 %v5990_v59, %v7024_v51 }
 0x3f7   :  { %6003 = vrcp.f32 %v932_v48  ;;  %v930_v52 = vpop.xlane.xlu0 %929  ;;  %v5992_v11 = vpop.eup %5991  ;;  %v1010_v35 = vpack.c.bf16 %v990_v15, %v989_v6 }
 0x3f8   :  { %6005 = vrcp.f32 %v930_v52  ;;  %v1009_v43 = vpack.c.bf16 %v988_v26, %v987_v2  ;;  %v991_v23 = vmul.f32 %v5992_v11, %v7027_v40  ;;  %v9102_v2 = vld [vmem:[#allocation18_spill] sm:$0xff]  ;;  %v9103_v52 = vld [vmem:[#allocation20_spill] sm:$0xff] }
 0x3f9   :  { %v7202_v56 = vpop.xlane.xlu1 %1643 }
 0x3fa   :  { %5349 = vmatprep.mubr.bf16.mxu0 %v1009_v43  ;;  %v9104_v43 = vld [vmem:[#allocation23_spill] sm:$0xff] }
 0x3fb   :  { %v5994_v31 = vpop.eup %5993  ;;  %5408 = vmatpush3.bf16.xpose.msra.mxu0 %v1523_v50  ;;  %v9105_v50 = vld [vmem:[#allocation21_spill] sm:$0xff] }
 0x3fc   :  { %v5996_v57 = vpop.eup %5995  ;;  %5350 = vmatmul.mubr.bf16.gmra.mxu0 %v1010_v35  ;;  %v994_v54 = vmul.f32 %v5994_v31, %v9096_v19  ;;  %v9106_v35 = vld [vmem:[#allocation26_spill] sm:$0xff] }
 0x3fd   :  { %v5998_v51 = vpop.eup %5997  ;;  %v1650_v8 = vpop.xlane.xlu1 %1649  ;;  %v993_v16 = vmul.f32 %v5996_v57, %v9097_v0 }
 0x3fe   :  { %v992_v29 = vmul.f32 %v5998_v51, %v7040_v18 }
 0x3ff   :  { %v6000_v9 = vpop.eup %5999  ;;  %v1012_v4 = vpack.c.bf16 %v994_v54, %v993_v16 }
 0x400   :  { %v1011_v21 = vpack.c.bf16 %v992_v29, %v991_v23  ;;  %v995_v40 = vmul.f32 %v6000_v9, %v9098_v10  ;;  %v1481_v23 = vpop.permute.xlu0 %1480  ;;  %v9107_v9 = vld [vmem:[#allocation27_spill] sm:$0xff] }
 0x401   :  { %v7210_v62 = vpop.xlane.xlu1 %1653 }
 0x402   :  { %5353 = vmatprep.mubr.bf16.mxu0 %v1011_v21 }
 0x403   :  { %v6002_v34 = vpop.eup %6001 }
 0x404   :  { %v6004_v12 = vpop.eup %6003  ;;  %5354 = vmatmul.mubr.bf16.gmra.mxu0 %v1012_v4  ;;  %v998_v45 = vmul.f32 %v6002_v34, %v9100_v27 }
 0x405   :  { %v6006_v13 = vpop.eup %6005  ;;  %v7212_v38 = vpop.xlane.xlu1 %1657  ;;  %v997_v24 = vmul.f32 %v6004_v12, %v9101_v20  ;;  %v9108_v12 = vld [vmem:[#allocation28_spill] sm:$0xff] }
 0x406   :  { %v996_v18 = vmul.f32 %v6006_v13, %v9099_v5  ;;  %v1710_v13 = vsub.f32 %v9108_v12, %v1650_v8 }
 0x407   :  { %v1014_v1 = vpack.c.bf16 %v998_v45, %v997_v24  ;;  %v9110_v24 = vld [vmem:[#allocation31_spill] sm:$0xff] }
 0x408   :  { %v1013_v48 = vpack.c.bf16 %v996_v18, %v995_v40  ;;  %v1745_v5 = vmul.f32 1.442695, %v1710_v13  ;;  %v9109_v18 = vld [vmem:[#allocation33_spill] sm:$0xff] }
 0x409   :  { %v7218_v59 = vpop.xlane.xlu1 %1661  ;;  %v1712_v27 = vsub.f32 %v9109_v18, %v7210_v62 }
 0x40a   :  { %5357 = vmatprep.mubr.bf16.mxu0 %v1013_v48 }
 0x40b   :  { %v1749_v8 = vmul.f32 1.442695, %v1712_v27 }
 0x40c   :  { %5358 = vmatmul.mubr.bf16.gmra.mxu0 %v1014_v1  ;;  %v1714_v1 = vsub.f32 %v9110_v24, %v7212_v38 }
 0x40d   :  { %5409 = vmatprep.mubr.msk.bf16.mxu0 %vm396_vm1, %v9102_v2  ;;  %v7222_v26 = vpop.xlane.xlu1 %1665 }
 0x411   :  { %v7224_v15 = vpop.xlane.xlu1 %1669 }
 0x414   :  { %5410 = vmatmul.mubr.msk.bf16.vlgmr.msra.gmra.mxu0 %vm396_vm1, %v9103_v52 }
 0x415   :  { %5413 = vmatprep.mubr.msk.bf16.mxu0 %vm396_vm1, %v9104_v43  ;;  %v7230_v6 = vpop.xlane.xlu1 %1673 }
 0x419   :  { %v7232_v11 = vpop.permute.xlu1 %1959 }
 0x41c   :  { %5414 = vmatmul.mubr.msk.bf16.gmra.mxu0 %vm396_vm1, %v9105_v50 }
 0x41d   :  { %5417 = vmatprep.mubr.msk.bf16.mxu0 %vm396_vm1, %v9106_v35  ;;  %v7238_v31 = vpop.permute.xlu1 %1957 }
 0x421   :  { %v7240_v57 = vpop.permute.xlu1 %1955 }
 0x424   :  { %5418 = vmatmul.mubr.msk.bf16.gmra.mxu0 %vm396_vm1, %v7180_v41  ;;  %v1707_v41 = vsub.f32 %v9107_v9, %v7202_v56 }
 0x425   :  { %5421 = vmatprep.mubr.msk.bf16.mxu0 %vm396_vm1, %v7176_v42  ;;  %v7246_v51 = vpop.permute.xlu1 %1951 }
 0x426   :  { %v1739_v40 = vmul.f32 1.442695, %v1707_v41 }
 0x429   :  { %v7248_v29 = vpop.permute.xlu1 %1949 }
 0x42c   :  { %5422 = vmatmul.mubr.msk.bf16.gmra.mxu0 %vm396_vm1, %v1481_v23  ;;  %v1646_v19 = vpop.xlane.xlu0 %1645 }
 0x42d   :  { %v1708_v54 = vsub.f32 %v7012_v32, %v1646_v19  ;;  %v7252_v21 = vpop.permute.xlu1 %1947 }
 0x42f   :  { %v1741_v0 = vmul.f32 1.442695, %v1708_v54 }
 0x430   :  { %v1648_v16 = vpop.xlane.xlu0 %1647 }
 0x431   :  { %6007 = vpow2.f32 %v1741_v0  ;;  %v1709_v42 = vsub.f32 %v6997_v63, %v1648_v16  ;;  %v2083_v4 = vpop.permute.xlu1 %2082  ;;  %v9112_v0 = vld [vmem:[#allocation37_spill] sm:$0xff] }
 0x432   :  { %5457 = vmatprep.subr.bf16.mxu0 %v2083_v4  ;;  %v1718_v16 = vsub.f32 %v9112_v0, %v7222_v26 }
 0x433   :  { %v1743_v34 = vmul.f32 1.442695, %v1709_v42  ;;  %5458 = vmatpush3.bf16.msra.mxu0 %v2083_v4 }
 0x434   :  { %v1652_v10 = vpop.xlane.xlu0 %1651 }
 0x435   :  { %6009 = vpow2.f32 %v1743_v34  ;;  %v7258_v32 = vpop.permute.xlu1 %2380  ;;  %v1711_v56 = vsub.f32 %v7029_v3, %v1652_v10  ;;  %v1753_v3 = vmul.f32 1.442695, %v1714_v1 }
 0x436   :  { %6011 = vpow2.f32 %v1739_v40 }
 0x437   :  { %6013 = vpow2.f32 %v1745_v5  ;;  %v1747_v52 = vmul.f32 1.442695, %v1711_v56 }
 0x438   :  { %v1656_v45 = vpop.xlane.xlu0 %1655 }
 0x439   :  { %v1713_v63 = vsub.f32 %v7021_v47, %v1656_v45  ;;  %v2081_v48 = vpop.permute.xlu1 %2080  ;;  %v9111_v47 = vld [vmem:[#allocation38_spill] sm:$0xff] }
 0x43a   :  { %5459 = vmatprep.subr.bf16.mxu0 %v2081_v48  ;;  %v1716_v62 = vsub.f32 %v9111_v47, %v7218_v59 }
 0x43b   :  { %v1751_v20 = vmul.f32 1.442695, %v1713_v63  ;;  %5460 = vmatpush3.bf16.msra.mxu0 %v2081_v48 }
 0x43c   :  { %v1660_v2 = vpop.xlane.xlu0 %1659  ;;  %v1757_v54 = vmul.f32 1.442695, %v1716_v62 }
 0x43d   :  { %6015 = vpow2.f32 %v1751_v20  ;;  %v1715_v35 = vsub.f32 %v7059_v61, %v1660_v2  ;;  %v9113_v61 = vld [vmem:[#allocation39_spill] sm:$0xff]  ;;  %v7295_v27 = vpop.permute.xlu1 %2378 }
 0x43e   :  { %v7266_v43 = vpop.eup %6007  ;;  %6017 = vpow2.f32 %v1749_v8  ;;  %v1722_v4 = vsub.f32 %v9113_v61, %v7230_v6  ;;  %v9114_v6 = vld [vmem:[#allocation40_spill] sm:$0xff] }
 0x43f   :  { %1805 = vadd.xlane.f32.xlu0 %v7266_v43  ;;  %6019 = vpow2.f32 %v1747_v52  ;;  %v1755_v41 = vmul.f32 1.442695, %v1715_v35  ;;  %v1720_v18 = vsub.f32 %v9114_v6, %v7224_v15 }
 0x440   :  { %v1664_v50 = vpop.xlane.xlu0 %1663  ;;  %6021 = vpow2.f32 %v1753_v3 }
 0x441   :  { %v1717_v23 = vsub.f32 %v7053_v53, %v1664_v50  ;;  %v1761_v53 = vmul.f32 1.442695, %v1718_v16  ;;  %v1765_v48 = vmul.f32 1.442695, %v1720_v18  ;;  %v2075_v20 = vpop.permute.xlu1 %2074 }
 0x442   :  { %v7273_v19 = vpop.eup %6009 }
 0x443   :  { %v1759_v38 = vmul.f32 1.442695, %v1717_v23  ;;  %1807 = vadd.xlane.f32.xlu1 %v7273_v19  ;;  %v7279_v42 = vpop.eup %6011 }
 0x444   :  { %v1668_v9 = vpop.xlane.xlu0 %1667  ;;  %v7284_v12 = vpop.eup %6013 }
 0x445   :  { %6023 = vpow2.f32 %v1759_v38  ;;  %v1719_v59 = vsub.f32 %v7071_v25, %v1668_v9  ;;  %v1769_v25 = vmul.f32 1.442695, %v1722_v4  ;;  %v7320_v52 = vpop.permute.xlu1 %2376 }
 0x446   :  { %6025 = vpow2.f32 %v1757_v54 }
 0x447   :  { %1803 = vadd.xlane.f32.xlu1 %v7279_v42  ;;  %6027 = vpow2.f32 %v1755_v41  ;;  %v1763_v13 = vmul.f32 1.442695, %v1719_v59 }
 0x448   :  { %v1672_v34 = vpop.xlane.xlu0 %1671  ;;  %6029 = vpow2.f32 %v1761_v53  ;;  %v9115_v53 = vld [vmem:[#allocation4_spill] sm:$0xff] }
 0x449   :  { %v1721_v26 = vsub.f32 %v7068_v28, %v1672_v34  ;;  %6031 = vpow2.f32 %v1763_v13  ;;  %v2073_v62 = vpop.permute.xlu1 %2072 }
 0x44a   :  { %v7287_v10 = vpop.eup %6015  ;;  %6033 = vpow2.f32 %v1769_v25 }
 0x44b   :  { %1815 = vadd.xlane.f32.xlu0 %v7287_v10  ;;  %1809 = vadd.xlane.f32.xlu1 %v7284_v12  ;;  %v7291_v5 = vpop.eup %6017  ;;  %v1767_v45 = vmul.f32 1.442695, %v1721_v26 }
 0x44c   :  { %v1962_v40 = vpop.permute.xlu0 %1961  ;;  %v7297_v28 = vpop.eup %6019 }
 0x44d   :  { %5425 = vmatprep.subr.bf16.mxu1 %v1962_v40  ;;  %v7302_v63 = vpop.eup %6021  ;;  %6035 = vpow2.f32 %v1767_v45 }
 0x44e   :  { %5426 = vmatpush3.bf16.msra.mxu1 %v1962_v40  ;;  %6037 = vpow2.f32 %v1765_v48 }
 0x44f   :  { %1811 = vadd.xlane.f32.xlu1 %v7297_v28  ;;  %1813 = vadd.xlane.f32.xlu0 %v7291_v5 }
 0x450   :  { %5427 = vmatprep.subr.bf16.mxu1 %v7232_v11  ;;  %v1954_v56 = vpop.permute.xlu0 %1953 }
 0x452   :  { %v7304_v15 = vpop.eup %6023  ;;  %5428 = vmatpush3.bf16.msra.mxu1 %v7232_v11 }
 0x453   :  { %1823 = vadd.xlane.f32.xlu0 %v7304_v15  ;;  %1817 = vadd.xlane.f32.xlu1 %v7302_v63  ;;  %v7310_v24 = vpop.eup %6025 }
 0x454   :  { %5429 = vmatprep.subr.bf16.mxu1 %v7238_v31  ;;  %v2079_v8 = vpop.permute.xlu0 %2078  ;;  %v7312_v1 = vpop.eup %6027 }
 0x455   :  { %5461 = vmatprep.subr.bf16.mxu0 %v2079_v8  ;;  %v7318_v2 = vpop.eup %6029 }
 0x456   :  { %5430 = vmatpush3.bf16.msra.mxu1 %v7238_v31  ;;  %5462 = vmatpush3.bf16.msra.mxu0 %v2079_v8  ;;  %v7322_v3 = vpop.eup %6031 }
 0x457   :  { %1819 = vadd.xlane.f32.xlu0 %v7312_v1  ;;  %1821 = vadd.xlane.f32.xlu1 %v7310_v24  ;;  %v7327_v31 = vpop.eup %6033 }
 0x458   :  { %5431 = vmatprep.subr.bf16.mxu1 %v7240_v57  ;;  %v2077_v11 = vpop.permute.xlu0 %2076 }
 0x459   :  { %5463 = vmatprep.subr.bf16.mxu0 %v2077_v11 }
 0x45a   :  { %5432 = vmatpush3.bf16.msra.mxu1 %v7240_v57  ;;  %5464 = vmatpush3.bf16.msra.mxu0 %v2077_v11  ;;  %v7329_v47 = vpop.eup %6035  ;;  %v7416_v11 = vpop.permute.xlu1 %2374 }
 0x45b   :  { %1827 = vadd.xlane.f32.xlu1 %v7322_v3  ;;  %1825 = vadd.xlane.f32.xlu0 %v7318_v2  ;;  %v7334_v57 = vpop.eup %6037 }
 0x45c   :  { %5433 = vmatprep.subr.bf16.mxu1 %v1954_v56  ;;  %5465 = vmatprep.subr.bf16.mxu0 %v2075_v20  ;;  %v2071_v35 = vpop.permute.xlu0 %2070 }
 0x45e   :  { %5434 = vmatpush3.bf16.msra.mxu1 %v1954_v56  ;;  %5466 = vmatpush3.bf16.msra.mxu0 %v2075_v20 }
 0x45f   :  { %1831 = vadd.xlane.f32.xlu0 %v7329_v47  ;;  %1833 = vadd.xlane.f32.xlu1 %v7327_v31 }
 0x460   :  { %5435 = vmatprep.subr.bf16.mxu1 %v7246_v51  ;;  %5467 = vmatprep.subr.bf16.mxu0 %v2073_v62 }
 0x462   :  { %v5315_v50 = vpop.f32.mrf.mxu0  ;;  %5436 = vmatpush3.bf16.msra.mxu1 %v7246_v51  ;;  %5468 = vmatpush3.bf16.msra.mxu0 %v2073_v62 }
 0x463   :  { %1259 = vst.msk [vmem:[#allocation2 + $0x10] sm:$0xff] %vm396_vm1, %v5315_v50  ;;  %1829 = vadd.xlane.f32.xlu0 %v7334_v57  ;;  %5437 = vmatprep.subr.bf16.mxu1 %v7248_v29 }
 0x464   :  { %5469 = vmatprep.subr.bf16.mxu0 %v2071_v35  ;;  %v1073_v23 = vpop.f32.mrf.mxu0 }
 0x465   :  { %1257 = vst.msk [vmem:[#allocation2] sm:$0xff] %vm396_vm1, %v1073_v23 }
 0x466   :  { %v5316_v38 = vpop.f32.mrf.mxu0  ;;  %5438 = vmatpush3.bf16.msra.mxu1 %v7248_v29  ;;  %5470 = vmatpush3.bf16.msra.mxu0 %v2071_v35 }
 0x467   :  { %1260 = vst.msk [vmem:[#allocation2 + $0x18] sm:$0xff] %vm396_vm1, %v5316_v38  ;;  %5439 = vmatprep.subr.bf16.mxu1 %v7252_v21 }
 0x468   :  { %v1076_v51 = vpop.f32.mrf.mxu0 }
 0x469   :  { %1258 = vst.msk [vmem:[#allocation2 + $0x8] sm:$0xff] %vm396_vm1, %v1076_v51 }
 0x46a   :  { %v5319_v54 = vpop.f32.mrf.mxu0  ;;  %5440 = vmatpush3.bf16.msra.mxu1 %v7252_v21 }
 0x46b   :  { %1263 = vst.msk [vmem:[#allocation2 + $0x30] sm:$0xff] %vm396_vm1, %v5319_v54  ;;  %5813 = vmatprep.subr.msk.bf16.mxu1 %vm396_vm1, %v7258_v32 }
 0x46c   :  { %v1089_v0 = vpop.f32.mrf.mxu0 }
 0x46d   :  { %1261 = vst.msk [vmem:[#allocation2 + $0x20] sm:$0xff] %vm396_vm1, %v1089_v0 }
 0x46e   :  { %v5320_v29 = vpop.f32.mrf.mxu0 }
 0x46f   :  { %1264 = vst.msk [vmem:[#allocation2 + $0x38] sm:$0xff] %vm396_vm1, %v5320_v29 }
 0x470   :  { %v1092_v16 = vpop.f32.mrf.mxu0  ;;  %2372 = vrot.lane.b32.xlu1 %v9088_v37, %s6396_s27 }
 0x471   :  { %1262 = vst.msk [vmem:[#allocation2 + $0x28] sm:$0xff] %vm396_vm1, %v1092_v16 }
 0x472   :  { %v5323_v9 = vpop.f32.mrf.mxu0 }
 0x473   :  { %1267 = vst.msk [vmem:[#allocation2 + $0x50] sm:$0xff] %vm396_vm1, %v5323_v9 }
 0x474   :  { %v1105_v21 = vpop.f32.mrf.mxu0  ;;  %2557 = vrot.lane.b32.xlu1 %v6546_v60, %s6396_s27 }
 0x475   :  { %1265 = vst.msk [vmem:[#allocation2 + $0x40] sm:$0xff] %vm396_vm1, %v1105_v21 }
 0x476   :  { %v5324_v41 = vpop.f32.mrf.mxu0 }
 0x477   :  { %1268 = vst.msk [vmem:[#allocation2 + $0x58] sm:$0xff] %vm396_vm1, %v5324_v41 }
 0x478   :  { %v1108_v59 = vpop.f32.mrf.mxu0  ;;  %2555 = vrot.lane.b32.xlu1 %v9079_v17, %s6396_s27 }
 0x479   :  { %1266 = vst.msk [vmem:[#allocation2 + $0x48] sm:$0xff] %vm396_vm1, %v1108_v59  ;;  %2068 = vrot.lane.b32.xlu0 %v9115_v53, %s6395_s26 }
 0x47a   :  { %v5327_v61 = vpop.f32.mrf.mxu0 }
 0x47b   :  { %1271 = vst.msk [vmem:[#allocation2 + $0x70] sm:$0xff] %vm396_vm1, %v5327_v61 }
 0x47c   :  { %v1121_v4 = vpop.f32.mrf.mxu0  ;;  %2368 = vrot.lane.b32.xlu1 %v6532_v49, %s6396_s27 }
 0x47d   :  { %1269 = vst.msk [vmem:[#allocation2 + $0x60] sm:$0xff] %vm396_vm1, %v1121_v4  ;;  %2370 = vrot.lane.b32.xlu0 %v6526_v46, %s6396_s27 }
 0x47e   :  { %v5328_v34 = vpop.f32.mrf.mxu0 }
 0x47f   :  { %1272 = vst.msk [vmem:[#allocation2 + $0x78] sm:$0xff] %vm396_vm1, %v5328_v34 }
 0x480   :  { %v1124_v13 = vpop.f32.mrf.mxu0  ;;  %2366 = vrot.lane.b32.xlu1 %v6500_v22, %s6396_s27 }
 0x481   :  { %1270 = vst.msk [vmem:[#allocation2 + $0x68] sm:$0xff] %vm396_vm1, %v1124_v13  ;;  %2553 = vrot.lane.b32.xlu0 %v9090_v55, %s6396_s27 }
 0x482   :  { %v5347_v26 = vpop.f32.mrf.mxu0 }
 0x483   :  { %1275 = vst.msk [vmem:[#allocation2 + $0x90] sm:$0xff] %vm396_vm1, %v5347_v26 }
 0x484   :  { %v1194_v25 = vpop.f32.mrf.mxu0  ;;  %2350 = vrot.lane.b32.xlu1 %v6500_v22, %s6397_s28 }
 0x485   :  { %1273 = vst.msk [vmem:[#allocation2 + $0x80] sm:$0xff] %vm396_vm1, %v1194_v25  ;;  %2551 = vrot.lane.b32.xlu0 %v9091_v14, %s6396_s27 }
 0x486   :  { %v5348_v40 = vpop.f32.mrf.mxu0 }
 0x487   :  { %1276 = vst.msk [vmem:[#allocation2 + $0x98] sm:$0xff] %vm396_vm1, %v5348_v40 }
 0x488   :  { %v1197_v6 = vpop.f32.mrf.mxu0  ;;  %2549 = vrot.lane.b32.xlu1 %v9084_v44, %s6396_s27 }
 0x489   :  { %1274 = vst.msk [vmem:[#allocation2 + $0x88] sm:$0xff] %vm396_vm1, %v1197_v6  ;;  %2352 = vrot.lane.b32.xlu0 %v6532_v49, %s6397_s28 }
 0x48c   :  { %2547 = vrot.lane.b32.xlu1 %v9086_v7, %s6396_s27 }
 0x48d   :  { %2545 = vrot.lane.b32.xlu0 %v9093_v58, %s6396_s27 }
 0x490   :  { %2543 = vrot.lane.b32.xlu1 %v9115_v53, %s6396_s27 }
 0x491   :  { %2527 = vrot.lane.b32.xlu0 %v9115_v53, %s6397_s28 }
 0x494   :  { %2529 = vrot.lane.b32.xlu1 %v9093_v58, %s6397_s28 }
 0x495   :  { %2354 = vrot.lane.b32.xlu0 %v6526_v46, %s6397_s28 }
 0x498   :  { %2356 = vrot.lane.b32.xlu1 %v9088_v37, %s6397_s28 }
 0x499   :  { %2358 = vrot.lane.b32.xlu0 %v6508_v33, %s6397_s28 }
 0x49c   :  { %2360 = vrot.lane.b32.xlu1 %v6504_v30, %s6397_s28 }
 0x49d   :  { %2362 = vrot.lane.b32.xlu0 %v6516_v39, %s6397_s28 }
 0x4a0   :  { %2364 = vrot.lane.b32.xlu1 %v6512_v36, %s6397_s28 }
 0x4bc   :  { %v5351_v18 = vpop.f32.mrf.mxu0 }
 0x4bd   :  { %1279 = vst.msk [vmem:[#allocation2 + $0xb0] sm:$0xff] %vm396_vm1, %v5351_v18 }
 0x4be   :  { %v1210_v45 = vpop.f32.mrf.mxu0 }
 0x4bf   :  { %1277 = vst.msk [vmem:[#allocation2 + $0xa0] sm:$0xff] %vm396_vm1, %v1210_v45 }
 0x4c0   :  { %v5352_v56 = vpop.f32.mrf.mxu0 }
 0x4c1   :  { %1280 = vst.msk [vmem:[#allocation2 + $0xb8] sm:$0xff] %vm396_vm1, %v5352_v56 }
 0x4c2   :  { %v1213_v48 = vpop.f32.mrf.mxu0 }
 0x4c3   :  { %1278 = vst.msk [vmem:[#allocation2 + $0xa8] sm:$0xff] %vm396_vm1, %v1213_v48 }
 0x4c4   :  { %v5355_v20 = vpop.f32.mrf.mxu0 }
 0x4c5   :  { %1283 = vst.msk [vmem:[#allocation2 + $0xd0] sm:$0xff] %vm396_vm1, %v5355_v20 }
 0x4c6   :  { %v1226_v8 = vpop.f32.mrf.mxu0 }
 0x4c7   :  { %1281 = vst.msk [vmem:[#allocation2 + $0xc0] sm:$0xff] %vm396_vm1, %v1226_v8 }
 0x4c8   :  { %v5356_v62 = vpop.f32.mrf.mxu0  ;;  %v1806_v35 = vpop.xlane.xlu0 %1805 }
 0x4c9   :  { %1284 = vst.msk [vmem:[#allocation2 + $0xd8] sm:$0xff] %vm396_vm1, %v5356_v62  ;;  %6039 = vrcp.f32 %v1806_v35 }
 0x4ca   :  { %v1229_v50 = vpop.f32.mrf.mxu0 }
 0x4cb   :  { %1282 = vst.msk [vmem:[#allocation2 + $0xc8] sm:$0xff] %vm396_vm1, %v1229_v50 }
 0x4cc   :  { %v5359_v23 = vpop.f32.mrf.mxu0  ;;  %v1808_v38 = vpop.xlane.xlu1 %1807 }
 0x4cd   :  { %1287 = vst.msk [vmem:[#allocation2 + $0xf0] sm:$0xff] %vm396_vm1, %v5359_v23 }
 0x4ce   :  { %v1242_v51 = vpop.f32.mrf.mxu0 }
 0x4cf   :  { %1285 = vst.msk [vmem:[#allocation2 + $0xe0] sm:$0xff] %vm396_vm1, %v1242_v51 }
 0x4d0   :  { %v5360_v54 = vpop.f32.mrf.mxu0  ;;  %v1804_v0 = vpop.xlane.xlu1 %1803 }
 0x4d1   :  { %1288 = vst.msk [vmem:[#allocation2 + $0xf8] sm:$0xff] %vm396_vm1, %v5360_v54  ;;  %6041 = vrcp.f32 %v1804_v0  ;;  %v2428_v54 = vsel %vm396_vm1, %v7258_v32, 0 }
 0x4d2   :  { %v1245_v29 = vpop.f32.mrf.mxu0  ;;  %6043 = vrcp.f32 %v1808_v38 }
 0x4d3   :  { %1286 = vst.msk [vmem:[#allocation2 + $0xe8] sm:$0xff] %vm396_vm1, %v1245_v29 }
 0x4d4   :  { %v7424_v16 = vpop.f32.mrf.mxu0  ;;  %v1816_v9 = vpop.xlane.xlu0 %1815 }
 0x4d5   :  { %1679 = vmax.xlane.f32.xlu0 %v7424_v16  ;;  %v1810_v21 = vpop.xlane.xlu1 %1809 }
 0x4d6   :  { %6045 = vrcp.f32 %v1810_v21  ;;  %v7427_v41 = vpop.f32.mrf.mxu0  ;;  %v6040_v34 = vpop.eup %6039 }
 0x4d7   :  { %v1900_v18 = vmul.f32 %v6040_v34, %v7266_v43 }
 0x4d8   :  { %v7429_v59 = vpop.f32.mrf.mxu0  ;;  %v1814_v61 = vpop.xlane.xlu0 %1813 }
 0x4d9   :  { %6047 = vrcp.f32 %v1814_v61  ;;  %1675 = vmax.xlane.f32.xlu0 %v7427_v41  ;;  %1681 = vmax.xlane.f32.xlu1 %v7429_v59  ;;  %v1812_v4 = vpop.xlane.xlu1 %1811 }
 0x4da   :  { %6049 = vrcp.f32 %v1812_v4  ;;  %v7433_v13 = vpop.f32.mrf.mxu0 }
 0x4db   :  { %6051 = vrcp.f32 %v1816_v9 }
 0x4dc   :  { %v1824_v26 = vpop.xlane.xlu0 %1823 }
 0x4dd   :  { %1677 = vmax.xlane.f32.xlu1 %v7433_v13  ;;  %v1818_v25 = vpop.xlane.xlu1 %1817 }
 0x4de   :  { %v6042_v40 = vpop.eup %6041  ;;  %6053 = vrcp.f32 %v1818_v25 }
 0x4df   :  { %v1899_v6 = vmul.f32 %v6042_v40, %v7279_v42  ;;  %v6044_v56 = vpop.eup %6043 }
 0x4e0   :  { %v1820_v45 = vpop.xlane.xlu0 %1819  ;;  %v1901_v50 = vmul.f32 %v6044_v56, %v7273_v19 }
 0x4e1   :  { %6055 = vrcp.f32 %v1820_v45  ;;  %v1822_v48 = vpop.xlane.xlu1 %1821  ;;  %v1931_v20 = vpack.c.bf16 %v1900_v18, %v1899_v6 }
 0x4e2   :  { %6057 = vrcp.f32 %v1822_v48 }
 0x4e3   :  { %v6046_v8 = vpop.eup %6045  ;;  %6059 = vrcp.f32 %v1824_v26  ;;  %5441 = vmatprep.mubr.bf16.mxu1 %v1931_v20 }
 0x4e4   :  { %v1826_v62 = vpop.xlane.xlu0 %1825  ;;  %v1902_v35 = vmul.f32 %v6046_v8, %v7284_v12 }
 0x4e5   :  { %6061 = vrcp.f32 %v1826_v62  ;;  %v1828_v23 = vpop.xlane.xlu1 %1827 }
 0x4e6   :  { %v6048_v38 = vpop.eup %6047  ;;  %v1932_v42 = vpack.c.bf16 %v1902_v35, %v1901_v50  ;;  %v2422_v50 = vsel %vm396_vm1, %v7320_v52, 0 }
 0x4e7   :  { %v6050_v51 = vpop.eup %6049  ;;  %v1904_v43 = vmul.f32 %v6048_v38, %v7291_v5 }
 0x4e8   :  { %5442 = vmatmul.mubr.bf16.vlgmr.msra.gmra.mxu1 %v1932_v42  ;;  %v1832_v0 = vpop.xlane.xlu0 %1831  ;;  %v1903_v29 = vmul.f32 %v6050_v51, %v7297_v28  ;;  %v6052_v9 = vpop.eup %6051 }
 0x4e9   :  { %5490 = vmatpush3.bf16.xpose.msra.mxu1 %v2428_v54  ;;  %6063 = vrcp.f32 %v1832_v0  ;;  %v1834_v19 = vpop.xlane.xlu1 %1833  ;;  %v1905_v61 = vmul.f32 %v6052_v9, %v7287_v10  ;;  %v2425_v10 = vsel %vm396_vm1, %v7295_v27, 0 }
 0x4ea   :  { %5814 = vmatprep.subr.msk.bf16.mxu1 %vm396_vm1, %v7295_v27  ;;  %6065 = vrcp.f32 %v1834_v19  ;;  %v1933_v12 = vpack.c.bf16 %v1904_v43, %v1903_v29  ;;  %v7476_v29 = vpop.f32.mrf.mxu0 }
 0x4eb   :  { %v6054_v21 = vpop.eup %6053  ;;  %6067 = vrcp.f32 %v1828_v23 }
 0x4ec   :  { %5445 = vmatprep.mubr.bf16.mxu1 %v1933_v12  ;;  %v1830_v5 = vpop.xlane.xlu0 %1829  ;;  %v1906_v32 = vmul.f32 %v6054_v21, %v7302_v63 }
 0x4ed   :  { %6069 = vrcp.f32 %v1830_v5  ;;  %v2373_v4 = vpop.permute.xlu1 %2372 }
 0x4ee   :  { %v6056_v28 = vpop.eup %6055  ;;  %2533 = vrot.lane.b32.xlu1 %v9084_v44, %s6397_s28  ;;  %v1934_v34 = vpack.c.bf16 %v1906_v32, %v1905_v61 }
 0x4ef   :  { %v6058_v26 = vpop.eup %6057  ;;  %2531 = vrot.lane.b32.xlu0 %v9086_v7, %s6397_s28  ;;  %v1907_v25 = vmul.f32 %v6056_v28, %v7312_v1 }
 0x4f0   :  { %v6060_v40 = vpop.eup %6059  ;;  %5446 = vmatmul.mubr.bf16.gmra.mxu1 %v1934_v34  ;;  %v2069_v6 = vpop.permute.xlu0 %2068  ;;  %v1908_v63 = vmul.f32 %v6058_v26, %v7310_v24 }
 0x4f1   :  { %5492 = vmatpush3.bf16.xpose.msra.mxu1 %v2425_v10  ;;  %v7456_v18 = vpop.permute.xlu1 %2557  ;;  %5471 = vmatprep.subr.bf16.mxu0 %v2069_v6  ;;  %v1909_v1 = vmul.f32 %v6060_v40, %v7304_v15 }
 0x4f2   :  { %v6062_v45 = vpop.eup %6061  ;;  %5815 = vmatprep.subr.msk.bf16.mxu1 %vm396_vm1, %v7320_v52  ;;  %5472 = vmatpush3.bf16.msra.mxu0 %v2069_v6  ;;  %v1935_v56 = vpack.c.bf16 %v1908_v63, %v1907_v25  ;;  %v2419_v52 = vsel %vm396_vm1, %v7416_v11, 0 }
 0x4f3   :  { %5821 = vmatprep.subr.msk.bf16.mxu0 %vm396_vm1, %v7456_v18  ;;  %v1910_v27 = vmul.f32 %v6062_v45, %v7318_v2 }
 0x4f4   :  { %5449 = vmatprep.mubr.bf16.mxu1 %v1935_v56 }
 0x4f5   :  { %v7464_v48 = vpop.permute.xlu1 %2555  ;;  %v1936_v24 = vpack.c.bf16 %v1910_v27, %v1909_v1 }
 0x4f6   :  { %v6064_v20 = vpop.eup %6063 }
 0x4f7   :  { %v6066_v8 = vpop.eup %6065  ;;  %v1913_v15 = vmul.f32 %v6064_v20, %v7329_v47  ;;  %v2416_v47 = vsel %vm396_vm1, %v2373_v4, 0 }
 0x4f8   :  { %v6068_v62 = vpop.eup %6067  ;;  %5450 = vmatmul.mubr.bf16.gmra.mxu1 %v1936_v24  ;;  %v1914_v2 = vmul.f32 %v6066_v8, %v7327_v31  ;;  %v2371_v31 = vpop.permute.xlu0 %2370 }
 0x4f9   :  { %5494 = vmatpush3.bf16.xpose.msra.mxu1 %v2422_v50  ;;  %v2369_v35 = vpop.permute.xlu1 %2368  ;;  %v1911_v38 = vmul.f32 %v6068_v62, %v7322_v3  ;;  %v7480_v3 = vpop.f32.mrf.mxu0  ;;  %v2413_v12 = vsel %vm396_vm1, %v2371_v31, 0 }
 0x4fa   :  { %v6070_v23 = vpop.eup %6069  ;;  %5816 = vmatprep.subr.msk.bf16.mxu1 %vm396_vm1, %v7416_v11  ;;  %v1938_v54 = vpack.c.bf16 %v1914_v2, %v1913_v15 }
 0x4fb   :  { %v1912_v42 = vmul.f32 %v6070_v23, %v7334_v57  ;;  %v7483_v57 = vpop.f32.mrf.mxu0 }
 0x4fc   :  { %v7485_v9 = vpop.permute.xlu0 %2553 }
 0x4fd   :  { %v2367_v51 = vpop.permute.xlu1 %2366  ;;  %v1937_v43 = vpack.c.bf16 %v1912_v42, %v1911_v38  ;;  %v7488_v11 = vpop.f32.mrf.mxu0 }
 0x4fe   :  { %v2407_v40 = vsel %vm396_vm1, %v2367_v51, 0 }
 0x4ff   :  { %5453 = vmatprep.mubr.bf16.mxu1 %v1937_v43  ;;  %v7494_v21 = vpop.f32.mrf.mxu0 }
 0x500   :  { %5454 = vmatmul.mubr.bf16.gmra.mxu1 %v1938_v54  ;;  %v7491_v19 = vpop.permute.xlu0 %2551 }
 0x501   :  { %5496 = vmatpush3.bf16.xpose.msra.mxu1 %v2419_v52  ;;  %v2351_v0 = vpop.permute.xlu1 %2350  ;;  %v7499_v5 = vpop.f32.mrf.mxu0 }
 0x502   :  { %5817 = vmatprep.subr.msk.bf16.mxu1 %vm396_vm1, %v2373_v4  ;;  %5505 = vmatprep.mubr.msk.bf16.mxu1 %vm396_vm1, %v2351_v0  ;;  %v2410_v4 = vsel %vm396_vm1, %v2369_v35, 0 }
 0x503   :  { %v7506_v28 = vpop.f32.mrf.mxu0 }
 0x504   :  { %v2353_v61 = vpop.permute.xlu0 %2352 }
 0x505   :  { %v7502_v32 = vpop.permute.xlu1 %2549  ;;  %v7515_v25 = vpop.f32.mrf.mxu0 }
 0x507   :  { %v7519_v10 = vpop.f32.mrf.mxu0 }
 0x508   :  { %v7511_v34 = vpop.permute.xlu0 %2545 }
 0x509   :  { %5498 = vmatpush3.bf16.xpose.msra.mxu1 %v2416_v47  ;;  %v7513_v26 = vpop.permute.xlu1 %2547  ;;  %v7526_v45 = vpop.f32.mrf.mxu0 }
 0x50a   :  { %5818 = vmatprep.subr.msk.bf16.mxu1 %vm396_vm1, %v2371_v31 }
 0x50b   :  { %v7533_v27 = vpop.f32.mrf.mxu0 }
 0x50c   :  { %v7521_v6 = vpop.permute.xlu0 %2527 }
 0x50d   :  { %v7523_v63 = vpop.permute.xlu1 %2543  ;;  %v7536_v24 = vpop.f32.mrf.mxu0 }
 0x50e   :  { %1687 = vmax.xlane.f32.xlu0 %v7476_v29 }
 0x510   :  { %v2355_v56 = vpop.permute.xlu0 %2354 }
 0x511   :  { %5500 = vmatpush3.bf16.xpose.msra.mxu1 %v2413_v12  ;;  %v7530_v1 = vpop.permute.xlu1 %2529 }
 0x512   :  { %5819 = vmatprep.subr.msk.bf16.mxu1 %vm396_vm1, %v2369_v35  ;;  %1683 = vmax.xlane.f32.xlu0 %v7480_v3 }
 0x513   :  { %1689 = vmax.xlane.f32.xlu1 %v7483_v57 }
 0x514   :  { %v2359_v8 = vpop.permute.xlu0 %2358 }
 0x515   :  { %v2357_v20 = vpop.permute.xlu1 %2356 }
 0x516   :  { %1695 = vmax.xlane.f32.xlu0 %v7494_v21 }
 0x517   :  { %1685 = vmax.xlane.f32.xlu1 %v7488_v11 }
 0x518   :  { %v2363_v50 = vpop.permute.xlu0 %2362 }
 0x519   :  { %5502 = vmatpush3.bf16.xpose.msra.mxu1 %v2410_v4  ;;  %v2361_v62 = vpop.permute.xlu1 %2360 }
 0x51a   :  { %5820 = vmatprep.subr.msk.bf16.mxu1 %vm396_vm1, %v2367_v51  ;;  %1691 = vmax.xlane.f32.xlu0 %v7499_v5 }
 0x51b   :  { %1697 = vmax.xlane.f32.xlu1 %v7506_v28 }
 0x51d   :  { %v2365_v35 = vpop.permute.xlu1 %2364 }
 0x51f   :  { %1693 = vmax.xlane.f32.xlu1 %v7515_v25 }
 0x521   :  { %5504 = vmatpush3.bf16.xpose.msra.mxu1 %v2407_v40 }
 0x523   :  { %1703 = vmax.xlane.f32.xlu1 %v7519_v10 }
 0x527   :  { %1699 = vmax.xlane.f32.xlu1 %v7526_v45 }
 0x528   :  { %5506 = vmatmul.mubr.msk.bf16.vlgmr.msra.gmra.mxu1 %vm396_vm1, %v2353_v61 }
 0x529   :  { %5509 = vmatprep.mubr.msk.bf16.mxu1 %vm396_vm1, %v2355_v56 }
 0x52b   :  { %1705 = vmax.xlane.f32.xlu1 %v7533_v27 }
 0x52f   :  { %1701 = vmax.xlane.f32.xlu1 %v7536_v24 }
 0x530   :  { %5510 = vmatmul.mubr.msk.bf16.gmra.mxu1 %vm396_vm1, %v2357_v20 }
 0x531   :  { %5513 = vmatprep.mubr.msk.bf16.mxu1 %vm396_vm1, %v2359_v8 }
 0x538   :  { %5514 = vmatmul.mubr.msk.bf16.gmra.mxu1 %vm396_vm1, %v2361_v62 }
 0x539   :  { %5517 = vmatprep.mubr.msk.bf16.mxu1 %vm396_vm1, %v2363_v50 }
 0x540   :  { %5518 = vmatmul.mubr.msk.bf16.gmra.mxu1 %vm396_vm1, %v2365_v35 }
 0x55e   :  { %v1680_v23 = vpop.xlane.xlu0 %1679 }
 0x55f   :  { %v1725_v15 = vsub.f32 %v7424_v16, %v1680_v23 }
 0x561   :  { %v1775_v2 = vmul.f32 1.442695, %v1725_v15 }
 0x562   :  { %v1676_v38 = vpop.xlane.xlu0 %1675  ;;  %v1682_v42 = vpop.xlane.xlu1 %1681 }
 0x563   :  { %6071 = vpow2.f32 %v1775_v2  ;;  %v1723_v51 = vsub.f32 %v7427_v41, %v1676_v38  ;;  %v1726_v43 = vsub.f32 %v7429_v59, %v1682_v42 }
 0x565   :  { %v1771_v54 = vmul.f32 1.442695, %v1723_v51  ;;  %v1777_v52 = vmul.f32 1.442695, %v1726_v43 }
 0x566   :  { %v1678_v0 = vpop.xlane.xlu1 %1677 }
 0x567   :  { %6073 = vpow2.f32 %v1771_v54  ;;  %v1724_v31 = vsub.f32 %v7433_v13, %v1678_v0  ;;  %v7564_v13 = vpop.permute.xlu0 %2531 }
 0x568   :  { %6075 = vpow2.f32 %v1777_v52 }
 0x569   :  { %v1773_v47 = vmul.f32 1.442695, %v1724_v31 }
 0x56a   :  { %v7566_v4 = vpop.permute.xlu1 %2533 }
 0x56b   :  { %6077 = vpow2.f32 %v1773_v47 }
 0x570   :  { %v7548_v12 = vpop.eup %6071 }
 0x571   :  { %1839 = vadd.xlane.f32.xlu0 %v7548_v12 }
 0x574   :  { %v7551_v16 = vpop.eup %6073 }
 0x575   :  { %1835 = vadd.xlane.f32.xlu0 %v7551_v16  ;;  %v7554_v41 = vpop.eup %6075 }
 0x578   :  { %v7556_v59 = vpop.eup %6077 }
 0x579   :  { %1841 = vadd.xlane.f32.xlu0 %v7554_v41  ;;  %1837 = vadd.xlane.f32.xlu1 %v7556_v59 }
 0x58a   :  { %2537 = vrot.lane.b32.xlu1 %v9090_v55, %s6397_s28 }
 0x58f   :  { %2535 = vrot.lane.b32.xlu0 %v9091_v14, %s6397_s28 }
 0x597   :  { %v1688_v61 = vpop.xlane.xlu0 %1687 }
 0x598   :  { %v1729_v40 = vsub.f32 %v7476_v29, %v1688_v61 }
 0x59a   :  { %v1783_v20 = vmul.f32 1.442695, %v1729_v40 }
 0x59b   :  { %v1684_v56 = vpop.xlane.xlu0 %1683 }
 0x59c   :  { %v1727_v8 = vsub.f32 %v7480_v3, %v1684_v56  ;;  %v1690_v62 = vpop.xlane.xlu1 %1689  ;;  %6079 = vpow2.f32 %v1783_v20 }
 0x59d   :  { %v1730_v23 = vsub.f32 %v7483_v57, %v1690_v62 }
 0x59e   :  { %v1779_v35 = vmul.f32 1.442695, %v1727_v8 }
 0x59f   :  { %v1696_v50 = vpop.xlane.xlu0 %1695  ;;  %v1785_v43 = vmul.f32 1.442695, %v1730_v23 }
 0x5a0   :  { %v1686_v15 = vpop.xlane.xlu1 %1685  ;;  %v1733_v2 = vsub.f32 %v7494_v21, %v1696_v50  ;;  %6081 = vpow2.f32 %v1779_v35 }
 0x5a1   :  { %v1728_v38 = vsub.f32 %v7488_v11, %v1686_v15 }
 0x5a2   :  { %v1791_v54 = vmul.f32 1.442695, %v1733_v2 }
 0x5a3   :  { %v1781_v42 = vmul.f32 1.442695, %v1728_v38  ;;  %v1692_v51 = vpop.xlane.xlu0 %1691 }
 0x5a4   :  { %v1698_v29 = vpop.xlane.xlu1 %1697  ;;  %v1731_v3 = vsub.f32 %v7499_v5, %v1692_v51 }
 0x5a5   :  { %6083 = vpow2.f32 %v1781_v42  ;;  %v1734_v52 = vsub.f32 %v7506_v28, %v1698_v29 }
 0x5a6   :  { %6085 = vpow2.f32 %v1785_v43  ;;  %v1787_v57 = vmul.f32 1.442695, %v1731_v3 }
 0x5a7   :  { %v1793_v0 = vmul.f32 1.442695, %v1734_v52  ;;  %6087 = vpow2.f32 %v1791_v54 }
 0x5a8   :  { %v1694_v31 = vpop.xlane.xlu1 %1693  ;;  %v7576_v47 = vpop.f32.mrf.mxu1 }
 0x5a9   :  { %v1732_v21 = vsub.f32 %v7515_v25, %v1694_v31  ;;  %9116 = vst [vmem:[#allocation11_spill] sm:$0xff] %v7576_v47  ;;  %6089 = vpow2.f32 %v1793_v0  ;;  %v7578_v40 = vpop.eup %6079 }
 0x5aa   :  { %6091 = vpow2.f32 %v1787_v57  ;;  %v7581_v5 = vpop.f32.mrf.mxu1 }
 0x5ab   :  { %v1789_v11 = vmul.f32 1.442695, %v1732_v21  ;;  %9117 = vst [vmem:[#allocation7_spill] sm:$0xff] %v7581_v5 }
 0x5ac   :  { %v1704_v61 = vpop.xlane.xlu1 %1703  ;;  %v7589_v50 = vpop.f32.mrf.mxu1 }
 0x5ad   :  { %v1737_v56 = vsub.f32 %v7519_v10, %v1704_v61  ;;  %6093 = vpow2.f32 %v1789_v11  ;;  %v7584_v8 = vpop.eup %6081  ;;  %9118 = vst [vmem:[#allocation24_spill] sm:$0xff] %v7589_v50 }
 0x5ae   :  { %1847 = vadd.xlane.f32.xlu0 %v7578_v40  ;;  %v7598_v38 = vpop.f32.mrf.mxu1 }
 0x5af   :  { %v1799_v28 = vmul.f32 1.442695, %v1737_v56  ;;  %9119 = vst [vmem:[#allocation25_spill] sm:$0xff] %v7598_v38 }
 0x5b0   :  { %v1700_v20 = vpop.xlane.xlu1 %1699  ;;  %v7607_v54 = vpop.f32.mrf.mxu1 }
 0x5b1   :  { %6095 = vpow2.f32 %v1799_v28  ;;  %v1735_v25 = vsub.f32 %v7526_v45, %v1700_v20  ;;  %9120 = vst [vmem:[#allocation12_spill] sm:$0xff] %v7607_v54 }
 0x5b2   :  { %v7587_v62 = vpop.eup %6083  ;;  %1843 = vadd.xlane.f32.xlu0 %v7584_v8  ;;  %v7615_v0 = vpop.f32.mrf.mxu1 }
 0x5b3   :  { %v1795_v35 = vmul.f32 1.442695, %v1735_v25  ;;  %1845 = vadd.xlane.f32.xlu1 %v7587_v62  ;;  %v7593_v23 = vpop.eup %6085  ;;  %9121 = vst [vmem:[#allocation22_spill] sm:$0xff] %v7615_v0 }
 0x5b4   :  { %v1706_v10 = vpop.xlane.xlu1 %1705  ;;  %v7596_v2 = vpop.eup %6087 }
 0x5b5   :  { %6097 = vpow2.f32 %v1795_v35  ;;  %v1738_v15 = vsub.f32 %v7533_v27, %v1706_v10  ;;  %v7621_v31 = vpop.f32.mrf.mxu1 }
 0x5b6   :  { %1849 = vadd.xlane.f32.xlu0 %v7593_v23  ;;  %v7602_v51 = vpop.eup %6089  ;;  %9122 = vst [vmem:[#allocation5_spill] sm:$0xff] %v7621_v31 }
 0x5b7   :  { %v1801_v45 = vmul.f32 1.442695, %v1738_v15  ;;  %1855 = vadd.xlane.f32.xlu1 %v7596_v2  ;;  %v7605_v29 = vpop.eup %6091  ;;  %v7626_v21 = vpop.f32.mrf.mxu1 }
 0x5b8   :  { %v1702_v42 = vpop.xlane.xlu1 %1701  ;;  %9123 = vst [vmem:[#allocation13_spill] sm:$0xff] %v7626_v21 }
 0x5b9   :  { %6099 = vpow2.f32 %v1801_v45  ;;  %v1736_v43 = vsub.f32 %v7536_v24, %v1702_v42  ;;  %v7631_v61 = vpop.f32.mrf.mxu1 }
 0x5ba   :  { %1857 = vadd.xlane.f32.xlu0 %v7602_v51  ;;  %v7611_v3 = vpop.eup %6093  ;;  %9124 = vst [vmem:[#allocation10_spill] sm:$0xff] %v7631_v61 }
 0x5bb   :  { %v1797_v27 = vmul.f32 1.442695, %v1736_v43  ;;  %1851 = vadd.xlane.f32.xlu1 %v7605_v29  ;;  %v7634_v56 = vpop.f32.mrf.mxu1 }
 0x5bc   :  { %9125 = vst [vmem:[#allocation14_spill] sm:$0xff] %v7634_v56 }
 0x5bd   :  { %6101 = vpow2.f32 %v1797_v27  ;;  %v7636_v28 = vpop.f32.mrf.mxu1 }
 0x5be   :  { %v7613_v52 = vpop.eup %6095  ;;  %1853 = vadd.xlane.f32.xlu0 %v7611_v3  ;;  %9126 = vst [vmem:[#allocation3_spill] sm:$0xff] %v7636_v28 }
 0x5bf   :  { %1863 = vadd.xlane.f32.xlu1 %v7613_v52  ;;  %v7640_v20 = vpop.f32.mrf.mxu1 }
 0x5c0   :  { %9127 = vst [vmem:[#allocation15_spill] sm:$0xff] %v7640_v20 }
 0x5c1   :  { %v7642_v25 = vpop.f32.mrf.mxu1 }
 0x5c2   :  { %v7619_v24 = vpop.eup %6097  ;;  %9128 = vst [vmem:[#allocation8_spill] sm:$0xff] %v7642_v25 }
 0x5c3   :  { %1859 = vadd.xlane.f32.xlu1 %v7619_v24  ;;  %v7644_v35 = vpop.f32.mrf.mxu1 }
 0x5c4   :  { %9129 = vst [vmem:[#allocation9_spill] sm:$0xff] %v7644_v35 }
 0x5c5   :  { %v7648_v10 = vpop.f32.mrf.mxu1 }
 0x5c6   :  { %v7624_v57 = vpop.eup %6099  ;;  %9130 = vst [vmem:[#allocation17_spill] sm:$0xff] %v7648_v10 }
 0x5c7   :  { %1865 = vadd.xlane.f32.xlu0 %v7624_v57  ;;  %v7650_v15 = vpop.f32.mrf.mxu1 }
 0x5c8   :  { %9131 = vst [vmem:[#allocation6_spill] sm:$0xff] %v7650_v15 }
 0x5ca   :  { %v7629_v11 = vpop.eup %6101 }
 0x5cb   :  { %1861 = vadd.xlane.f32.xlu0 %v7629_v11 }
 0x5d4   :  { %2541 = vrot.lane.b32.xlu1 %v6546_v60, %s6397_s28 }
 0x5e1   :  { %2539 = vrot.lane.b32.xlu0 %v9079_v17, %s6397_s28 }
 0x5e8   :  { %v7652_v45 = vpop.f32.mrf.mxu1 }
 0x5ea   :  { %v7654_v42 = vpop.f32.mrf.mxu1 }
 0x5ec   :  { %v7656_v43 = vpop.f32.mrf.mxu1 }
 0x5ee   :  { %v7658_v27 = vpop.f32.mrf.mxu1 }
 0x5f0   :  { %v7660_v28 = vpop.f32.mrf.mxu1 }
 0x5f2   :  { %v7662_v25 = vpop.f32.mrf.mxu1 }
 0x5f3   :  { %9132 = vst [vmem:[#allocation16_spill] sm:$0xff] %v7662_v25 }
 0x5f4   :  { %v7664_v35 = vpop.f32.mrf.mxu1 }
 0x5f6   :  { %v7666_v20 = vpop.f32.mrf.mxu1 }
 0x5f7   :  { %9133 = vst [vmem:[#allocation19_spill] sm:$0xff] %v7666_v20 }
 0x5f8   :  { %v7668_v61 = vpop.f32.mrf.mxu1  ;;  %2706 = vmax.xlane.f32.xlu1 %v7658_v27 }
 0x5f9   :  { %9134 = vst [vmem:[#allocation30_spill] sm:$0xff] %v7668_v61 }
 0x5fa   :  { %v1840_v10 = vpop.xlane.xlu0 %1839  ;;  %v7671_v15 = vpop.f32.mrf.mxu1 }
 0x5fb   :  { %6103 = vrcp.f32 %v1840_v10 }
 0x5fc   :  { %2712 = vmax.xlane.f32.xlu1 %v7662_v25  ;;  %v7674_v31 = vpop.f32.mrf.mxu1 }
 0x5fe   :  { %v1836_v56 = vpop.xlane.xlu0 %1835  ;;  %v7678_v54 = vpop.f32.mrf.mxu1 }
 0x5ff   :  { %6105 = vrcp.f32 %v1836_v56 }
 0x600   :  { %2716 = vmax.xlane.f32.xlu1 %v7660_v28  ;;  %2704 = vmax.xlane.f32.xlu0 %v7654_v42  ;;  %v7682_v50 = vpop.f32.mrf.mxu1 }
 0x601   :  { %9135 = vst [vmem:[#allocation29_spill] sm:$0xff] %v7682_v50 }
 0x602   :  { %v1842_v21 = vpop.xlane.xlu0 %1841  ;;  %v1838_v0 = vpop.xlane.xlu1 %1837 }
 0x603   :  { %6107 = vrcp.f32 %v1842_v21  ;;  %v7686_v5 = vpop.f32.mrf.mxu1 }
 0x604   :  { %6109 = vrcp.f32 %v1838_v0  ;;  %2720 = vmax.xlane.f32.xlu1 %v7671_v15  ;;  %2708 = vmax.xlane.f32.xlu0 %v7652_v45  ;;  %9136 = vst [vmem:[#allocation32_spill] sm:$0xff] %v7686_v5 }
 0x608   :  { %2724 = vmax.xlane.f32.xlu1 %v7668_v61  ;;  %2710 = vmax.xlane.f32.xlu0 %v7656_v43  ;;  %v6104_v56 = vpop.eup %6103 }
 0x609   :  { %v1917_v47 = vmul.f32 %v6104_v56, %v7548_v12 }
 0x60c   :  { %2728 = vmax.xlane.f32.xlu1 %v7686_v5  ;;  %2714 = vmax.xlane.f32.xlu0 %v7666_v20  ;;  %v6106_v21 = vpop.eup %6105  ;;  %v7697_v20 = vpop.f32.mrf.mxu1 }
 0x60d   :  { %v1915_v53 = vmul.f32 %v6106_v21, %v7551_v16  ;;  %v2593_v16 = vsel %vm396_vm1, %v7502_v32, 0 }
 0x60e   :  { %v7704_v12 = vpop.f32.mrf.mxu1 }
 0x610   :  { %v6108_v10 = vpop.eup %6107  ;;  %2732 = vmax.xlane.f32.xlu1 %v7682_v50  ;;  %2718 = vmax.xlane.f32.xlu0 %v7664_v35  ;;  %v2605_v50 = vsel %vm396_vm1, %v7456_v18, 0  ;;  %v2599_v18 = vsel %vm396_vm1, %v7485_v9, 0 }
 0x611   :  { %v6110_v0 = vpop.eup %6109  ;;  %v1918_v38 = vmul.f32 %v6108_v10, %v7554_v41  ;;  %v7738_v41 = vpop.permute.xlu1 %2537 }
 0x612   :  { %v1916_v61 = vmul.f32 %v6110_v0, %v7556_v59 }
 0x613   :  { %v1940_v25 = vpack.c.bf16 %v1918_v38, %v1917_v47 }
 0x614   :  { %2722 = vmax.xlane.f32.xlu0 %v7678_v54  ;;  %v1939_v5 = vpack.c.bf16 %v1916_v61, %v1915_v53  ;;  %v2602_v53 = vsel %vm396_vm1, %v7464_v48, 0 }
 0x616   :  { %5473 = vmatprep.mubr.bf16.mxu0 %v1939_v5 }
 0x617   :  { %5474 = vmatmul.mubr.bf16.vlgmr.msra.gmra.mxu0 %v1940_v25 }
 0x618   :  { %5522 = vmatpush3.bf16.xpose.msra.mxu0 %v2605_v50  ;;  %2726 = vmax.xlane.f32.xlu0 %v7674_v31 }
 0x619   :  { %5822 = vmatprep.subr.msk.bf16.mxu0 %vm396_vm1, %v7464_v48  ;;  %v2596_v48 = vsel %vm396_vm1, %v7491_v19, 0 }
 0x61c   :  { %2730 = vmax.xlane.f32.xlu0 %v7704_v12 }
 0x620   :  { %5524 = vmatpush3.bf16.xpose.msra.mxu0 %v2602_v53  ;;  %2734 = vmax.xlane.f32.xlu0 %v7697_v20 }
 0x621   :  { %5823 = vmatprep.subr.msk.bf16.mxu0 %vm396_vm1, %v7485_v9  ;;  %3022 = vrot.lane.b32.xlu1 %v6512_v36, %s6398_s29  ;;  %v7730_v9 = vpop.permute.xlu0 %2535 }
 0x625   :  { %3016 = vrot.lane.b32.xlu1 %v6508_v33, %s6398_s29 }
 0x628   :  { %5526 = vmatpush3.bf16.xpose.msra.mxu0 %v2599_v18 }
 0x629   :  { %5824 = vmatprep.subr.msk.bf16.mxu0 %vm396_vm1, %v7491_v19  ;;  %3143 = vrot.lane.b32.xlu1 %v6546_v60, %s6398_s29 }
 0x62d   :  { %3139 = vrot.lane.b32.xlu1 %v9090_v55, %s6398_s29 }
 0x630   :  { %5528 = vmatpush3.bf16.xpose.msra.mxu0 %v2596_v48 }
 0x631   :  { %5825 = vmatprep.subr.msk.bf16.mxu0 %vm396_vm1, %v7502_v32  ;;  %3439 = vrot.lane.b32.xlu1 %v6516_v39, %s6399_s30  ;;  %v2590_v32 = vsel %vm396_vm1, %v7513_v26, 0 }
 0x635   :  { %3137 = vrot.lane.b32.xlu1 %v9091_v14, %s6398_s29 }
 0x636   :  { %3020 = vrot.lane.b32.xlu0 %v6516_v39, %s6398_s29 }
 0x637   :  { %v1848_v19 = vpop.xlane.xlu0 %1847 }
 0x638   :  { %5530 = vmatpush3.bf16.xpose.msra.mxu0 %v2593_v16 }
 0x639   :  { %5826 = vmatprep.subr.msk.bf16.mxu0 %vm396_vm1, %v7513_v26  ;;  %3437 = vrot.lane.b32.xlu1 %v6504_v30, %s6399_s30  ;;  %v2587_v26 = vsel %vm396_vm1, %v7511_v34, 0 }
 0x63a   :  { %3018 = vrot.lane.b32.xlu0 %v6504_v30, %s6398_s29 }
 0x63b   :  { %v1844_v59 = vpop.xlane.xlu0 %1843 }
 0x63c   :  { %6111 = vrcp.f32 %v1844_v59  ;;  %v1846_v47 = vpop.xlane.xlu1 %1845  ;;  %v2584_v59 = vsel %vm396_vm1, %v7523_v63, 0 }
 0x63d   :  { %6113 = vrcp.f32 %v1846_v47  ;;  %3131 = vrot.lane.b32.xlu1 %v9093_v58, %s6398_s29 }
 0x63e   :  { %6115 = vrcp.f32 %v1848_v19  ;;  %3014 = vrot.lane.b32.xlu0 %v9088_v37, %s6398_s29 }
 0x63f   :  { %v1850_v5 = vpop.xlane.xlu0 %1849 }
 0x640   :  { %5532 = vmatpush3.bf16.xpose.msra.mxu0 %v2590_v32  ;;  %6117 = vrcp.f32 %v1850_v5  ;;  %v1856_v50 = vpop.xlane.xlu1 %1855 }
 0x641   :  { %5827 = vmatprep.subr.msk.bf16.mxu0 %vm396_vm1, %v7511_v34 }
 0x642   :  { %3012 = vrot.lane.b32.xlu0 %v6526_v46, %s6398_s29 }
 0x643   :  { %v1858_v38 = vpop.xlane.xlu0 %1857 }
 0x644   :  { %v1852_v61 = vpop.xlane.xlu1 %1851  ;;  %6119 = vrcp.f32 %v1858_v38 }
 0x645   :  { %6121 = vrcp.f32 %v1852_v61 }
 0x646   :  { %3010 = vrot.lane.b32.xlu0 %v6532_v49, %s6398_s29  ;;  %6123 = vrcp.f32 %v1856_v50 }
 0x647   :  { %v1854_v25 = vpop.xlane.xlu0 %1853 }
 0x648   :  { %5534 = vmatpush3.bf16.xpose.msra.mxu0 %v2587_v26  ;;  %6125 = vrcp.f32 %v1854_v25  ;;  %v1864_v10 = vpop.xlane.xlu1 %1863 }
 0x649   :  { %v6112_v56 = vpop.eup %6111  ;;  %5828 = vmatprep.subr.msk.bf16.mxu0 %vm396_vm1, %v7523_v63 }
 0x64a   :  { %v6114_v21 = vpop.eup %6113  ;;  %3008 = vrot.lane.b32.xlu0 %v6500_v22, %s6398_s29  ;;  %v1919_v0 = vmul.f32 %v6112_v56, %v7584_v8 }
 0x64b   :  { %v6116_v53 = vpop.eup %6115  ;;  %v1920_v18 = vmul.f32 %v6114_v21, %v7587_v62 }
 0x64c   :  { %v1921_v34 = vmul.f32 %v6116_v53, %v7578_v40  ;;  %v1860_v47 = vpop.xlane.xlu1 %1859 }
 0x64d   :  { %v6118_v48 = vpop.eup %6117  ;;  %v1941_v16 = vpack.c.bf16 %v1920_v18, %v1919_v0 }
 0x64e   :  { %3441 = vrot.lane.b32.xlu0 %v6512_v36, %s6399_s30  ;;  %v1922_v19 = vmul.f32 %v6118_v48, %v7593_v23 }
 0x64f   :  { %5477 = vmatprep.mubr.bf16.mxu0 %v1941_v16 }
 0x650   :  { %5536 = vmatpush3.bf16.xpose.msra.mxu0 %v2584_v59  ;;  %v1866_v32 = vpop.xlane.xlu0 %1865  ;;  %v1942_v8 = vpack.c.bf16 %v1922_v19, %v1921_v34 }
 0x651   :  { %v6120_v5 = vpop.eup %6119  ;;  %6127 = vrcp.f32 %v1866_v32 }
 0x652   :  { %3141 = vrot.lane.b32.xlu0 %v9079_v17, %s6398_s29  ;;  %5478 = vmatmul.mubr.bf16.gmra.mxu0 %v1942_v8  ;;  %v6122_v62 = vpop.eup %6121  ;;  %6129 = vrcp.f32 %v1860_v47  ;;  %v1926_v38 = vmul.f32 %v6120_v5, %v7602_v51 }
 0x653   :  { %v6124_v50 = vpop.eup %6123  ;;  %6131 = vrcp.f32 %v1864_v10  ;;  %v1923_v63 = vmul.f32 %v6122_v62, %v7605_v29 }
 0x654   :  { %v1862_v40 = vpop.xlane.xlu0 %1861  ;;  %v1925_v26 = vmul.f32 %v6124_v50, %v7596_v2 }
 0x655   :  { %v6126_v23 = vpop.eup %6125  ;;  %6133 = vrcp.f32 %v1862_v40 }
 0x656   :  { %3135 = vrot.lane.b32.xlu0 %v9084_v44, %s6398_s29  ;;  %v1924_v61 = vmul.f32 %v6126_v23, %v7611_v3  ;;  %v1944_v56 = vpack.c.bf16 %v1926_v38, %v1925_v26  ;;  %v9137_v23 = vld [vmem:[#allocation19_spill] sm:$0xff]  ;;  %v9138_v26 = vld [vmem:[#allocation16_spill] sm:$0xff] }
 0x658   :  { %v1943_v25 = vpack.c.bf16 %v1924_v61, %v1923_v63 }
 0x65a   :  { %3133 = vrot.lane.b32.xlu0 %v9086_v7, %s6398_s29  ;;  %5481 = vmatprep.mubr.bf16.mxu0 %v1943_v25 }
 0x65b   :  { %5482 = vmatmul.mubr.bf16.gmra.mxu0 %v1944_v56 }
 0x65e   :  { %v6128_v21 = vpop.eup %6127 }
 0x65f   :  { %v6130_v10 = vpop.eup %6129  ;;  %v1930_v53 = vmul.f32 %v6128_v21, %v7624_v57 }
 0x660   :  { %v6132_v0 = vpop.eup %6131  ;;  %v1927_v18 = vmul.f32 %v6130_v10, %v7619_v24  ;;  %v2540_v24 = vpop.permute.xlu0 %2539 }
 0x661   :  { %v1929_v3 = vmul.f32 %v6132_v0, %v7613_v52  ;;  %v2542_v52 = vpop.permute.xlu1 %2541 }
 0x662   :  { %v6134_v51 = vpop.eup %6133 }
 0x663   :  { %v1928_v29 = vmul.f32 %v6134_v51, %v7629_v11  ;;  %v1946_v48 = vpack.c.bf16 %v1930_v53, %v1929_v3 }
 0x665   :  { %v1945_v2 = vpack.c.bf16 %v1928_v29, %v1927_v18  ;;  %v9139_v29 = vld [vmem:[#allocation30_spill] sm:$0xff] }
 0x667   :  { %5485 = vmatprep.mubr.bf16.mxu0 %v1945_v2 }
 0x668   :  { %5486 = vmatmul.mubr.bf16.gmra.mxu0 %v1946_v48 }
 0x669   :  { %5537 = vmatprep.mubr.msk.bf16.mxu0 %vm396_vm1, %v7521_v6 }
 0x670   :  { %5538 = vmatmul.mubr.msk.bf16.vlgmr.msra.gmra.mxu0 %vm396_vm1, %v7530_v1 }
 0x671   :  { %5541 = vmatprep.mubr.msk.bf16.mxu0 %vm396_vm1, %v7564_v13 }
 0x678   :  { %5542 = vmatmul.mubr.msk.bf16.gmra.mxu0 %vm396_vm1, %v7566_v4 }
 0x679   :  { %5545 = vmatprep.mubr.msk.bf16.mxu0 %vm396_vm1, %v7730_v9 }
 0x680   :  { %5546 = vmatmul.mubr.msk.bf16.gmra.mxu0 %vm396_vm1, %v7738_v41 }
 0x681   :  { %5549 = vmatprep.mubr.msk.bf16.mxu0 %vm396_vm1, %v2540_v24  ;;  %v2707_v6 = vpop.xlane.xlu1 %2706 }
 0x682   :  { %v2769_v59 = vsub.f32 %v7658_v27, %v2707_v6 }
 0x684   :  { %v2802_v5 = vmul.f32 1.442695, %v2769_v59  ;;  %v9141_v59 = vld [vmem:[#allocation29_spill] sm:$0xff] }
 0x685   :  { %v2713_v57 = vpop.xlane.xlu1 %2712 }
 0x686   :  { %v2772_v25 = vsub.f32 %v9138_v26, %v2713_v57 }
 0x688   :  { %5550 = vmatmul.mubr.msk.bf16.gmra.mxu0 %vm396_vm1, %v2542_v52  ;;  %v2808_v10 = vmul.f32 1.442695, %v2772_v25 }
 0x689   :  { %v2705_v1 = vpop.xlane.xlu0 %2704  ;;  %v2717_v11 = vpop.xlane.xlu1 %2716 }
 0x68a   :  { %v2768_v13 = vsub.f32 %v7654_v42, %v2705_v1  ;;  %v2774_v62 = vsub.f32 %v7660_v28, %v2717_v11 }
 0x68c   :  { %v2800_v16 = vmul.f32 1.442695, %v2768_v13  ;;  %v2812_v63 = vmul.f32 1.442695, %v2774_v62 }
 0x68d   :  { %v2709_v4 = vpop.xlane.xlu0 %2708  ;;  %v2721_v34 = vpop.xlane.xlu1 %2720 }
 0x68e   :  { %6135 = vpow2.f32 %v2800_v16  ;;  %v2770_v9 = vsub.f32 %v7652_v45, %v2709_v4  ;;  %v2776_v40 = vsub.f32 %v7671_v15, %v2721_v34  ;;  %v9140_v16 = vld [vmem:[#allocation32_spill] sm:$0xff] }
 0x690   :  { %v2804_v19 = vmul.f32 1.442695, %v2770_v9  ;;  %v2816_v56 = vmul.f32 1.442695, %v2776_v40 }
 0x691   :  { %v2711_v41 = vpop.xlane.xlu0 %2710  ;;  %v2725_v47 = vpop.xlane.xlu1 %2724 }
 0x692   :  { %6137 = vpow2.f32 %v2804_v19  ;;  %v2771_v32 = vsub.f32 %v7656_v43, %v2711_v41  ;;  %v2778_v3 = vsub.f32 %v9139_v29, %v2725_v47 }
 0x694   :  { %v2806_v8 = vmul.f32 1.442695, %v2771_v32  ;;  %v2820_v57 = vmul.f32 1.442695, %v2778_v3 }
 0x695   :  { %v2715_v50 = vpop.xlane.xlu0 %2714  ;;  %v2729_v42 = vpop.xlane.xlu1 %2728 }
 0x696   :  { %6139 = vpow2.f32 %v2806_v8  ;;  %v2773_v38 = vsub.f32 %v9137_v23, %v2715_v50  ;;  %v2780_v4 = vsub.f32 %v9140_v16, %v2729_v42 }
 0x697   :  { %6141 = vpow2.f32 %v2802_v5 }
 0x698   :  { %v2810_v45 = vmul.f32 1.442695, %v2773_v38  ;;  %v2824_v19 = vmul.f32 1.442695, %v2780_v4 }
 0x699   :  { %v2719_v27 = vpop.xlane.xlu0 %2718  ;;  %v2733_v61 = vpop.xlane.xlu1 %2732 }
 0x69a   :  { %6143 = vpow2.f32 %v2810_v45  ;;  %v2775_v28 = vsub.f32 %v7664_v35, %v2719_v27  ;;  %v2782_v41 = vsub.f32 %v9141_v59, %v2733_v61 }
 0x69b   :  { %v7808_v43 = vpop.eup %6135  ;;  %6145 = vpow2.f32 %v2812_v63 }
 0x69c   :  { %2864 = vadd.xlane.f32.xlu1 %v7808_v43  ;;  %6147 = vpow2.f32 %v2816_v56  ;;  %v2814_v51 = vmul.f32 1.442695, %v2775_v28  ;;  %v2828_v5 = vmul.f32 1.442695, %v2782_v41 }
 0x69d   :  { %v2723_v15 = vpop.xlane.xlu0 %2722  ;;  %v3023_v21 = vpop.permute.xlu1 %3022  ;;  %6149 = vpow2.f32 %v2808_v10 }
 0x69e   :  { %5553 = vmatprep.subr.bf16.mxu1 %v3023_v21  ;;  %6151 = vpow2.f32 %v2814_v51  ;;  %v2777_v1 = vsub.f32 %v7678_v54, %v2723_v15 }
 0x69f   :  { %v7812_v0 = vpop.eup %6137  ;;  %5554 = vmatpush3.bf16.msra.mxu1 %v3023_v21 }
 0x6a0   :  { %2868 = vadd.xlane.f32.xlu0 %v7812_v0  ;;  %v2818_v34 = vmul.f32 1.442695, %v2777_v1 }
 0x6a1   :  { %v2727_v53 = vpop.xlane.xlu0 %2726  ;;  %v3017_v18 = vpop.permute.xlu1 %3016 }
 0x6a2   :  { %v2779_v2 = vsub.f32 %v7674_v31, %v2727_v53 }
 0x6a3   :  { %v7817_v48 = vpop.eup %6139 }
 0x6a4   :  { %v2822_v35 = vmul.f32 1.442695, %v2779_v2  ;;  %2870 = vadd.xlane.f32.xlu0 %v7817_v48  ;;  %v7822_v6 = vpop.eup %6141  ;;  %v9142_v2 = vld [vmem:[#allocation4_spill] sm:$0xff] }
 0x6a5   :  { %v7820_v52 = vpop.xlane.xlu0 %2730  ;;  %v3144_v24 = vpop.permute.xlu1 %3143 }
 0x6a6   :  { %6153 = vpow2.f32 %v2822_v35  ;;  %5585 = vmatprep.subr.bf16.mxu0 %v3144_v24  ;;  %v2781_v51 = vsub.f32 %v7704_v12, %v7820_v52 }
 0x6a7   :  { %v7825_v11 = vpop.eup %6143  ;;  %5586 = vmatpush3.bf16.msra.mxu0 %v3144_v24  ;;  %6155 = vpow2.f32 %v2820_v57 }
 0x6a8   :  { %2874 = vadd.xlane.f32.xlu1 %v7825_v11  ;;  %2866 = vadd.xlane.f32.xlu0 %v7822_v6  ;;  %v7829_v13 = vpop.eup %6145  ;;  %6157 = vpow2.f32 %v2818_v34 }
 0x6a9   :  { %v2735_v31 = vpop.xlane.xlu0 %2734  ;;  %v7832_v9 = vpop.eup %6147  ;;  %6159 = vpow2.f32 %v2824_v19 }
 0x6aa   :  { %v7837_v47 = vpop.eup %6149  ;;  %v2783_v62 = vsub.f32 %v7697_v20, %v2735_v31  ;;  %6161 = vpow2.f32 %v2828_v5  ;;  %v3140_v26 = vpop.permute.xlu1 %3139 }
 0x6ab   :  { %v7840_v8 = vpop.eup %6151 }
 0x6ac   :  { %2876 = vadd.xlane.f32.xlu0 %v7829_v13  ;;  %2880 = vadd.xlane.f32.xlu1 %v7832_v9  ;;  %v2830_v40 = vmul.f32 1.442695, %v2783_v62 }
 0x6ad   :  { %v3021_v54 = vpop.permute.xlu0 %3020 }
 0x6ae   :  { %5555 = vmatprep.subr.bf16.mxu1 %v3021_v54  ;;  %6163 = vpow2.f32 %v2830_v40  ;;  %v7868_v28 = vpop.permute.xlu1 %3439 }
 0x6af   :  { %5556 = vmatpush3.bf16.msra.mxu1 %v3021_v54 }
 0x6b0   :  { %2872 = vadd.xlane.f32.xlu0 %v7837_v47 }
 0x6b1   :  { %v3019_v32 = vpop.permute.xlu0 %3018 }
 0x6b2   :  { %5557 = vmatprep.subr.bf16.mxu1 %v3019_v32  ;;  %v3138_v21 = vpop.permute.xlu1 %3137 }
 0x6b3   :  { %v7843_v50 = vpop.eup %6153  ;;  %5558 = vmatpush3.bf16.msra.mxu1 %v3019_v32 }
 0x6b4   :  { %2878 = vadd.xlane.f32.xlu0 %v7840_v8  ;;  %2886 = vadd.xlane.f32.xlu1 %v7843_v50  ;;  %v7847_v23 = vpop.eup %6155 }
 0x6b5   :  { %5559 = vmatprep.subr.bf16.mxu1 %v3017_v18  ;;  %v3015_v42 = vpop.permute.xlu0 %3014  ;;  %v7850_v20 = vpop.eup %6157 }
 0x6b6   :  { %v7853_v63 = vpop.eup %6159  ;;  %v7872_v53 = vpop.permute.xlu1 %3437 }
 0x6b7   :  { %5560 = vmatpush3.bf16.msra.mxu1 %v3017_v18  ;;  %v7856_v61 = vpop.eup %6161  ;;  %v2826_v18 = vmul.f32 1.442695, %v2781_v51 }
 0x6b8   :  { %2884 = vadd.xlane.f32.xlu0 %v7847_v23  ;;  %5561 = vmatprep.subr.bf16.mxu1 %v3015_v42 }
 0x6b9   :  { %v3013_v38 = vpop.permute.xlu0 %3012  ;;  %6165 = vpow2.f32 %v2826_v18 }
 0x6ba   :  { %v3132_v3 = vpop.permute.xlu1 %3131 }
 0x6bb   :  { %5562 = vmatpush3.bf16.msra.mxu1 %v3015_v42  ;;  %v7863_v56 = vpop.eup %6163 }
 0x6bc   :  { %2882 = vadd.xlane.f32.xlu0 %v7850_v20  ;;  %5563 = vmatprep.subr.bf16.mxu1 %v3013_v38 }
 0x6bd   :  { %v3011_v45 = vpop.permute.xlu0 %3010 }
 0x6bf   :  { %5564 = vmatpush3.bf16.msra.mxu1 %v3013_v38 }
 0x6c0   :  { %2888 = vadd.xlane.f32.xlu0 %v7853_v63  ;;  %5565 = vmatprep.subr.bf16.mxu1 %v3011_v45 }
 0x6c1   :  { %v3009_v27 = vpop.permute.xlu0 %3008 }
 0x6c3   :  { %5566 = vmatpush3.bf16.msra.mxu1 %v3011_v45 }
 0x6c4   :  { %2892 = vadd.xlane.f32.xlu0 %v7856_v61  ;;  %5567 = vmatprep.subr.bf16.mxu1 %v3009_v27 }
 0x6c5   :  { %v7859_v25 = vpop.permute.xlu0 %3441  ;;  %3435 = vrot.lane.b32.xlu1 %v6508_v33, %s6399_s30 }
 0x6c6   :  { %v7880_v12 = vpop.eup %6165 }
 0x6c7   :  { %5568 = vmatpush3.bf16.msra.mxu1 %v3009_v27 }
 0x6c8   :  { %2894 = vadd.xlane.f32.xlu0 %v7863_v56  ;;  %5829 = vmatprep.subr.msk.bf16.mxu1 %vm396_vm1, %v7859_v25 }
 0x6c9   :  { %v3142_v15 = vpop.permute.xlu0 %3141 }
 0x6ca   :  { %5587 = vmatprep.subr.bf16.mxu0 %v3142_v15 }
 0x6cb   :  { %5588 = vmatpush3.bf16.msra.mxu0 %v3142_v15 }
 0x6cc   :  { %5589 = vmatprep.subr.bf16.mxu0 %v3140_v26 }
 0x6cd   :  { %v3136_v10 = vpop.permute.xlu0 %3135 }
 0x6cf   :  { %5590 = vmatpush3.bf16.msra.mxu0 %v3140_v26 }
 0x6d0   :  { %5591 = vmatprep.subr.bf16.mxu0 %v3138_v21 }
 0x6d1   :  { %v3134_v29 = vpop.permute.xlu0 %3133 }
 0x6d3   :  { %5592 = vmatpush3.bf16.msra.mxu0 %v3138_v21 }
 0x6d4   :  { %5593 = vmatprep.subr.bf16.mxu0 %v3136_v10 }
 0x6d7   :  { %5594 = vmatpush3.bf16.msra.mxu0 %v3136_v10  ;;  %v7897_v35 = vpop.f32.mrf.mxu0 }
 0x6d8   :  { %5595 = vmatprep.subr.bf16.mxu0 %v3134_v29  ;;  %9143 = vst [vmem:[#allocation36_spill] sm:$0xff] %v7897_v35 }
 0x6d9   :  { %v7901_v52 = vpop.f32.mrf.mxu0 }
 0x6da   :  { %9144 = vst [vmem:[#allocation35_spill] sm:$0xff] %v7901_v52 }
 0x6db   :  { %5596 = vmatpush3.bf16.msra.mxu0 %v3134_v29  ;;  %v7905_v24 = vpop.f32.mrf.mxu0 }
 0x6dc   :  { %5597 = vmatprep.subr.bf16.mxu0 %v3132_v3  ;;  %9145 = vst [vmem:[#allocation34_spill] sm:$0xff] %v7905_v24 }
 0x6dd   :  { %v7909_v57 = vpop.f32.mrf.mxu0 }
 0x6de   :  { %3433 = vrot.lane.b32.xlu0 %v9088_v37, %s6399_s30  ;;  %9146 = vst [vmem:[#allocation18_spill] sm:$0xff] %v7909_v57 }
 0x6df   :  { %5598 = vmatpush3.bf16.msra.mxu0 %v3132_v3 }
 0x6e2   :  { %3616 = vrot.lane.b32.xlu0 %v9079_v17, %s6399_s30 }
 0x6e6   :  { %3429 = vrot.lane.b32.xlu0 %v6532_v49, %s6399_s30 }
 0x6e9   :  { %2890 = vadd.xlane.f32.xlu1 %v7880_v12 }
 0x6ea   :  { %3427 = vrot.lane.b32.xlu0 %v6500_v22, %s6399_s30 }
 0x6ee   :  { %3411 = vrot.lane.b32.xlu0 %v6500_v22, %s6400_s5 }
 0x6f2   :  { %3415 = vrot.lane.b32.xlu0 %v6526_v46, %s6400_s5 }
 0x6f6   :  { %3608 = vrot.lane.b32.xlu0 %v9086_v7, %s6399_s30 }
 0x6fa   :  { %3129 = vrot.lane.b32.xlu1 %v9142_v2, %s6398_s29 }
 0x6fe   :  { %3618 = vrot.lane.b32.xlu1 %v6546_v60, %s6399_s30 }
 0x702   :  { %3431 = vrot.lane.b32.xlu1 %v6526_v46, %s6399_s30 }
 0x706   :  { %3614 = vrot.lane.b32.xlu1 %v9090_v55, %s6399_s30 }
 0x70a   :  { %3612 = vrot.lane.b32.xlu1 %v9091_v14, %s6399_s30 }
 0x70e   :  { %3413 = vrot.lane.b32.xlu1 %v6532_v49, %s6400_s5 }
 0x712   :  { %3610 = vrot.lane.b32.xlu1 %v9084_v44, %s6399_s30  ;;  %v7913_v1 = vpop.f32.mrf.mxu0 }
 0x713   :  { %9147 = vst [vmem:[#allocation20_spill] sm:$0xff] %v7913_v1 }
 0x714   :  { %v7915_v31 = vpop.f32.mrf.mxu0 }
 0x715   :  { %9148 = vst [vmem:[#allocation23_spill] sm:$0xff] %v7915_v31 }
 0x716   :  { %3417 = vrot.lane.b32.xlu1 %v9088_v37, %s6400_s5  ;;  %v7919_v16 = vpop.f32.mrf.mxu0 }
 0x717   :  { %9149 = vst [vmem:[#allocation21_spill] sm:$0xff] %v7919_v16 }
 0x718   :  { %v7921_v4 = vpop.f32.mrf.mxu0 }
 0x719   :  { %9150 = vst [vmem:[#allocation26_spill] sm:$0xff] %v7921_v4 }
 0x71b   :  { %v7923_v34 = vpop.f32.mrf.mxu0 }
 0x71c   :  { %9151 = vst [vmem:[#allocation27_spill] sm:$0xff] %v7923_v34 }
 0x71d   :  { %v7925_v54 = vpop.f32.mrf.mxu0 }
 0x71e   :  { %9152 = vst [vmem:[#allocation28_spill] sm:$0xff] %v7925_v54 }
 0x71f   :  { %v7927_v19 = vpop.f32.mrf.mxu0 }
 0x720   :  { %9153 = vst [vmem:[#allocation33_spill] sm:$0xff] %v7927_v19 }
 0x721   :  { %v7929_v59 = vpop.f32.mrf.mxu0 }
 0x722   :  { %9154 = vst [vmem:[#allocation31_spill] sm:$0xff] %v7929_v59 }
 0x725   :  { %v2865_v42 = vpop.xlane.xlu1 %2864 }
 0x728   :  { %v7931_v41 = vpop.f32.mrf.mxu0 }
 0x729   :  { %9155 = vst [vmem:[#allocation38_spill] sm:$0xff] %v7931_v41  ;;  %v2869_v32 = vpop.xlane.xlu0 %2868 }
 0x72a   :  { %v7933_v5 = vpop.f32.mrf.mxu0 }
 0x72b   :  { %9156 = vst [vmem:[#allocation37_spill] sm:$0xff] %v7933_v5 }
 0x72c   :  { %v7935_v62 = vpop.f32.mrf.mxu0 }
 0x72d   :  { %9157 = vst [vmem:[#allocation39_spill] sm:$0xff] %v7935_v62  ;;  %v2871_v40 = vpop.xlane.xlu0 %2870 }
 0x72e   :  { %v7937_v38 = vpop.f32.mrf.mxu0  ;;  %6167 = vrcp.f32 %v2871_v40 }
 0x72f   :  { %9158 = vst [vmem:[#allocation40_spill] sm:$0xff] %v7937_v38  ;;  %6169 = vrcp.f32 %v2865_v42 }
 0x730   :  { %v7939_v45 = vpop.f32.mrf.mxu0  ;;  %6171 = vrcp.f32 %v2869_v32 }
 0x731   :  { %v2867_v27 = vpop.xlane.xlu0 %2866  ;;  %v2875_v21 = vpop.xlane.xlu1 %2874 }
 0x732   :  { %6173 = vrcp.f32 %v2867_v27  ;;  %v7941_v26 = vpop.f32.mrf.mxu0 }
 0x733   :  { %6175 = vrcp.f32 %v2875_v21 }
 0x734   :  { %v7943_v15 = vpop.f32.mrf.mxu0 }
 0x735   :  { %v2877_v10 = vpop.xlane.xlu0 %2876  ;;  %2742 = vmax.xlane.f32.xlu0 %v7943_v15  ;;  %v2881_v21 = vpop.xlane.xlu1 %2880 }
 0x736   :  { %v7946_v51 = vpop.f32.mrf.mxu0 }
 0x738   :  { %v7948_v18 = vpop.f32.mrf.mxu0 }
 0x739   :  { %v2873_v29 = vpop.xlane.xlu0 %2872  ;;  %2738 = vmax.xlane.f32.xlu0 %v7946_v51 }
 0x73a   :  { %6177 = vrcp.f32 %v2873_v29  ;;  %v7951_v3 = vpop.f32.mrf.mxu0  ;;  %2740 = vmax.xlane.f32.xlu1 %v7939_v45 }
 0x73b   :  { %v6168_v32 = vpop.eup %6167  ;;  %6179 = vrcp.f32 %v2877_v10 }
 0x73c   :  { %v7954_v42 = vpop.f32.mrf.mxu0  ;;  %v6170_v40 = vpop.eup %6169  ;;  %v2963_v41 = vmul.f32 %v6168_v32, %v7817_v48 }
 0x73d   :  { %v2879_v27 = vpop.xlane.xlu0 %2878  ;;  %2750 = vmax.xlane.f32.xlu0 %v7954_v42  ;;  %v6172_v62 = vpop.eup %6171  ;;  %v2960_v10 = vmul.f32 %v6170_v40, %v7808_v43 }
 0x73e   :  { %6181 = vrcp.f32 %v2879_v27  ;;  %v7957_v38 = vpop.f32.mrf.mxu0  ;;  %2736 = vmax.xlane.f32.xlu1 %v7941_v26  ;;  %v2962_v34 = vmul.f32 %v6172_v62, %v7812_v0  ;;  %v2887_v54 = vpop.xlane.xlu1 %2886  ;;  %v3489_v0 = vsel %vm396_vm1, %v7859_v25, 0 }
 0x73f   :  { %v6174_v29 = vpop.eup %6173 }
 0x740   :  { %v7961_v5 = vpop.f32.mrf.mxu0  ;;  %v2961_v19 = vmul.f32 %v6174_v29, %v7822_v6  ;;  %v2993_v4 = vpack.c.bf16 %v2963_v41, %v2962_v34  ;;  %v6176_v43 = vpop.eup %6175 }
 0x741   :  { %v2885_v59 = vpop.xlane.xlu0 %2884  ;;  %2746 = vmax.xlane.f32.xlu0 %v7957_v38 }
 0x742   :  { %v7967_v27 = vpop.f32.mrf.mxu0  ;;  %2748 = vmax.xlane.f32.xlu1 %v7948_v18  ;;  %v2992_v16 = vpack.c.bf16 %v2961_v19, %v2960_v10  ;;  %6183 = vrcp.f32 %v2885_v59 }
 0x743   :  { %6185 = vrcp.f32 %v2881_v21 }
 0x744   :  { %v7970_v48 = vpop.f32.mrf.mxu0  ;;  %5569 = vmatprep.mubr.bf16.mxu1 %v2992_v16  ;;  %6187 = vrcp.f32 %v2887_v54  ;;  %v2965_v54 = vmul.f32 %v6176_v43, %v7825_v11  ;;  %v3486_v11 = vsel %vm396_vm1, %v7868_v28, 0 }
 0x745   :  { %v2883_v6 = vpop.xlane.xlu0 %2882  ;;  %2758 = vmax.xlane.f32.xlu0 %v7970_v48  ;;  %5570 = vmatmul.mubr.bf16.vlgmr.msra.gmra.mxu1 %v2993_v4 }
 0x746   :  { %6189 = vrcp.f32 %v2883_v6  ;;  %5618 = vmatpush3.bf16.xpose.msra.mxu1 %v3489_v0  ;;  %2744 = vmax.xlane.f32.xlu1 %v7951_v3  ;;  %v7978_v34 = vpop.f32.mrf.mxu0 }
 0x747   :  { %v6178_v19 = vpop.eup %6177  ;;  %5830 = vmatprep.subr.msk.bf16.mxu1 %vm396_vm1, %v7868_v28 }
 0x748   :  { %v2964_v16 = vmul.f32 %v6178_v19, %v7837_v47  ;;  %v6180_v59 = vpop.eup %6179  ;;  %v7984_v41 = vpop.f32.mrf.mxu0 }
 0x749   :  { %2754 = vmax.xlane.f32.xlu0 %v7978_v34  ;;  %v2889_v62 = vpop.xlane.xlu0 %2888  ;;  %v2966_v32 = vmul.f32 %v6180_v59, %v7829_v13  ;;  %v3436_v59 = vpop.permute.xlu1 %3435 }
 0x74a   :  { %2756 = vmax.xlane.f32.xlu1 %v7961_v5  ;;  %v2994_v25 = vpack.c.bf16 %v2965_v54, %v2964_v16  ;;  %v7994_v29 = vpop.f32.mrf.mxu0  ;;  %v3483_v16 = vsel %vm396_vm1, %v7872_v53, 0 }
 0x74b   :  { %v6182_v4 = vpop.eup %6181 }
 0x74c   :  { %5573 = vmatprep.mubr.bf16.mxu1 %v2994_v25  ;;  %v2967_v40 = vmul.f32 %v6182_v4, %v7840_v8  ;;  %v7998_v28 = vpop.f32.mrf.mxu0 }
 0x74d   :  { %2764 = vmax.xlane.f32.xlu0 %v7984_v41  ;;  %v2893_v8 = vpop.xlane.xlu0 %2892 }
 0x74e   :  { %5620 = vmatpush3.bf16.xpose.msra.mxu1 %v3486_v11  ;;  %2752 = vmax.xlane.f32.xlu1 %v7967_v27  ;;  %v2995_v47 = vpack.c.bf16 %v2967_v40, %v2966_v32 }
 0x74f   :  { %5831 = vmatprep.subr.msk.bf16.mxu1 %vm396_vm1, %v7872_v53  ;;  %v6184_v21 = vpop.eup %6183 }
 0x750   :  { %5574 = vmatmul.mubr.bf16.gmra.mxu1 %v2995_v47  ;;  %v6186_v10 = vpop.eup %6185  ;;  %v2970_v6 = vmul.f32 %v6184_v21, %v7847_v23  ;;  %v8007_v23 = vpop.f32.mrf.mxu0 }
 0x751   :  { %2760 = vmax.xlane.f32.xlu0 %v7994_v29  ;;  %v6188_v13 = vpop.eup %6187  ;;  %v2968_v0 = vmul.f32 %v6186_v10, %v7832_v9  ;;  %v2895_v32 = vpop.xlane.xlu0 %2894  ;;  %v3480_v9 = vsel %vm396_vm1, %v3436_v59, 0 }
 0x752   :  { %v2971_v54 = vmul.f32 %v6188_v13, %v7843_v50  ;;  %6191 = vrcp.f32 %v2895_v32 }
 0x753   :  { %v6190_v43 = vpop.eup %6189  ;;  %6193 = vrcp.f32 %v2889_v62 }
 0x754   :  { %v2969_v19 = vmul.f32 %v6190_v43, %v7850_v20  ;;  %v2997_v4 = vpack.c.bf16 %v2971_v54, %v2970_v6  ;;  %6195 = vrcp.f32 %v2893_v8 }
 0x755   :  { %2766 = vmax.xlane.f32.xlu0 %v7998_v28  ;;  %v3434_v20 = vpop.permute.xlu0 %3433 }
 0x756   :  { %5622 = vmatpush3.bf16.xpose.msra.mxu1 %v3483_v16  ;;  %v2996_v25 = vpack.c.bf16 %v2969_v19, %v2968_v0  ;;  %v3477_v50 = vsel %vm396_vm1, %v3434_v20, 0 }
 0x757   :  { %5832 = vmatprep.subr.msk.bf16.mxu1 %vm396_vm1, %v3436_v59 }
 0x758   :  { %5577 = vmatprep.mubr.bf16.mxu1 %v2996_v25 }
 0x759   :  { %2762 = vmax.xlane.f32.xlu0 %v8007_v23  ;;  %5578 = vmatmul.mubr.bf16.gmra.mxu1 %v2997_v4  ;;  %v8017_v40 = vpop.permute.xlu0 %3616 }
 0x75d   :  { %v3430_v47 = vpop.permute.xlu0 %3429 }
 0x75e   :  { %5624 = vmatpush3.bf16.xpose.msra.mxu1 %v3480_v9 }
 0x75f   :  { %5833 = vmatprep.subr.msk.bf16.mxu1 %vm396_vm1, %v3434_v20  ;;  %3419 = vrot.lane.b32.xlu1 %v6508_v33, %s6400_s5  ;;  %v6192_v10 = vpop.eup %6191  ;;  %v3471_v20 = vsel %vm396_vm1, %v3430_v47, 0 }
 0x760   :  { %v6194_v13 = vpop.eup %6193  ;;  %v2975_v19 = vmul.f32 %v6192_v10, %v7863_v56 }
 0x761   :  { %v6196_v6 = vpop.eup %6195  ;;  %v3428_v0 = vpop.permute.xlu0 %3427  ;;  %v2972_v16 = vmul.f32 %v6194_v13, %v7853_v63 }
 0x762   :  { %v2974_v59 = vmul.f32 %v6196_v6, %v7856_v61  ;;  %v3468_v63 = vsel %vm396_vm1, %v3428_v0, 0 }
 0x764   :  { %v2999_v4 = vpack.c.bf16 %v2975_v19, %v2974_v59 }
 0x765   :  { %v3412_v32 = vpop.permute.xlu0 %3411 }
 0x766   :  { %5626 = vmatpush3.bf16.xpose.msra.mxu1 %v3477_v50 }
 0x76f   :  { %3421 = vrot.lane.b32.xlu0 %v6504_v30, %s6400_s5 }
 0x772   :  { %v2891_v53 = vpop.xlane.xlu1 %2890 }
 0x773   :  { %6197 = vrcp.f32 %v2891_v53 }
 0x776   :  { %v3130_v11 = vpop.permute.xlu1 %3129 }
 0x777   :  { %5599 = vmatprep.subr.bf16.mxu0 %v3130_v11 }
 0x778   :  { %5600 = vmatpush3.bf16.msra.mxu0 %v3130_v11 }
 0x77a   :  { %v8019_v21 = vpop.permute.xlu1 %3618 }
 0x77b   :  { %5837 = vmatprep.subr.msk.bf16.mxu0 %vm396_vm1, %v8019_v21 }
 0x77e   :  { %v3432_v43 = vpop.permute.xlu1 %3431 }
 0x77f   :  { %5834 = vmatprep.subr.msk.bf16.mxu1 %vm396_vm1, %v3432_v43  ;;  %v3474_v62 = vsel %vm396_vm1, %v3432_v43, 0 }
 0x780   :  { %v6198_v8 = vpop.eup %6197  ;;  %5628 = vmatpush3.bf16.xpose.msra.mxu1 %v3474_v62 }
 0x781   :  { %5835 = vmatprep.subr.msk.bf16.mxu1 %vm396_vm1, %v3430_v47  ;;  %v2973_v54 = vmul.f32 %v6198_v8, %v7880_v12  ;;  %v3416_v12 = vpop.permute.xlu0 %3415 }
 0x782   :  { %v8030_v9 = vpop.permute.xlu1 %3614 }
 0x783   :  { %v2998_v25 = vpack.c.bf16 %v2973_v54, %v2972_v16 }
 0x785   :  { %5581 = vmatprep.mubr.bf16.mxu1 %v2998_v25  ;;  %v8043_v11 = vpop.permute.xlu0 %3608 }
 0x786   :  { %5582 = vmatmul.mubr.bf16.gmra.mxu1 %v2999_v4  ;;  %v8035_v56 = vpop.permute.xlu1 %3612 }
 0x787   :  { %5633 = vmatprep.mubr.msk.bf16.mxu1 %vm396_vm1, %v3412_v32 }
 0x788   :  { %5630 = vmatpush3.bf16.xpose.msra.mxu1 %v3471_v20 }
 0x789   :  { %5836 = vmatprep.subr.msk.bf16.mxu1 %vm396_vm1, %v3428_v0 }
 0x78a   :  { %v3414_v61 = vpop.permute.xlu1 %3413 }
 0x78e   :  { %v8039_v50 = vpop.permute.xlu1 %3610 }
 0x790   :  { %5632 = vmatpush3.bf16.xpose.msra.mxu1 %v3468_v63 }
 0x792   :  { %v3418_v53 = vpop.permute.xlu1 %3417 }
 0x797   :  { %5634 = vmatmul.mubr.msk.bf16.vlgmr.msra.gmra.mxu1 %vm396_vm1, %v3414_v61 }
 0x798   :  { %5637 = vmatprep.mubr.msk.bf16.mxu1 %vm396_vm1, %v3416_v12 }
 0x79f   :  { %5638 = vmatmul.mubr.msk.bf16.gmra.mxu1 %vm396_vm1, %v3418_v53 }
 0x7be   :  { %v2743_v47 = vpop.xlane.xlu0 %2742 }
 0x7bf   :  { %v2787_v16 = vsub.f32 %v7943_v15, %v2743_v47 }
 0x7c1   :  { %v2838_v32 = vmul.f32 1.442695, %v2787_v16 }
 0x7c2   :  { %v2739_v10 = vpop.xlane.xlu0 %2738 }
 0x7c3   :  { %v2785_v13 = vsub.f32 %v7946_v51, %v2739_v10  ;;  %v2741_v43 = vpop.xlane.xlu1 %2740 }
 0x7c4   :  { %v2786_v6 = vsub.f32 %v7939_v45, %v2741_v43 }
 0x7c5   :  { %v2834_v0 = vmul.f32 1.442695, %v2785_v13 }
 0x7c6   :  { %v2836_v62 = vmul.f32 1.442695, %v2786_v6  ;;  %v2751_v8 = vpop.xlane.xlu0 %2750 }
 0x7c7   :  { %v2737_v19 = vpop.xlane.xlu1 %2736 }
 0x7c8   :  { %6199 = vpow2.f32 %v2836_v62  ;;  %v2784_v54 = vsub.f32 %v7941_v26, %v2737_v19 }
 0x7c9   :  { %6201 = vpow2.f32 %v2834_v0 }
 0x7ca   :  { %v2832_v59 = vmul.f32 1.442695, %v2784_v54  ;;  %v2747_v25 = vpop.xlane.xlu0 %2746 }
 0x7cb   :  { %v2749_v4 = vpop.xlane.xlu1 %2748  ;;  %v2789_v19 = vsub.f32 %v7957_v38, %v2747_v25 }
 0x7cc   :  { %6203 = vpow2.f32 %v2832_v59  ;;  %v2790_v0 = vsub.f32 %v7948_v18, %v2749_v4  ;;  %v2791_v59 = vsub.f32 %v7954_v42, %v2751_v8 }
 0x7cd   :  { %6205 = vpow2.f32 %v2838_v32  ;;  %v2842_v32 = vmul.f32 1.442695, %v2789_v19 }
 0x7ce   :  { %v2759_v20 = vpop.xlane.xlu0 %2758  ;;  %v2844_v16 = vmul.f32 1.442695, %v2790_v0  ;;  %v2846_v1 = vmul.f32 1.442695, %v2791_v59 }
 0x7cf   :  { %v2745_v51 = vpop.xlane.xlu1 %2744  ;;  %v2795_v38 = vsub.f32 %v7970_v48, %v2759_v20 }
 0x7d0   :  { %v2788_v54 = vsub.f32 %v7951_v3, %v2745_v51  ;;  %6207 = vpow2.f32 %v2844_v16 }
 0x7d1   :  { %6209 = vpow2.f32 %v2842_v32  ;;  %v2854_v8 = vmul.f32 1.442695, %v2795_v38 }
 0x7d2   :  { %v2755_v63 = vpop.xlane.xlu0 %2754 }
 0x7d3   :  { %v2757_v45 = vpop.xlane.xlu1 %2756  ;;  %v2793_v31 = vsub.f32 %v7978_v34, %v2755_v63 }
 0x7d5   :  { %v8049_v61 = vpop.eup %6199  ;;  %v2850_v25 = vmul.f32 1.442695, %v2793_v31 }
 0x7d6   :  { %v2765_v12 = vpop.xlane.xlu0 %2764  ;;  %2900 = vadd.xlane.f32.xlu0 %v8049_v61  ;;  %v8052_v53 = vpop.eup %6201 }
 0x7d7   :  { %v2753_v15 = vpop.xlane.xlu1 %2752  ;;  %v2798_v3 = vsub.f32 %v7984_v41, %v2765_v12 }
 0x7d8   :  { %v2792_v18 = vsub.f32 %v7967_v27, %v2753_v15 }
 0x7d9   :  { %v8054_v26 = vpop.eup %6203  ;;  %v2860_v4 = vmul.f32 1.442695, %v2798_v3 }
 0x7da   :  { %v2761_v47 = vpop.xlane.xlu0 %2760  ;;  %2898 = vadd.xlane.f32.xlu0 %v8052_v53  ;;  %2896 = vadd.xlane.f32.xlu1 %v8054_v26  ;;  %v8059_v13 = vpop.eup %6205  ;;  %v2848_v42 = vmul.f32 1.442695, %v2792_v18 }
 0x7db   :  { %v3420_v10 = vpop.permute.xlu1 %3419 }
 0x7dc   :  { %5641 = vmatprep.mubr.msk.bf16.mxu1 %vm396_vm1, %v3420_v10  ;;  %v2840_v10 = vmul.f32 1.442695, %v2788_v54 }
 0x7dd   :  { %v8078_v51 = vpop.eup %6207 }
 0x7de   :  { %v2767_v43 = vpop.xlane.xlu0 %2766  ;;  %2902 = vadd.xlane.f32.xlu1 %v8059_v13  ;;  %6211 = vpow2.f32 %v2840_v10  ;;  %v8081_v27 = vpop.eup %6209 }
 0x7df   :  { %6213 = vpow2.f32 %v2846_v1 }
 0x7e2   :  { %v2763_v6 = vpop.xlane.xlu0 %2762 }
 0x7e3   :  { %v2797_v34 = vsub.f32 %v8007_v23, %v2763_v6 }
 0x7e5   :  { %v2858_v31 = vmul.f32 1.442695, %v2797_v34 }
 0x7e6   :  { %v3422_v62 = vpop.permute.xlu0 %3421 }
 0x7e7   :  { %5642 = vmatmul.mubr.msk.bf16.gmra.mxu1 %vm396_vm1, %v3422_v62  ;;  %v2794_v62 = vsub.f32 %v7961_v5, %v2757_v45  ;;  %v2796_v5 = vsub.f32 %v7994_v29, %v2761_v47 }
 0x7e9   :  { %v2852_v24 = vmul.f32 1.442695, %v2794_v62  ;;  %v2856_v1 = vmul.f32 1.442695, %v2796_v5 }
 0x7eb   :  { %6215 = vpow2.f32 %v2852_v24  ;;  %v2799_v24 = vsub.f32 %v7998_v28, %v2767_v43  ;;  %v8084_v48 = vpop.eup %6211 }
 0x7ec   :  { %6217 = vpow2.f32 %v2850_v25  ;;  %v8088_v41 = vpop.eup %6213 }
 0x7ed   :  { %6219 = vpow2.f32 %v2848_v42  ;;  %v2862_v29 = vmul.f32 1.442695, %v2799_v24 }
 0x7ee   :  { %6221 = vpow2.f32 %v2854_v8 }
 0x7ef   :  { %3606 = vrot.lane.b32.xlu1 %v9093_v58, %s6399_s30  ;;  %6223 = vpow2.f32 %v2860_v4 }
 0x7f0   :  { %3423 = vrot.lane.b32.xlu0 %v6516_v39, %s6400_s5  ;;  %6225 = vpow2.f32 %v2856_v1 }
 0x7f1   :  { %6227 = vpow2.f32 %v2858_v31 }
 0x7f2   :  { %6229 = vpow2.f32 %v2862_v29 }
 0x7f8   :  { %v8090_v23 = vpop.eup %6215 }
 0x7f9   :  { %v8094_v20 = vpop.eup %6217 }
 0x7fa   :  { %v8096_v28 = vpop.eup %6219 }
 0x7fb   :  { %v8100_v63 = vpop.eup %6221 }
 0x7fc   :  { %v8104_v12 = vpop.eup %6223 }
 0x7fd   :  { %v8108_v15 = vpop.eup %6225 }
 0x7fe   :  { %v8112_v43 = vpop.eup %6227 }
 0x7ff   :  { %v8118_v0 = vpop.eup %6229 }
 0x805   :  { %v8102_v45 = vpop.f32.mrf.mxu1 }
 0x807   :  { %v8110_v47 = vpop.f32.mrf.mxu1 }
 0x809   :  { %v8116_v6 = vpop.f32.mrf.mxu1 }
 0x80b   :  { %v8121_v19 = vpop.f32.mrf.mxu1 }
 0x80f   :  { %2908 = vadd.xlane.f32.xlu0 %v8078_v51 }
 0x810   :  { %v8123_v16 = vpop.f32.mrf.mxu1 }
 0x812   :  { %v8125_v54 = vpop.f32.mrf.mxu1 }
 0x813   :  { %2906 = vadd.xlane.f32.xlu0 %v8081_v27  ;;  %2904 = vadd.xlane.f32.xlu1 %v8084_v48 }
 0x814   :  { %v8127_v59 = vpop.f32.mrf.mxu1 }
 0x816   :  { %v8129_v32 = vpop.f32.mrf.mxu1 }
 0x817   :  { %2910 = vadd.xlane.f32.xlu1 %v8088_v41  ;;  %2916 = vadd.xlane.f32.xlu0 %v8090_v23 }
 0x819   :  { %v8135_v10 = vpop.f32.mrf.mxu1 }
 0x81a   :  { %9159 = vst [vmem:[#allocation19_spill] sm:$0xff] %v8135_v10 }
 0x81b   :  { %2914 = vadd.xlane.f32.xlu0 %v8094_v20  ;;  %2912 = vadd.xlane.f32.xlu1 %v8096_v28  ;;  %v8141_v62 = vpop.f32.mrf.mxu1 }
 0x81c   :  { %9160 = vst [vmem:[#allocation16_spill] sm:$0xff] %v8141_v62 }
 0x81d   :  { %v8147_v18 = vpop.f32.mrf.mxu1 }
 0x81e   :  { %9161 = vst [vmem:[#allocation30_spill] sm:$0xff] %v8147_v18 }
 0x81f   :  { %2924 = vadd.xlane.f32.xlu0 %v8104_v12  ;;  %2918 = vadd.xlane.f32.xlu1 %v8100_v63  ;;  %v8153_v38 = vpop.f32.mrf.mxu1 }
 0x820   :  { %9162 = vst [vmem:[#allocation32_spill] sm:$0xff] %v8153_v38 }
 0x823   :  { %2922 = vadd.xlane.f32.xlu0 %v8112_v43  ;;  %2920 = vadd.xlane.f32.xlu1 %v8108_v15 }
 0x827   :  { %2926 = vadd.xlane.f32.xlu1 %v8118_v0 }
 0x838   :  { %3425 = vrot.lane.b32.xlu1 %v6512_v36, %s6400_s5 }
 0x839   :  { %3604 = vrot.lane.b32.xlu0 %v9142_v2, %s6399_s30 }
 0x83c   :  { %3588 = vrot.lane.b32.xlu1 %v9142_v2, %s6400_s5 }
 0x83d   :  { %3590 = vrot.lane.b32.xlu0 %v9093_v58, %s6400_s5 }
 0x840   :  { %3592 = vrot.lane.b32.xlu1 %v9086_v7, %s6400_s5 }
 0x841   :  { %3594 = vrot.lane.b32.xlu0 %v9084_v44, %s6400_s5 }
 0x844   :  { %3596 = vrot.lane.b32.xlu1 %v9091_v14, %s6400_s5 }
 0x845   :  { %3598 = vrot.lane.b32.xlu0 %v9090_v55, %s6400_s5 }
 0x846   :  { %v8157_v25 = vpop.f32.mrf.mxu1 }
 0x847   :  { %9163 = vst [vmem:[#allocation29_spill] sm:$0xff] %v8157_v25 }
 0x848   :  { %3600 = vrot.lane.b32.xlu1 %v9079_v17, %s6400_s5  ;;  %v8161_v3 = vpop.f32.mrf.mxu1 }
 0x849   :  { %3602 = vrot.lane.b32.xlu0 %v6546_v60, %s6400_s5  ;;  %9164 = vst [vmem:[#allocation4_spill] sm:$0xff] %v8161_v3 }
 0x84a   :  { %v8163_v42 = vpop.f32.mrf.mxu1 }
 0x84b   :  { %9165 = vst [vmem:[#allocation41_spill] sm:$0xff] %v8163_v42 }
 0x84c   :  { %v8165_v8 = vpop.f32.mrf.mxu1 }
 0x84d   :  { %9166 = vst [vmem:[#allocation42_spill] sm:$0xff] %v8165_v8 }
 0x857   :  { %v8167_v5 = vpop.f32.mrf.mxu1 }
 0x859   :  { %v8169_v4 = vpop.f32.mrf.mxu1 }
 0x85b   :  { %v8171_v34 = vpop.f32.mrf.mxu1 }
 0x85d   :  { %v8173_v24 = vpop.f32.mrf.mxu1 }
 0x85f   :  { %v2901_v1 = vpop.xlane.xlu0 %2900  ;;  %v8175_v57 = vpop.f32.mrf.mxu1 }
 0x861   :  { %v8179_v42 = vpop.f32.mrf.mxu1 }
 0x863   :  { %v2899_v31 = vpop.xlane.xlu0 %2898  ;;  %v2897_v29 = vpop.xlane.xlu1 %2896 }
 0x864   :  { %6231 = vrcp.f32 %v2899_v31  ;;  %v8183_v8 = vpop.f32.mrf.mxu1 }
 0x865   :  { %6233 = vrcp.f32 %v2897_v29 }
 0x866   :  { %6235 = vrcp.f32 %v2901_v1  ;;  %v8188_v25 = vpop.f32.mrf.mxu1 }
 0x867   :  { %v3424_v35 = vpop.permute.xlu0 %3423  ;;  %v2903_v52 = vpop.xlane.xlu1 %2902 }
 0x868   :  { %3767 = vmax.xlane.f32.xlu0 %v8173_v24  ;;  %5645 = vmatprep.mubr.msk.bf16.mxu1 %vm396_vm1, %v3424_v35  ;;  %6237 = vrcp.f32 %v2903_v52 }
 0x86c   :  { %3769 = vmax.xlane.f32.xlu0 %v8167_v5  ;;  %3765 = vmax.xlane.f32.xlu1 %v8169_v4 }
 0x870   :  { %3773 = vmax.xlane.f32.xlu0 %v8179_v42  ;;  %3771 = vmax.xlane.f32.xlu1 %v8171_v34 }
 0x871   :  { %v6232_v1 = vpop.eup %6231 }
 0x872   :  { %v6234_v31 = vpop.eup %6233  ;;  %v2977_v29 = vmul.f32 %v6232_v1, %v8052_v53  ;;  %v3666_v53 = vsel %vm396_vm1, %v8019_v21, 0  ;;  %v3657_v21 = vsel %vm396_vm1, %v8035_v56, 0 }
 0x873   :  { %v2976_v35 = vmul.f32 %v6234_v31, %v8054_v26  ;;  %v6236_v52 = vpop.eup %6235  ;;  %v3663_v26 = vsel %vm396_vm1, %v8017_v40, 0 }
 0x874   :  { %3777 = vmax.xlane.f32.xlu0 %v8175_v57  ;;  %3775 = vmax.xlane.f32.xlu1 %v8188_v25  ;;  %v2978_v38 = vmul.f32 %v6236_v52, %v8049_v61  ;;  %v3660_v61 = vsel %vm396_vm1, %v8030_v9, 0 }
 0x875   :  { %v3000_v3 = vpack.c.bf16 %v2977_v29, %v2976_v35  ;;  %v6238_v18 = vpop.eup %6237 }
 0x876   :  { %v2979_v10 = vmul.f32 %v6238_v18, %v8059_v13  ;;  %v3607_v13 = vpop.permute.xlu1 %3606 }
 0x877   :  { %5601 = vmatprep.mubr.bf16.mxu0 %v3000_v3 }
 0x878   :  { %3779 = vmax.xlane.f32.xlu1 %v8183_v8  ;;  %v3001_v62 = vpack.c.bf16 %v2979_v10, %v2978_v38  ;;  %v3654_v10 = vsel %vm396_vm1, %v8039_v50, 0  ;;  %v3651_v38 = vsel %vm396_vm1, %v8043_v11, 0 }
 0x87a   :  { %5602 = vmatmul.mubr.bf16.vlgmr.msra.gmra.mxu0 %v3001_v62 }
 0x87b   :  { %5650 = vmatpush3.bf16.xpose.msra.mxu0 %v3666_v53 }
 0x87c   :  { %5838 = vmatprep.subr.msk.bf16.mxu0 %vm396_vm1, %v8017_v40 }
 0x883   :  { %5652 = vmatpush3.bf16.xpose.msra.mxu0 %v3663_v26 }
 0x884   :  { %5839 = vmatprep.subr.msk.bf16.mxu0 %vm396_vm1, %v8030_v9 }
 0x88b   :  { %5654 = vmatpush3.bf16.xpose.msra.mxu0 %v3660_v61 }
 0x88c   :  { %5840 = vmatprep.subr.msk.bf16.mxu0 %vm396_vm1, %v8035_v56 }
 0x893   :  { %5656 = vmatpush3.bf16.xpose.msra.mxu0 %v3657_v21 }
 0x894   :  { %5841 = vmatprep.subr.msk.bf16.mxu0 %vm396_vm1, %v8039_v50 }
 0x898   :  { %v2909_v40 = vpop.xlane.xlu0 %2908 }
 0x89b   :  { %5658 = vmatpush3.bf16.xpose.msra.mxu0 %v3654_v10 }
 0x89c   :  { %v2907_v62 = vpop.xlane.xlu0 %2906  ;;  %v2905_v18 = vpop.xlane.xlu1 %2904  ;;  %5842 = vmatprep.subr.msk.bf16.mxu0 %vm396_vm1, %v8043_v11  ;;  %v3648_v11 = vsel %vm396_vm1, %v3607_v13, 0 }
 0x89d   :  { %6239 = vrcp.f32 %v2907_v62 }
 0x89e   :  { %6241 = vrcp.f32 %v2905_v18 }
 0x89f   :  { %6243 = vrcp.f32 %v2909_v40 }
 0x8a0   :  { %v2917_v9 = vpop.xlane.xlu0 %2916  ;;  %v2911_v56 = vpop.xlane.xlu1 %2910 }
 0x8a1   :  { %6245 = vrcp.f32 %v2911_v56 }
 0x8a3   :  { %5660 = vmatpush3.bf16.xpose.msra.mxu0 %v3651_v38 }
 0x8a4   :  { %v2915_v3 = vpop.xlane.xlu0 %2914  ;;  %v2913_v1 = vpop.xlane.xlu1 %2912  ;;  %5843 = vmatprep.subr.msk.bf16.mxu0 %vm396_vm1, %v3607_v13 }
 0x8a5   :  { %6247 = vrcp.f32 %v2915_v3 }
 0x8a6   :  { %6249 = vrcp.f32 %v2913_v1 }
 0x8a7   :  { %v8219_v50 = vpop.f32.mrf.mxu1  ;;  %6251 = vrcp.f32 %v2917_v9 }
 0x8a8   :  { %v2925_v31 = vpop.xlane.xlu0 %2924  ;;  %v2919_v29 = vpop.xlane.xlu1 %2918 }
 0x8a9   :  { %v8221_v35 = vpop.f32.mrf.mxu1  ;;  %6253 = vrcp.f32 %v2919_v29 }
 0x8aa   :  { %v6240_v52 = vpop.eup %6239  ;;  %3781 = vmax.xlane.f32.xlu0 %v8221_v35 }
 0x8ab   :  { %v6242_v53 = vpop.eup %6241  ;;  %v8225_v26 = vpop.f32.mrf.mxu1  ;;  %v2981_v61 = vmul.f32 %v6240_v52, %v8081_v27  ;;  %5662 = vmatpush3.bf16.xpose.msra.mxu0 %v3648_v11 }
 0x8ac   :  { %v2923_v21 = vpop.xlane.xlu0 %2922  ;;  %v2921_v40 = vpop.xlane.xlu1 %2920  ;;  %v2980_v10 = vmul.f32 %v6242_v53, %v8084_v48 }
 0x8ad   :  { %v6244_v62 = vpop.eup %6243  ;;  %6255 = vrcp.f32 %v2923_v21  ;;  %v8229_v18 = vpop.f32.mrf.mxu1 }
 0x8ae   :  { %6257 = vrcp.f32 %v2921_v40  ;;  %3785 = vmax.xlane.f32.xlu0 %v8219_v50  ;;  %3783 = vmax.xlane.f32.xlu1 %v8229_v18  ;;  %v3002_v9 = vpack.c.bf16 %v2981_v61, %v2980_v10  ;;  %v6246_v13 = vpop.eup %6245  ;;  %v2982_v38 = vmul.f32 %v6244_v62, %v8078_v51 }
 0x8af   :  { %6259 = vrcp.f32 %v2925_v31  ;;  %v2983_v3 = vmul.f32 %v6246_v13, %v8088_v41 }
 0x8b0   :  { %5605 = vmatprep.mubr.bf16.mxu0 %v3002_v9  ;;  %v3605_v56 = vpop.permute.xlu0 %3604  ;;  %v2927_v27 = vpop.xlane.xlu1 %2926 }
 0x8b1   :  { %6261 = vrcp.f32 %v2927_v27  ;;  %5844 = vmatprep.subr.msk.bf16.mxu0 %vm396_vm1, %v3605_v56  ;;  %v3645_v48 = vsel %vm396_vm1, %v3605_v56, 0  ;;  %v3003_v29 = vpack.c.bf16 %v2983_v3, %v2982_v38 }
 0x8b2   :  { %v6248_v1 = vpop.eup %6247  ;;  %3787 = vmax.xlane.f32.xlu1 %v8225_v26 }
 0x8b3   :  { %v6250_v52 = vpop.eup %6249  ;;  %v2985_v53 = vmul.f32 %v6248_v1, %v8094_v20  ;;  %5664 = vmatpush3.bf16.xpose.msra.mxu0 %v3645_v48 }
 0x8b4   :  { %v3426_v31 = vpop.permute.xlu1 %3425  ;;  %v2984_v11 = vmul.f32 %v6250_v52, %v8096_v28  ;;  %v6252_v61 = vpop.eup %6251  ;;  %5606 = vmatmul.mubr.bf16.gmra.mxu0 %v3003_v29 }
 0x8b5   :  { %5646 = vmatmul.mubr.msk.bf16.gmra.mxu1 %vm396_vm1, %v3426_v31  ;;  %v2986_v21 = vmul.f32 %v6252_v61, %v8090_v23 }
 0x8b6   :  { %v3004_v51 = vpack.c.bf16 %v2985_v53, %v2984_v11  ;;  %v6254_v41 = vpop.eup %6253 }
 0x8b7   :  { %v2987_v40 = vmul.f32 %v6254_v41, %v8100_v63  ;;  %v3591_v63 = vpop.permute.xlu0 %3590 }
 0x8b8   :  { %5609 = vmatprep.mubr.bf16.mxu0 %v3004_v51  ;;  %v3589_v23 = vpop.permute.xlu1 %3588 }
 0x8b9   :  { %v3005_v62 = vpack.c.bf16 %v2987_v40, %v2986_v21 }
 0x8ba   :  { %v6256_v10 = vpop.eup %6255 }
 0x8bb   :  { %v6258_v9 = vpop.eup %6257  ;;  %v2989_v20 = vmul.f32 %v6256_v10, %v8112_v43 }
 0x8bc   :  { %v6260_v13 = vpop.eup %6259  ;;  %v2988_v56 = vmul.f32 %v6258_v9, %v8108_v15  ;;  %5610 = vmatmul.mubr.bf16.gmra.mxu0 %v3005_v62  ;;  %v3593_v1 = vpop.permute.xlu1 %3592 }
 0x8bd   :  { %v2990_v38 = vmul.f32 %v6260_v13, %v8104_v12  ;;  %v3595_v15 = vpop.permute.xlu0 %3594 }
 0x8be   :  { %v6262_v28 = vpop.eup %6261  ;;  %v3006_v27 = vpack.c.bf16 %v2989_v20, %v2988_v56 }
 0x8bf   :  { %v2991_v3 = vmul.f32 %v6262_v28, %v8118_v0 }
 0x8c0   :  { %5613 = vmatprep.mubr.bf16.mxu0 %v3006_v27  ;;  %v3597_v43 = vpop.permute.xlu1 %3596 }
 0x8c1   :  { %v3007_v48 = vpack.c.bf16 %v2991_v3, %v2990_v38  ;;  %v3599_v12 = vpop.permute.xlu0 %3598 }
 0x8c4   :  { %5614 = vmatmul.mubr.bf16.gmra.mxu0 %v3007_v48  ;;  %v3601_v0 = vpop.permute.xlu1 %3600 }
 0x8c5   :  { %5665 = vmatprep.mubr.msk.bf16.mxu0 %vm396_vm1, %v3589_v23  ;;  %v3603_v29 = vpop.permute.xlu0 %3602 }
 0x8cc   :  { %5666 = vmatmul.mubr.msk.bf16.vlgmr.msra.gmra.mxu0 %vm396_vm1, %v3591_v63 }
 0x8cd   :  { %5669 = vmatprep.mubr.msk.bf16.mxu0 %vm396_vm1, %v3593_v1 }
 0x8d4   :  { %5670 = vmatmul.mubr.msk.bf16.gmra.mxu0 %vm396_vm1, %v3595_v15 }
 0x8d5   :  { %5673 = vmatprep.mubr.msk.bf16.mxu0 %vm396_vm1, %v3597_v43 }
 0x8dc   :  { %5674 = vmatmul.mubr.msk.bf16.gmra.mxu0 %vm396_vm1, %v3599_v12 }
 0x8dd   :  { %5677 = vmatprep.mubr.msk.bf16.mxu0 %vm396_vm1, %v3601_v0 }
 0x8e4   :  { %5678 = vmatmul.mubr.msk.bf16.gmra.mxu0 %vm396_vm1, %v3603_v29 }
 0x8f1   :  { %v3768_v61 = vpop.xlane.xlu0 %3767 }
 0x8f2   :  { %v3830_v27 = vsub.f32 %v8173_v24, %v3768_v61 }
 0x8f4   :  { %v3863_v3 = vmul.f32 1.442695, %v3830_v27 }
 0x8f5   :  { %v3770_v51 = vpop.xlane.xlu0 %3769  ;;  %v3766_v41 = vpop.xlane.xlu1 %3765 }
 0x8f6   :  { %v3831_v40 = vsub.f32 %v8167_v5, %v3770_v51  ;;  %v3829_v62 = vsub.f32 %v8169_v4, %v3766_v41 }
 0x8f9   :  { %v3774_v21 = vpop.xlane.xlu0 %3773 }
 0x975   :  { %v8255_v52 = vpop.f32.mrf.mxu1 }
 0x977   :  { %v8257_v53 = vpop.f32.mrf.mxu1 }
 0x978   :  { %3789 = vmax.xlane.f32.xlu0 %v8257_v53 }
 0x979   :  { %v8260_v31 = vpop.f32.mrf.mxu1 }
 0x97b   :  { %v8262_v11 = vpop.f32.mrf.mxu1 }
 0x97c   :  { %3793 = vmax.xlane.f32.xlu0 %v8255_v52  ;;  %3791 = vmax.xlane.f32.xlu1 %v8262_v11 }
 0x980   :  { %3795 = vmax.xlane.f32.xlu1 %v8260_v31 }
 0x991   :  { %4081 = vrot.lane.b32.xlu1 %v6516_v39, %s6401_s6  ;;  %v3772_v39 = vpop.xlane.xlu1 %3771 }
 0x992   :  { %4083 = vrot.lane.b32.xlu0 %v6512_v36, %s6401_s6  ;;  %v3778_v36 = vpop.xlane.xlu0 %3777  ;;  %v3832_v56 = vsub.f32 %v8171_v34, %v3772_v39 }
 0x993   :  { %v3835_v10 = vsub.f32 %v8175_v57, %v3778_v36  ;;  %v8329_v36 = vpop.f32.mrf.mxu0 }
 0x994   :  { %v3867_v57 = vmul.f32 1.442695, %v3832_v56 }
 0x995   :  { %4075 = vrot.lane.b32.xlu1 %v9088_v37, %s6401_s6  ;;  %v3776_v37 = vpop.xlane.xlu1 %3775  ;;  %v3873_v20 = vmul.f32 1.442695, %v3835_v10 }
 0x996   :  { %4079 = vrot.lane.b32.xlu0 %v6504_v30, %s6401_s6  ;;  %v3865_v30 = vmul.f32 1.442695, %v3831_v40  ;;  %v3782_v9 = vpop.xlane.xlu0 %3781  ;;  %v3834_v48 = vsub.f32 %v8188_v25, %v3776_v37  ;;  %v8331_v40 = vpop.f32.mrf.mxu0 }
 0x997   :  { %v3837_v34 = vsub.f32 %v8221_v35, %v3782_v9 }
 0x998   :  { %6263 = vpow2.f32 %v3865_v30  ;;  %v8333_v10 = vpop.f32.mrf.mxu0 }
 0x999   :  { %4073 = vrot.lane.b32.xlu1 %v6526_v46, %s6401_s6  ;;  %v3833_v46 = vsub.f32 %v8179_v42, %v3774_v21  ;;  %v3780_v13 = vpop.xlane.xlu1 %3779  ;;  %6265 = vpow2.f32 %v3873_v20  ;;  %v3877_v15 = vmul.f32 1.442695, %v3837_v34 }
 0x99a   :  { %4077 = vrot.lane.b32.xlu0 %v6508_v33, %s6401_s6  ;;  %v3861_v33 = vmul.f32 1.442695, %v3829_v62  ;;  %v3836_v28 = vsub.f32 %v8183_v8, %v3780_v13  ;;  %v3786_v5 = vpop.xlane.xlu0 %3785  ;;  %v3871_v8 = vmul.f32 1.442695, %v3834_v48 }
 0x99b   :  { %v3839_v42 = vsub.f32 %v8219_v50, %v3786_v5 }
 0x99c   :  { %6267 = vpow2.f32 %v3861_v33  ;;  %v3875_v4 = vmul.f32 1.442695, %v3836_v28 }
 0x99d   :  { %v3784_v38 = vpop.xlane.xlu1 %3783  ;;  %v3881_v23 = vmul.f32 1.442695, %v3839_v42 }
 0x99e   :  { %4071 = vrot.lane.b32.xlu0 %v6532_v49, %s6401_s6  ;;  %v3869_v49 = vmul.f32 1.442695, %v3833_v46  ;;  %v3838_v24 = vsub.f32 %v8229_v18, %v3784_v38  ;;  %v8336_v46 = vpop.f32.mrf.mxu0 }
 0x9a0   :  { %6269 = vpow2.f32 %v3869_v49  ;;  %v3879_v25 = vmul.f32 1.442695, %v3838_v24  ;;  %v8339_v13 = vpop.f32.mrf.mxu0 }
 0x9a1   :  { %6271 = vpow2.f32 %v3867_v57  ;;  %v3788_v63 = vpop.xlane.xlu1 %3787  ;;  %9167 = vst [vmem:[#allocation43_spill] sm:$0xff] %v8339_v13 }
 0x9a2   :  { %6273 = vpow2.f32 %v3875_v4  ;;  %v3840_v43 = vsub.f32 %v8225_v26, %v3788_v63 }
 0x9a3   :  { %6275 = vpow2.f32 %v3863_v3 }
 0x9a4   :  { %6277 = vpow2.f32 %v3881_v23  ;;  %v3883_v12 = vmul.f32 1.442695, %v3840_v43 }
 0x9a5   :  { %v8292_v1 = vpop.eup %6263  ;;  %6279 = vpow2.f32 %v3871_v8 }
 0x9a6   :  { %v8295_v50 = vpop.eup %6265  ;;  %6281 = vpow2.f32 %v3877_v15 }
 0x9a7   :  { %6283 = vpow2.f32 %v3879_v25 }
 0x9a8   :  { %6285 = vpow2.f32 %v3883_v12 }
 0x9a9   :  { %v8299_v35 = vpop.eup %6267 }
 0x9ad   :  { %v8301_v0 = vpop.eup %6269 }
 0x9ae   :  { %v8305_v26 = vpop.eup %6271 }
 0x9af   :  { %v8307_v18 = vpop.eup %6273 }
 0x9b0   :  { %v8311_v29 = vpop.eup %6275 }
 0x9b1   :  { %v8313_v61 = vpop.eup %6277 }
 0x9b2   :  { %v8317_v51 = vpop.eup %6279 }
 0x9b3   :  { %v8319_v41 = vpop.eup %6281 }
 0x9b4   :  { %v8323_v21 = vpop.eup %6283 }
 0x9b5   :  { %v8325_v39 = vpop.eup %6285 }
 0x9bd   :  { %3937 = vadd.xlane.f32.xlu0 %v8295_v50  ;;  %3929 = vadd.xlane.f32.xlu1 %v8292_v1 }
 0x9c1   :  { %3933 = vadd.xlane.f32.xlu0 %v8301_v0  ;;  %3925 = vadd.xlane.f32.xlu1 %v8299_v35 }
 0x9c5   :  { %3931 = vadd.xlane.f32.xlu1 %v8305_v26  ;;  %3939 = vadd.xlane.f32.xlu0 %v8307_v18 }
 0x9c9   :  { %3927 = vadd.xlane.f32.xlu1 %v8311_v29  ;;  %3945 = vadd.xlane.f32.xlu0 %v8313_v61 }
 0x9cd   :  { %3935 = vadd.xlane.f32.xlu1 %v8317_v51  ;;  %3941 = vadd.xlane.f32.xlu0 %v8319_v41 }
 0x9d1   :  { %3943 = vadd.xlane.f32.xlu1 %v8323_v21  ;;  %3947 = vadd.xlane.f32.xlu0 %v8325_v39 }
 0xa01   :  { %v3790_v37 = vpop.xlane.xlu0 %3789 }
 0xa02   :  { %v3841_v30 = vsub.f32 %v8257_v53, %v3790_v37  ;;  %v8343_v53 = vpop.f32.mrf.mxu0 }
 0xa04   :  { %v3885_v56 = vmul.f32 1.442695, %v3841_v30  ;;  %v8345_v42 = vpop.f32.mrf.mxu0 }
 0xa05   :  { %v3794_v62 = vpop.xlane.xlu0 %3793  ;;  %v3792_v9 = vpop.xlane.xlu1 %3791  ;;  %9168 = vst [vmem:[#allocation44_spill] sm:$0xff] %v8345_v42 }
 0xa06   :  { %v3843_v20 = vsub.f32 %v8255_v52, %v3794_v62  ;;  %v3842_v5 = vsub.f32 %v8262_v11, %v3792_v9  ;;  %v8347_v11 = vpop.f32.mrf.mxu0 }
 0xa07   :  { %9169 = vst [vmem:[#allocation45_spill] sm:$0xff] %v8347_v11 }
 0xa08   :  { %v3889_v33 = vmul.f32 1.442695, %v3843_v20  ;;  %v3887_v52 = vmul.f32 1.442695, %v3842_v5  ;;  %v8351_v34 = vpop.f32.mrf.mxu0 }
 0xa09   :  { %v4084_v49 = vpop.permute.xlu0 %4083  ;;  %v3796_v28 = vpop.xlane.xlu1 %3795  ;;  %9170 = vst [vmem:[#allocation46_spill] sm:$0xff] %v8351_v34 }
 0xa0a   :  { %6287 = vpow2.f32 %v3889_v33  ;;  %v3844_v27 = vsub.f32 %v8260_v31, %v3796_v28  ;;  %5681 = vmatprep.subr.bf16.mxu1 %v4084_v49  ;;  %v8358_v8 = vpop.f32.mrf.mxu0 }
 0xa0b   :  { %5682 = vmatpush3.bf16.msra.mxu1 %v4084_v49  ;;  %6289 = vpow2.f32 %v3885_v56  ;;  %9171 = vst [vmem:[#allocation47_spill] sm:$0xff] %v8358_v8 }
 0xa0c   :  { %v3891_v57 = vmul.f32 1.442695, %v3844_v27  ;;  %v8364_v25 = vpop.f32.mrf.mxu0 }
 0xa0d   :  { %v4080_v38 = vpop.permute.xlu0 %4079  ;;  %v4082_v4 = vpop.permute.xlu1 %4081  ;;  %9172 = vst [vmem:[#allocation48_spill] sm:$0xff] %v8364_v25 }
 0xa0e   :  { %6291 = vpow2.f32 %v3891_v57  ;;  %5683 = vmatprep.subr.bf16.mxu1 %v4082_v4  ;;  %v8367_v12 = vpop.f32.mrf.mxu0 }
 0xa0f   :  { %5684 = vmatpush3.bf16.msra.mxu1 %v4082_v4  ;;  %6293 = vpow2.f32 %v3887_v52  ;;  %9173 = vst [vmem:[#allocation49_spill] sm:$0xff] %v8367_v12 }
 0xa10   :  { %5685 = vmatprep.subr.bf16.mxu1 %v4080_v38  ;;  %v8369_v37 = vpop.f32.mrf.mxu0 }
 0xa11   :  { %v4078_v3 = vpop.permute.xlu0 %4077  ;;  %v4076_v31 = vpop.permute.xlu1 %4075  ;;  %9174 = vst [vmem:[#allocation50_spill] sm:$0xff] %v8369_v37 }
 0xa12   :  { %v8371_v30 = vpop.f32.mrf.mxu0 }
 0xa13   :  { %5686 = vmatpush3.bf16.msra.mxu1 %v4080_v38  ;;  %9175 = vst [vmem:[#allocation51_spill] sm:$0xff] %v8371_v30 }
 0xa14   :  { %5687 = vmatprep.subr.bf16.mxu1 %v4078_v3  ;;  %v8375_v62 = vpop.f32.mrf.mxu0 }
 0xa15   :  { %v4074_v24 = vpop.permute.xlu1 %4073  ;;  %v4072_v43 = vpop.permute.xlu0 %4071  ;;  %9176 = vst [vmem:[#allocation52_spill] sm:$0xff] %v8375_v62 }
 0xa16   :  { %v8379_v9 = vpop.f32.mrf.mxu0 }
 0xa17   :  { %v8349_v48 = vpop.eup %6287  ;;  %5688 = vmatpush3.bf16.msra.mxu1 %v4078_v3  ;;  %9177 = vst [vmem:[#allocation53_spill] sm:$0xff] %v8379_v9 }
 0xa18   :  { %3953 = vadd.xlane.f32.xlu1 %v8349_v48  ;;  %5689 = vmatprep.subr.bf16.mxu1 %v4076_v31  ;;  %v8354_v23 = vpop.eup %6289  ;;  %v8385_v20 = vpop.f32.mrf.mxu0 }
 0xa1a   :  { %v8389_v33 = vpop.f32.mrf.mxu0 }
 0xa1b   :  { %v8356_v63 = vpop.eup %6291  ;;  %5690 = vmatpush3.bf16.msra.mxu1 %v4076_v31 }
 0xa1c   :  { %3949 = vadd.xlane.f32.xlu1 %v8354_v23  ;;  %3955 = vadd.xlane.f32.xlu0 %v8356_v63  ;;  %v8362_v15 = vpop.eup %6293 }
 0xa1d   :  { %5691 = vmatprep.subr.bf16.mxu1 %v4074_v24 }
 0xa1f   :  { %5692 = vmatpush3.bf16.msra.mxu1 %v4074_v24 }
 0xa20   :  { %3951 = vadd.xlane.f32.xlu0 %v8362_v15  ;;  %5693 = vmatprep.subr.bf16.mxu1 %v4072_v43 }
 0xa23   :  { %5694 = vmatpush3.bf16.msra.mxu1 %v4072_v43 }
 0xa2d   :  { %4069 = vrot.lane.b32.xlu1 %v6500_v22, %s6401_s6  ;;  %v8391_v22 = vpop.f32.mrf.mxu0 }
 0xa2f   :  { %v8393_v56 = vpop.f32.mrf.mxu0 }
 0xa31   :  { %4202 = vrot.lane.b32.xlu1 %v9079_v17, %s6401_s6  ;;  %v8395_v49 = vpop.f32.mrf.mxu0 }
 0xa33   :  { %v8397_v5 = vpop.f32.mrf.mxu0 }
 0xa35   :  { %4198 = vrot.lane.b32.xlu1 %v9091_v14, %s6401_s6  ;;  %v8399_v27 = vpop.f32.mrf.mxu0 }
 0xa36   :  { %4204 = vrot.lane.b32.xlu0 %v6546_v60, %s6401_s6 }
 0xa37   :  { %v8401_v57 = vpop.f32.mrf.mxu0 }
 0xa3a   :  { %4200 = vrot.lane.b32.xlu0 %v9090_v55, %s6401_s6  ;;  %v8403_v55 = vpop.f32.mrf.mxu0 }
 0xa3c   :  { %v8407_v38 = vpop.f32.mrf.mxu0 }
 0xa3e   :  { %v8411_v52 = vpop.f32.mrf.mxu0 }
 0xa40   :  { %v8417_v43 = vpop.f32.mrf.mxu0 }
 0xa46   :  { %v3930_v17 = vpop.xlane.xlu1 %3929 }
 0xa4a   :  { %v3926_v28 = vpop.xlane.xlu1 %3925 }
 0xa4b   :  { %6295 = vrcp.f32 %v3926_v28 }
 0xa4e   :  { %v3932_v14 = vpop.xlane.xlu1 %3931 }
 0xa52   :  { %v3928_v60 = vpop.xlane.xlu1 %3927 }
 0xa53   :  { %6297 = vrcp.f32 %v3928_v60  ;;  %v8421_v60 = vpop.f32.mrf.mxu0 }
 0xa54   :  { %6299 = vrcp.f32 %v3932_v14 }
 0xa55   :  { %v8425_v62 = vpop.f32.mrf.mxu0 }
 0xa58   :  { %v6296_v4 = vpop.eup %6295 }
 0xa59   :  { %3803 = vmax.xlane.f32.xlu1 %v8391_v22  ;;  %3801 = vmax.xlane.f32.xlu0 %v8385_v20  ;;  %v4021_v31 = vmul.f32 %v6296_v4, %v8299_v35  ;;  %v8429_v35 = vpop.f32.mrf.mxu0  ;;  %v3938_v4 = vpop.xlane.xlu0 %3937 }
 0xa5d   :  { %3799 = vmax.xlane.f32.xlu1 %v8393_v56  ;;  %3797 = vmax.xlane.f32.xlu0 %v8389_v33 }
 0xa60   :  { %v6298_v3 = vpop.eup %6297 }
 0xa61   :  { %3811 = vmax.xlane.f32.xlu1 %v8399_v27  ;;  %3809 = vmax.xlane.f32.xlu0 %v8395_v49  ;;  %v4022_v24 = vmul.f32 %v6298_v3, %v8311_v29  ;;  %v8433_v29 = vpop.f32.mrf.mxu0  ;;  %v3934_v3 = vpop.xlane.xlu0 %3933 }
 0xa63   :  { %v4053_v28 = vpack.c.bf16 %v4022_v24, %v4021_v31 }
 0xa65   :  { %3807 = vmax.xlane.f32.xlu1 %v8401_v57  ;;  %3805 = vmax.xlane.f32.xlu0 %v8397_v5  ;;  %v3940_v31 = vpop.xlane.xlu0 %3939 }
 0xa66   :  { %5697 = vmatprep.mubr.bf16.mxu1 %v4053_v28  ;;  %v3936_v28 = vpop.xlane.xlu1 %3935 }
 0xa67   :  { %6301 = vrcp.f32 %v3936_v28 }
 0xa68   :  { %6303 = vrcp.f32 %v3930_v17 }
 0xa69   :  { %3819 = vmax.xlane.f32.xlu1 %v8411_v52  ;;  %3817 = vmax.xlane.f32.xlu0 %v8403_v55  ;;  %v3946_v24 = vpop.xlane.xlu0 %3945  ;;  %6305 = vrcp.f32 %v3934_v3 }
 0xa6a   :  { %v3944_v9 = vpop.xlane.xlu1 %3943  ;;  %6307 = vrcp.f32 %v3940_v31 }
 0xa6b   :  { %6309 = vrcp.f32 %v3944_v9 }
 0xa6c   :  { %6311 = vrcp.f32 %v3938_v4 }
 0xa6d   :  { %3815 = vmax.xlane.f32.xlu1 %v8417_v43  ;;  %3813 = vmax.xlane.f32.xlu0 %v8407_v38  ;;  %v3942_v37 = vpop.xlane.xlu0 %3941 }
 0xa6e   :  { %6313 = vrcp.f32 %v3942_v37 }
 0xa71   :  { %3827 = vmax.xlane.f32.xlu1 %v8429_v35  ;;  %3825 = vmax.xlane.f32.xlu0 %v8421_v60  ;;  %v3948_v30 = vpop.xlane.xlu0 %3947 }
 0xa72   :  { %6315 = vrcp.f32 %v3948_v30 }
 0xa73   :  { %6317 = vrcp.f32 %v3946_v24 }
 0xa75   :  { %3823 = vmax.xlane.f32.xlu1 %v8433_v29  ;;  %3821 = vmax.xlane.f32.xlu0 %v8425_v62 }
 0xa86   :  { %4194 = vrot.lane.b32.xlu1 %v9086_v7, %s6401_s6  ;;  %v6300_v7 = vpop.eup %6299 }
 0xa87   :  { %v6302_v8 = vpop.eup %6301  ;;  %v4024_v14 = vmul.f32 %v6300_v7, %v8305_v26 }
 0xa88   :  { %v4026_v28 = vmul.f32 %v6302_v8, %v8317_v51 }
 0xa8b   :  { %4196 = vrot.lane.b32.xlu0 %v9084_v44, %s6401_s6  ;;  %v6304_v44 = vpop.eup %6303 }
 0xa8c   :  { %v6306_v42 = vpop.eup %6305  ;;  %v4023_v9 = vmul.f32 %v6304_v44, %v8292_v1 }
 0xa8d   :  { %v4025_v37 = vmul.f32 %v6306_v42, %v8301_v0  ;;  %v6308_v31 = vpop.eup %6307 }
 0xa8e   :  { %v4054_v4 = vpack.c.bf16 %v4024_v14, %v4023_v9  ;;  %v6310_v30 = vpop.eup %6309  ;;  %v4028_v1 = vmul.f32 %v6308_v31, %v8307_v18 }
 0xa8f   :  { %v4055_v13 = vpack.c.bf16 %v4026_v28, %v4025_v37  ;;  %v6312_v26 = vpop.eup %6311 }
 0xa90   :  { %v6314_v51 = vpop.eup %6313  ;;  %v4027_v0 = vmul.f32 %v6312_v26, %v8295_v50 }
 0xa91   :  { %v4029_v8 = vmul.f32 %v6314_v51, %v8319_v41  ;;  %v6316_v44 = vpop.eup %6315 }
 0xa92   :  { %v4056_v7 = vpack.c.bf16 %v4028_v1, %v4027_v0 }
 0xaa1   :  { %v3954_v25 = vpop.xlane.xlu1 %3953 }
 0xaa5   :  { %v3956_v12 = vpop.xlane.xlu0 %3955  ;;  %v3950_v34 = vpop.xlane.xlu1 %3949 }
 0xaa9   :  { %v3952_v17 = vpop.xlane.xlu0 %3951  ;;  %v4070_v3 = vpop.permute.xlu1 %4069 }
 0xaaa   :  { %6319 = vrcp.f32 %v3952_v17  ;;  %5695 = vmatprep.subr.bf16.mxu1 %v4070_v3 }
 0xaab   :  { %6321 = vrcp.f32 %v3950_v34  ;;  %5696 = vmatpush3.bf16.msra.mxu1 %v4070_v3  ;;  %v4030_v34 = vmul.f32 %v6310_v30, %v8323_v21  ;;  %v4032_v21 = vmul.f32 %v6316_v44, %v8325_v39 }
 0xaac   :  { %6323 = vrcp.f32 %v3956_v12 }
 0xaad   :  { %v4205_v11 = vpop.permute.xlu0 %4204  ;;  %v4203_v24 = vpop.permute.xlu1 %4202  ;;  %6325 = vrcp.f32 %v3954_v25  ;;  %v4057_v14 = vpack.c.bf16 %v4030_v34, %v4029_v8 }
 0xaae   :  { %5698 = vmatmul.mubr.bf16.vlgmr.msra.gmra.mxu1 %v4054_v4  ;;  %5713 = vmatprep.subr.bf16.mxu0 %v4205_v11 }
 0xaaf   :  { %5701 = vmatprep.mubr.bf16.mxu1 %v4055_v13  ;;  %5714 = vmatpush3.bf16.msra.mxu0 %v4205_v11  ;;  %v6318_v13 = vpop.eup %6317 }
 0xab0   :  { %5715 = vmatprep.subr.bf16.mxu0 %v4203_v24  ;;  %v4031_v25 = vmul.f32 %v6318_v13, %v8313_v61 }
 0xab1   :  { %v4201_v42 = vpop.permute.xlu0 %4200  ;;  %v4199_v12 = vpop.permute.xlu1 %4198 }
 0xab2   :  { %v4058_v17 = vpack.c.bf16 %v4032_v21, %v4031_v25 }
 0xab3   :  { %5716 = vmatpush3.bf16.msra.mxu0 %v4203_v24 }
 0xab4   :  { %5717 = vmatprep.subr.bf16.mxu0 %v4201_v42 }
 0xab6   :  { %5702 = vmatmul.mubr.bf16.gmra.mxu1 %v4056_v7 }
 0xab7   :  { %v6320_v11 = vpop.eup %6319  ;;  %5705 = vmatprep.mubr.bf16.mxu1 %v4057_v14  ;;  %5718 = vmatpush3.bf16.msra.mxu0 %v4201_v42 }
 0xab8   :  { %v6322_v18 = vpop.eup %6321  ;;  %5719 = vmatprep.subr.bf16.mxu0 %v4199_v12  ;;  %v4034_v50 = vmul.f32 %v6320_v11, %v8362_v15 }
 0xab9   :  { %v4033_v41 = vmul.f32 %v6322_v18, %v8354_v23  ;;  %v6324_v3 = vpop.eup %6323 }
 0xaba   :  { %v6326_v9 = vpop.eup %6325  ;;  %v4036_v37 = vmul.f32 %v6324_v3, %v8356_v63 }
 0xabb   :  { %5720 = vmatpush3.bf16.msra.mxu0 %v4199_v12  ;;  %v4059_v28 = vpack.c.bf16 %v4034_v50, %v4033_v41  ;;  %v4035_v4 = vmul.f32 %v6326_v9, %v8349_v48 }
 0xabd   :  { %v4060_v31 = vpack.c.bf16 %v4036_v37, %v4035_v4 }
 0xabe   :  { %5706 = vmatmul.mubr.bf16.gmra.mxu1 %v4058_v17 }
 0xabf   :  { %5709 = vmatprep.mubr.bf16.mxu1 %v4059_v28 }
 0xac6   :  { %5710 = vmatmul.mubr.bf16.gmra.mxu1 %v4060_v31 }
 0xae2   :  { %v3802_v39 = vpop.xlane.xlu0 %3801  ;;  %v3804_v30 = vpop.xlane.xlu1 %3803 }
 0xae3   :  { %v3847_v15 = vsub.f32 %v8385_v20, %v3802_v39  ;;  %v3848_v61 = vsub.f32 %v8391_v22, %v3804_v30 }
 0xae5   :  { %v3897_v26 = vmul.f32 1.442695, %v3847_v15  ;;  %v3899_v23 = vmul.f32 1.442695, %v3848_v61 }
 0xae6   :  { %v3798_v24 = vpop.xlane.xlu0 %3797  ;;  %v3800_v51 = vpop.xlane.xlu1 %3799 }
 0xae7   :  { %6327 = vpow2.f32 %v3897_v26  ;;  %v3845_v1 = vsub.f32 %v8389_v33, %v3798_v24  ;;  %v3846_v34 = vsub.f32 %v8393_v56, %v3800_v51 }
 0xae8   :  { %6329 = vpow2.f32 %v3899_v23 }
 0xae9   :  { %v3893_v63 = vmul.f32 1.442695, %v3845_v1  ;;  %v3895_v48 = vmul.f32 1.442695, %v3846_v34 }
 0xaea   :  { %v3810_v0 = vpop.xlane.xlu0 %3809  ;;  %v3812_v42 = vpop.xlane.xlu1 %3811 }
 0xaeb   :  { %6331 = vpow2.f32 %v3893_v63  ;;  %v3851_v8 = vsub.f32 %v8395_v49, %v3810_v0  ;;  %v3852_v20 = vsub.f32 %v8399_v27, %v3812_v42  ;;  %v9178_v42 = vld [vmem:[#allocation25_spill] sm:$0xff] }
 0xaec   :  { %6333 = vpow2.f32 %v3895_v48 }
 0xaed   :  { %v3905_v22 = vmul.f32 1.442695, %v3851_v8  ;;  %v3907_v7 = vmul.f32 1.442695, %v3852_v20  ;;  %v9179_v20 = vld [vmem:[#allocation11_spill] sm:$0xff] }
 0xaee   :  { %v3806_v44 = vpop.xlane.xlu0 %3805  ;;  %v3808_v14 = vpop.xlane.xlu1 %3807 }
 0xaef   :  { %6335 = vpow2.f32 %v3905_v22  ;;  %v3849_v33 = vsub.f32 %v8397_v5, %v3806_v44  ;;  %v3850_v56 = vsub.f32 %v8401_v57, %v3808_v14  ;;  %v9181_v44 = vld [vmem:[#allocation24_spill] sm:$0xff] }
 0xaf0   :  { %6337 = vpow2.f32 %v3907_v7 }
 0xaf1   :  { %v3901_v13 = vmul.f32 1.442695, %v3849_v33  ;;  %v3903_v11 = vmul.f32 1.442695, %v3850_v56  ;;  %v5878_v56 = vld [vmem:[%s8990_s2] sm:$0xff]  }
 0xaf2   :  { %v3818_v12 = vpop.xlane.xlu0 %3817  ;;  %v3820_v18 = vpop.xlane.xlu1 %3819 }
 0xaf3   :  { %6339 = vpow2.f32 %v3901_v13  ;;  %v3855_v49 = vsub.f32 %v8403_v55, %v3818_v12  ;;  %v3856_v27 = vsub.f32 %v8411_v52, %v3820_v18  ;;  %v9183_v13 = vld [vmem:[#allocation12_spill] sm:$0xff] }
 0xaf4   :  { %v8465_v21 = vpop.eup %6327  ;;  %6341 = vpow2.f32 %v3903_v11  ;;  %v9184_v11 = vld [vmem:[#allocation13_spill] sm:$0xff] }
 0xaf5   :  { %v8467_v50 = vpop.eup %6329  ;;  %v3913_v25 = vmul.f32 1.442695, %v3855_v49  ;;  %v3915_v41 = vmul.f32 1.442695, %v3856_v27  ;;  %3961 = vadd.xlane.f32.xlu1 %v8465_v21  ;;  %v9185_v27 = vld [vmem:[#allocation5_spill] sm:$0xff] }
 0xaf6   :  { %3963 = vadd.xlane.f32.xlu0 %v8467_v50  ;;  %v3814_v5 = vpop.xlane.xlu0 %3813  ;;  %v3816_v57 = vpop.xlane.xlu1 %3815 }
 0xaf7   :  { %6343 = vpow2.f32 %v3913_v25  ;;  %v3853_v17 = vsub.f32 %v8407_v38, %v3814_v5  ;;  %v3854_v55 = vsub.f32 %v8417_v43, %v3816_v57 }
 0xaf8   :  { %v8473_v3 = vpop.eup %6331  ;;  %6345 = vpow2.f32 %v3915_v41 }
 0xaf9   :  { %v8475_v52 = vpop.eup %6333  ;;  %v3909_v28 = vmul.f32 1.442695, %v3853_v17  ;;  %v3911_v9 = vmul.f32 1.442695, %v3854_v55  ;;  %3957 = vadd.xlane.f32.xlu1 %v8473_v3 }
 0xafa   :  { %3959 = vadd.xlane.f32.xlu0 %v8475_v52  ;;  %v3826_v37 = vpop.xlane.xlu0 %3825  ;;  %v3828_v4 = vpop.xlane.xlu1 %3827 }
 0xafb   :  { %6347 = vpow2.f32 %v3909_v28  ;;  %v3859_v31 = vsub.f32 %v8421_v60, %v3826_v37  ;;  %v3860_v22 = vsub.f32 %v8429_v35, %v3828_v4  ;;  %v9180_v35 = vld [vmem:[#allocation7_spill] sm:$0xff] }
 0xafc   :  { %v8480_v39 = vpop.eup %6335  ;;  %6349 = vpow2.f32 %v3911_v9 }
 0xafd   :  { %v8482_v38 = vpop.eup %6337  ;;  %v3921_v43 = vmul.f32 1.442695, %v3859_v31  ;;  %3969 = vadd.xlane.f32.xlu1 %v8480_v39  ;;  %v9186_v31 = vld [vmem:[#allocation14_spill] sm:$0xff] }
 0xafe   :  { %3971 = vadd.xlane.f32.xlu0 %v8482_v38  ;;  %v3822_v30 = vpop.xlane.xlu0 %3821  ;;  %v3824_v15 = vpop.xlane.xlu1 %3823 }
 0xaff   :  { %6351 = vpow2.f32 %v3921_v43  ;;  %v3857_v61 = vsub.f32 %v8425_v62, %v3822_v30  ;;  %v3858_v8 = vsub.f32 %v8433_v29, %v3824_v15 }
 0xb00   :  { %v8487_v26 = vpop.eup %6339 }
 0xb01   :  { %v8489_v23 = vpop.eup %6341  ;;  %v3917_v60 = vmul.f32 1.442695, %v3857_v61  ;;  %3965 = vadd.xlane.f32.xlu1 %v8487_v26  ;;  %v3919_v7 = vmul.f32 1.442695, %v3858_v8 }
 0xb02   :  { %3967 = vadd.xlane.f32.xlu0 %v8489_v23  ;;  %v4197_v24 = vpop.permute.xlu0 %4196  ;;  %v4195_v1 = vpop.permute.xlu1 %4194 }
 0xb03   :  { %6353 = vpow2.f32 %v3917_v60  ;;  %5721 = vmatprep.subr.bf16.mxu0 %v4197_v24  ;;  %v9187_v60 = vld [vmem:[#allocation10_spill] sm:$0xff] }
 0xb04   :  { %v8493_v51 = vpop.eup %6343  ;;  %5722 = vmatpush3.bf16.msra.mxu0 %v4197_v24  ;;  %6355 = vpow2.f32 %v3919_v7  ;;  %v9188_v24 = vld [vmem:[#allocation15_spill] sm:$0xff] }
 0xb05   :  { %v8495_v34 = vpop.eup %6345  ;;  %3977 = vadd.xlane.f32.xlu1 %v8493_v51  ;;  %5723 = vmatprep.subr.bf16.mxu0 %v4195_v1  ;;  %v9190_v7 = vld [vmem:[#allocation3_spill] sm:$0xff] }
 0xb06   :  { %3979 = vadd.xlane.f32.xlu0 %v8495_v34 }
 0xb08   :  { %v8499_v62 = vpop.eup %6347  ;;  %5724 = vmatpush3.bf16.msra.mxu0 %v4195_v1 }
 0xb09   :  { %v8501_v63 = vpop.eup %6349  ;;  %3973 = vadd.xlane.f32.xlu1 %v8499_v62 }
 0xb0a   :  { %3975 = vadd.xlane.f32.xlu0 %v8501_v63 }
 0xb0c   :  { %v8505_v48 = vpop.eup %6351 }
 0xb0d   :  { %3985 = vadd.xlane.f32.xlu1 %v8505_v48 }
 0xb10   :  { %v8508_v0 = vpop.eup %6353 }
 0xb11   :  { %3981 = vadd.xlane.f32.xlu1 %v8508_v0 }
 0xb20   :  { %4192 = vrot.lane.b32.xlu0 %v9093_v58, %s6401_s6  ;;  %v3923_v58 = vmul.f32 1.442695, %v3860_v22 }
 0xb22   :  { %4190 = vrot.lane.b32.xlu1 %v9142_v2, %s6401_s6  ;;  %6357 = vpow2.f32 %v3923_v58  ;;  %v8525_v2 = vpop.eup %6355 }
 0xb26   :  { %2223 = vrot.lane.b32.xlu1 %v9178_v42, %s6402_s7 }
 0xb2a   :  { %2225 = vrot.lane.b32.xlu1 %v9179_v20, %s6402_s7  ;;  %v9189_v20 = vld [vmem:[#allocation16_spill] sm:$0xff] }
 0xb2e   :  { %3282 = vrot.lane.b32.xlu1 %v8110_v47, %s6403_s8  ;;  %v5877_v47 = vld [vmem:[%s8990_s2 + $0x8] sm:$0xff]  }
 0xb2f   :  { %v8528_v29 = vpop.eup %6357  ;;  %5745 = vmatprep.subr.bf16.mxu1 %v5877_v47 }
 0xb30   :  { %5746 = vmatpush3.bf16.msra.mxu1 %v5877_v47 }
 0xb31   :  { %5747 = vmatprep.subr.bf16.mxu1 %v5878_v56 }
 0xb32   :  { %3286 = vrot.lane.b32.xlu1 %v8102_v45, %s6403_s8 }
 0xb34   :  { %5748 = vmatpush3.bf16.msra.mxu1 %v5878_v56 }
 0xb3f   :  { %3983 = vadd.xlane.f32.xlu0 %v8525_v2 }
 0xb43   :  { %3987 = vadd.xlane.f32.xlu0 %v8528_v29 }
 0xb59   :  { %2221 = vrot.lane.b32.xlu0 %v9180_v35, %s6402_s7 }
 0xb5d   :  { %2227 = vrot.lane.b32.xlu0 %v9181_v44, %s6402_s7 }
 0xb61   :  { %3284 = vrot.lane.b32.xlu0 %v8121_v19, %s6403_s8 }
 0xb65   :  { %3288 = vrot.lane.b32.xlu0 %v8116_v6, %s6403_s8  ;;  %v9182_v6 = vld [vmem:[#allocation22_spill] sm:$0xff] }
 0xb6e   :  { %v5699_v45 = vpop.f32.mrf.mxu1 }
 0xb70   :  { %v4127_v14 = vpop.f32.mrf.mxu1 }
 0xb71   :  { %4343 = vrot.lane.b32.xlu1 %v4127_v14, %s6404_s11  ;;  %v9191_v14 = vld [vmem:[#allocation19_spill] sm:$0xff] }
 0xb72   :  { %v5700_v33 = vpop.f32.mrf.mxu1 }
 0xb74   :  { %v4130_v19 = vpop.f32.mrf.mxu1 }
 0xb75   :  { %4347 = vrot.lane.b32.xlu1 %v5699_v45, %s6404_s11  ;;  %4345 = vrot.lane.b32.xlu0 %v4130_v19, %s6404_s11 }
 0xb76   :  { %v5703_v49 = vpop.f32.mrf.mxu1 }
 0xb78   :  { %v4143_v5 = vpop.f32.mrf.mxu1 }
 0xb79   :  { %2229 = vrot.lane.b32.xlu1 %v9182_v6, %s6402_s7  ;;  %4349 = vrot.lane.b32.xlu0 %v5700_v33, %s6404_s11  ;;  %v9192_v33 = vld [vmem:[#allocation32_spill] sm:$0xff] }
 0xb7a   :  { %v5704_v55 = vpop.f32.mrf.mxu1 }
 0xb7c   :  { %v4146_v9 = vpop.f32.mrf.mxu1 }
 0xb7d   :  { %2233 = vrot.lane.b32.xlu1 %v9183_v13, %s6402_s7  ;;  %2231 = vrot.lane.b32.xlu0 %v9184_v11, %s6402_s7 }
 0xb7e   :  { %v3962_v12 = vpop.xlane.xlu1 %3961 }
 0xb7f   :  { %v3964_v18 = vpop.xlane.xlu0 %3963 }
 0xb81   :  { %3290 = vrot.lane.b32.xlu1 %v8125_v54, %s6403_s8  ;;  %2235 = vrot.lane.b32.xlu0 %v9185_v27, %s6402_s7 }
 0xb82   :  { %v3958_v25 = vpop.xlane.xlu1 %3957 }
 0xb83   :  { %v3960_v41 = vpop.xlane.xlu0 %3959  ;;  %6359 = vrcp.f32 %v3958_v25 }
 0xb84   :  { %6361 = vrcp.f32 %v3960_v41 }
 0xb85   :  { %3294 = vrot.lane.b32.xlu1 %v8123_v16, %s6403_s8  ;;  %3292 = vrot.lane.b32.xlu0 %v8129_v32, %s6403_s8  ;;  %6363 = vrcp.f32 %v3962_v12 }
 0xb86   :  { %v3970_v57 = vpop.xlane.xlu1 %3969  ;;  %6365 = vrcp.f32 %v3964_v18  ;;  %v9193_v18 = vld [vmem:[#allocation30_spill] sm:$0xff] }
 0xb87   :  { %v3972_v17 = vpop.xlane.xlu0 %3971 }
 0xb89   :  { %4351 = vrot.lane.b32.xlu1 %v4143_v5, %s6404_s11  ;;  %3296 = vrot.lane.b32.xlu0 %v8127_v59, %s6403_s8 }
 0xb8a   :  { %v3966_v54 = vpop.xlane.xlu1 %3965 }
 0xb8b   :  { %v3968_v28 = vpop.xlane.xlu0 %3967  ;;  %6367 = vrcp.f32 %v3966_v54  ;;  %v9194_v54 = vld [vmem:[#allocation9_spill] sm:$0xff] }
 0xb8c   :  { %6369 = vrcp.f32 %v3968_v28 }
 0xb8d   :  { %4355 = vrot.lane.b32.xlu1 %v5703_v49, %s6404_s11  ;;  %4353 = vrot.lane.b32.xlu0 %v4146_v9, %s6404_s11  ;;  %6371 = vrcp.f32 %v3970_v57 }
 0xb8e   :  { %v3978_v16 = vpop.xlane.xlu1 %3977  ;;  %6373 = vrcp.f32 %v3972_v17 }
 0xb8f   :  { %v3980_v32 = vpop.xlane.xlu0 %3979 }
 0xb90   :  { %v6360_v37 = vpop.eup %6359 }
 0xb91   :  { %v6362_v4 = vpop.eup %6361  ;;  %2237 = vrot.lane.b32.xlu1 %v9186_v31, %s6402_s7  ;;  %4357 = vrot.lane.b32.xlu0 %v5704_v55, %s6404_s11  ;;  %v4037_v59 = vmul.f32 %v6360_v37, %v8473_v3  ;;  %v9197_v31 = vld [vmem:[#allocation4_spill] sm:$0xff] }
 0xb92   :  { %v3974_v43 = vpop.xlane.xlu1 %3973  ;;  %v4038_v30 = vmul.f32 %v6362_v4, %v8475_v52  ;;  %v6364_v3 = vpop.eup %6363 }
 0xb93   :  { %v3976_v15 = vpop.xlane.xlu0 %3975  ;;  %6375 = vrcp.f32 %v3974_v43  ;;  %v6366_v8 = vpop.eup %6365  ;;  %v4039_v45 = vmul.f32 %v6364_v3, %v8465_v21  ;;  %v9198_v43 = vld [vmem:[#allocation17_spill] sm:$0xff]  ;;  %v9204_v3 = vld [vmem:[#allocation18_spill] sm:$0xff] }
 0xb94   :  { %v4061_v61 = vpack.c.bf16 %v4038_v30, %v4037_v59  ;;  %6377 = vrcp.f32 %v3976_v15  ;;  %v5707_v52 = vpop.f32.mrf.mxu1  ;;  %v4040_v44 = vmul.f32 %v6366_v8, %v8467_v50 }
 0xb95   :  { %2241 = vrot.lane.b32.xlu1 %v9187_v60, %s6402_s7  ;;  %2239 = vrot.lane.b32.xlu0 %v9188_v24, %s6402_s7  ;;  %6379 = vrcp.f32 %v3978_v16  ;;  %v9202_v24 = vld [vmem:[#allocation35_spill] sm:$0xff] }
 0xb96   :  { %5729 = vmatprep.mubr.bf16.mxu0 %v4061_v61  ;;  %v8577_v1 = vpop.xlane.xlu1 %3985  ;;  %v4159_v47 = vpop.f32.mrf.mxu1  ;;  %6381 = vrcp.f32 %v3980_v32  ;;  %v4062_v21 = vpack.c.bf16 %v4040_v44, %v4039_v45  ;;  %v9196_v32 = vld [vmem:[#allocation6_spill] sm:$0xff]  ;;  %v9201_v61 = vld [vmem:[#allocation41_spill] sm:$0xff] }
 0xb97   :  { %v4193_v42 = vpop.permute.xlu0 %4192 }
 0xb98   :  { %5725 = vmatprep.subr.bf16.mxu0 %v4193_v42  ;;  %v6368_v22 = vpop.eup %6367  ;;  %v5708_v11 = vpop.f32.mrf.mxu1 }
 0xb99   :  { %5726 = vmatpush3.bf16.msra.mxu0 %v4193_v42  ;;  %3298 = vrot.lane.b32.xlu1 %v9189_v20, %s6403_s8  ;;  %v6370_v35 = vpop.eup %6369  ;;  %v4041_v19 = vmul.f32 %v6368_v22, %v8487_v26  ;;  %v9203_v42 = vld [vmem:[#allocation36_spill] sm:$0xff] }
 0xb9a   :  { %2243 = vrot.lane.b32.xlu0 %v9190_v7, %s6402_s7  ;;  %v8583_v58 = vpop.xlane.xlu1 %3981  ;;  %v4042_v6 = vmul.f32 %v6370_v35, %v8489_v23  ;;  %v6372_v13 = vpop.eup %6371  ;;  %v9206_v7 = vld [vmem:[#allocation23_spill] sm:$0xff] }
 0xb9b   :  { %v6374_v50 = vpop.eup %6373  ;;  %v4162_v26 = vpop.f32.mrf.mxu1  ;;  %v4043_v23 = vmul.f32 %v6372_v13, %v8480_v39  ;;  %6383 = vrcp.f32 %v8583_v58  ;;  %v9211_v13 = vld [vmem:[#allocation45_spill] sm:$0xff] }
 0xb9c   :  { %v4063_v27 = vpack.c.bf16 %v4042_v6, %v4041_v19  ;;  %v4044_v41 = vmul.f32 %v6374_v50, %v8482_v38  ;;  %v9195_v38 = vld [vmem:[#allocation8_spill] sm:$0xff] }
 0xb9d   :  { %3302 = vrot.lane.b32.xlu1 %v9191_v14, %s6403_s8  ;;  %v5711_v4 = vpop.f32.mrf.mxu1  ;;  %v9213_v50 = vld [vmem:[#allocation44_spill] sm:$0xff] }
 0xb9e   :  { %3300 = vrot.lane.b32.xlu0 %v9192_v33, %s6403_s8  ;;  %v4191_v56 = vpop.permute.xlu1 %4190  ;;  %v4064_v28 = vpack.c.bf16 %v4044_v41, %v4043_v23  ;;  %v9209_v33 = vld [vmem:[#allocation21_spill] sm:$0xff] }
 0xb9f   :  { %5727 = vmatprep.subr.bf16.mxu0 %v4191_v56  ;;  %v4175_v30 = vpop.f32.mrf.mxu1  ;;  %v9219_v23 = vld [vmem:[#allocation49_spill] sm:$0xff] }
 0xba0   :  { %5728 = vmatpush3.bf16.msra.mxu0 %v4191_v56  ;;  %v6376_v12 = vpop.eup %6375 }
 0xba1   :  { %4359 = vrot.lane.b32.xlu1 %v4159_v47, %s6404_s11  ;;  %v6378_v25 = vpop.eup %6377  ;;  %v4045_v57 = vmul.f32 %v6376_v12, %v8499_v62  ;;  %v5712_v15 = vpop.f32.mrf.mxu1 }
 0xba2   :  { %3304 = vrot.lane.b32.xlu0 %v9193_v18, %s6403_s8  ;;  %v2224_v49 = vpop.permute.xlu1 %2223  ;;  %v4046_v17 = vmul.f32 %v6378_v25, %v8501_v63  ;;  %v6380_v55 = vpop.eup %6379  ;;  %v9216_v18 = vld [vmem:[#allocation47_spill] sm:$0xff] }
 0xba3   :  { %2319 = vst.msk [vmem:[#allocation2 + $0x8] sm:$0xff] %vm2317_vm2, %v2224_v49  ;;  %5730 = vmatmul.mubr.bf16.vlgmr.msra.gmra.mxu0 %v4062_v21  ;;  %v6382_v9 = vpop.eup %6381  ;;  %v4047_v62 = vmul.f32 %v6380_v55, %v8493_v51  ;;  %v9199_v51 = vld [vmem:[#allocation29_spill] sm:$0xff]  ;;  %v4178_v60 = vpop.f32.mrf.mxu1 }
 0xba4   :  { %5733 = vmatprep.mubr.bf16.mxu0 %v4063_v27  ;;  %v4065_v16 = vpack.c.bf16 %v4046_v17, %v4045_v57  ;;  %v4048_v63 = vmul.f32 %v6382_v9, %v8495_v34  ;;  %v9200_v34 = vld [vmem:[#allocation42_spill] sm:$0xff]  ;;  %v9217_v49 = vld [vmem:[#allocation33_spill] sm:$0xff] }
 0xba5   :  { %4363 = vrot.lane.b32.xlu1 %v5707_v52, %s6404_s11  ;;  %v9205_v52 = vld [vmem:[#allocation34_spill] sm:$0xff] }
 0xba6   :  { %4361 = vrot.lane.b32.xlu0 %v4162_v26, %s6404_s11  ;;  %v2226_v5 = vpop.permute.xlu1 %2225  ;;  %v4066_v59 = vpack.c.bf16 %v4048_v63, %v4047_v62  ;;  %v9218_v26 = vld [vmem:[#allocation46_spill] sm:$0xff] }
 0xba7   :  { %2320 = vst.msk [vmem:[#allocation2 + $0x10] sm:$0xff] %vm2317_vm2, %v2226_v5  ;;  %v9222_v63 = vld [vmem:[#allocation38_spill] sm:$0xff] }
 0xba9   :  { %2245 = vrot.lane.b32.xlu1 %v9194_v54, %s6402_s7  ;;  %v9220_v54 = vld [vmem:[#allocation37_spill] sm:$0xff] }
 0xbaa   :  { %4365 = vrot.lane.b32.xlu0 %v5708_v11, %s6404_s11  ;;  %v3283_v39 = vpop.permute.xlu1 %3282  ;;  %v9215_v11 = vld [vmem:[#allocation31_spill] sm:$0xff] }
 0xbab   :  { %5734 = vmatmul.mubr.bf16.gmra.mxu0 %v4064_v28  ;;  %v9221_v28 = vld [vmem:[#allocation48_spill] sm:$0xff] }
 0xbac   :  { %5737 = vmatprep.mubr.bf16.mxu0 %v4065_v16 }
 0xbad   :  { %2249 = vrot.lane.b32.xlu1 %v9195_v38, %s6402_s7 }
 0xbae   :  { %2247 = vrot.lane.b32.xlu0 %v9196_v32, %s6402_s7  ;;  %v3287_v37 = vpop.permute.xlu1 %3286  ;;  %v9223_v32 = vld [vmem:[#allocation40_spill] sm:$0xff] }
 0xbaf   :  { %3381 = vst.msk [vmem:[#allocation2 + $0x10] sm:$0xff] %vm3378_vm3, %v3287_v37 }
 0xbb1   :  { %3306 = vrot.lane.b32.xlu1 %v9197_v31, %s6403_s8  ;;  %v9224_v31 = vld [vmem:[#allocation51_spill] sm:$0xff] }
 0xbb2   :  { %2251 = vrot.lane.b32.xlu0 %v9198_v43, %s6402_s7 }
 0xbb3   :  { %5738 = vmatmul.mubr.bf16.gmra.mxu0 %v4066_v59  ;;  %v9225_v59 = vld [vmem:[#allocation39_spill] sm:$0xff] }
 0xbb5   :  { %3310 = vrot.lane.b32.xlu1 %v9199_v51, %s6403_s8  ;;  %v9226_v51 = vld [vmem:[#allocation53_spill] sm:$0xff] }
 0xbb6   :  { %3308 = vrot.lane.b32.xlu0 %v9200_v34, %s6403_s8 }
 0xbb9   :  { %4367 = vrot.lane.b32.xlu1 %v4175_v30, %s6404_s11 }
 0xbba   :  { %3312 = vrot.lane.b32.xlu0 %v9201_v61, %s6403_s8 }
 0xbbd   :  { %4371 = vrot.lane.b32.xlu1 %v5711_v4, %s6404_s11 }
 0xbbe   :  { %4369 = vrot.lane.b32.xlu0 %v4178_v60, %s6404_s11 }
 0xbc1   :  { %2253 = vrot.lane.b32.xlu1 %v9202_v24, %s6402_s7 }
 0xbc2   :  { %4373 = vrot.lane.b32.xlu0 %v5712_v15, %s6404_s11 }
 0xbc5   :  { %2257 = vrot.lane.b32.xlu1 %v9203_v42, %s6402_s7 }
 0xbc6   :  { %2255 = vrot.lane.b32.xlu0 %v9204_v3, %s6402_s7 }
 0xbc8   :  { %v3984_v8 = vpop.xlane.xlu0 %3983 }
 0xbc9   :  { %6385 = vrcp.f32 %v3984_v8  ;;  %3314 = vrot.lane.b32.xlu1 %v8331_v40, %s6403_s8  ;;  %v6384_v40 = vpop.eup %6383 }
 0xbca   :  { %2259 = vrot.lane.b32.xlu0 %v9205_v52, %s6402_s7  ;;  %6387 = vrcp.f32 %v8577_v1  ;;  %v4049_v35 = vmul.f32 %v6384_v40, %v8508_v0 }
 0xbcc   :  { %v3988_v20 = vpop.xlane.xlu0 %3987 }
 0xbcd   :  { %6389 = vrcp.f32 %v3988_v20  ;;  %3318 = vrot.lane.b32.xlu1 %v8329_v36, %s6403_s8  ;;  %v9207_v36 = vld [vmem:[#allocation20_spill] sm:$0xff] }
 0xbce   :  { %3316 = vrot.lane.b32.xlu0 %v8336_v46, %s6403_s8  ;;  %v9208_v46 = vld [vmem:[#allocation26_spill] sm:$0xff] }
 0xbd0   :  { %v2222_v22 = vpop.permute.xlu0 %2221 }
 0xbd1   :  { %2318 = vst.msk [vmem:[#allocation2] sm:$0xff] %vm2317_vm2, %v2222_v22  ;;  %2261 = vrot.lane.b32.xlu1 %v9206_v7, %s6402_s7 }
 0xbd2   :  { %3379 = vst.msk [vmem:[#allocation2] sm:$0xff] %vm3378_vm3, %v3283_v39  ;;  %3320 = vrot.lane.b32.xlu0 %v8333_v10, %s6403_s8 }
 0xbd4   :  { %v2228_v1 = vpop.permute.xlu0 %2227 }
 0xbd5   :  { %2321 = vst.msk [vmem:[#allocation2 + $0x18] sm:$0xff] %vm2317_vm2, %v2228_v1  ;;  %2265 = vrot.lane.b32.xlu1 %v9207_v36, %s6402_s7 }
 0xbd6   :  { %v6386_v58 = vpop.eup %6385  ;;  %2263 = vrot.lane.b32.xlu0 %v9208_v46, %s6402_s7 }
 0xbd7   :  { %v4050_v44 = vmul.f32 %v6386_v58, %v8525_v2  ;;  %v6388_v45 = vpop.eup %6387  ;;  %v9210_v2 = vld [vmem:[#allocation43_spill] sm:$0xff] }
 0xbd8   :  { %v3285_v47 = vpop.permute.xlu0 %3284  ;;  %v4051_v56 = vmul.f32 %v6388_v45, %v8505_v48 }
 0xbd9   :  { %3380 = vst.msk [vmem:[#allocation2 + $0x8] sm:$0xff] %vm3378_vm3, %v3285_v47  ;;  %3322 = vrot.lane.b32.xlu1 %v8343_v53, %s6403_s8  ;;  %v4067_v10 = vpack.c.bf16 %v4050_v44, %v4049_v35  ;;  %v9212_v53 = vld [vmem:[#allocation28_spill] sm:$0xff] }
 0xbda   :  { %v6390_v14 = vpop.eup %6389  ;;  %2267 = vrot.lane.b32.xlu0 %v9209_v33, %s6402_s7 }
 0xbdb   :  { %5741 = vmatprep.mubr.bf16.mxu0 %v4067_v10  ;;  %v4052_v19 = vmul.f32 %v6390_v14, %v8528_v29  ;;  %v9214_v29 = vld [vmem:[#allocation27_spill] sm:$0xff] }
 0xbdc   :  { %v3289_v0 = vpop.permute.xlu0 %3288 }
 0xbdd   :  { %3382 = vst.msk [vmem:[#allocation2 + $0x18] sm:$0xff] %vm3378_vm3, %v3289_v0  ;;  %3326 = vrot.lane.b32.xlu1 %v9210_v2, %s6403_s8  ;;  %v4068_v6 = vpack.c.bf16 %v4052_v19, %v4051_v56 }
 0xbde   :  { %3324 = vrot.lane.b32.xlu0 %v9211_v13, %s6403_s8 }
 0xbdf   :  { %5742 = vmatmul.mubr.bf16.gmra.mxu0 %v4068_v6 }
 0xbe1   :  { %2269 = vrot.lane.b32.xlu1 %v9212_v53, %s6402_s7 }
 0xbe2   :  { %3328 = vrot.lane.b32.xlu0 %v9213_v50, %s6403_s8 }
 0xbe3   :  { %v4344_v48 = vpop.permute.xlu1 %4343 }
 0xbe4   :  { %4440 = vst.msk [vmem:[#allocation2] sm:$0xff] %vm4439_vm4, %v4344_v48 }
 0xbe5   :  { %2273 = vrot.lane.b32.xlu1 %v9214_v29, %s6402_s7 }
 0xbe6   :  { %2271 = vrot.lane.b32.xlu0 %v9215_v11, %s6402_s7 }
 0xbe7   :  { %v4346_v21 = vpop.permute.xlu0 %4345  ;;  %v4348_v12 = vpop.permute.xlu1 %4347 }
 0xbe8   :  { %4441 = vst.msk [vmem:[#allocation2 + $0x8] sm:$0xff] %vm4439_vm4, %v4346_v21  ;;  %4442 = vst.msk [vmem:[#allocation2 + $0x10] sm:$0xff] %vm4439_vm4, %v4348_v12 }
 0xbe9   :  { %3330 = vrot.lane.b32.xlu1 %v9216_v18, %s6403_s8 }
 0xbea   :  { %2275 = vrot.lane.b32.xlu0 %v9217_v49, %s6402_s7 }
 0xbeb   :  { %v4350_v27 = vpop.permute.xlu0 %4349  ;;  %v2230_v25 = vpop.permute.xlu1 %2229  ;;  %v4472_v57 = vld [vmem:[#allocation2] sm:$0xff] }
 0xbec   :  { %4443 = vst.msk [vmem:[#allocation2 + $0x18] sm:$0xff] %vm4439_vm4, %v4350_v27 }
 0xbed   :  { %2322 = vst.msk [vmem:[#allocation2 + $0x20] sm:$0xff] %vm2317_vm2, %v2230_v25  ;;  %3334 = vrot.lane.b32.xlu1 %v9218_v26, %s6403_s8 }
 0xbee   :  { %3332 = vrot.lane.b32.xlu0 %v9219_v23, %s6403_s8 }
 0xbef   :  { %v2232_v41 = vpop.permute.xlu0 %2231  ;;  %v2234_v5 = vpop.permute.xlu1 %2233  ;;  %v4473_v17 = vld [vmem:[#allocation2 + $0x8] sm:$0xff]  ;;  %v4474_v16 = vld [vmem:[#allocation2 + $0x10] sm:$0xff] }
 0xbf0   :  { %2323 = vst.msk [vmem:[#allocation2 + $0x28] sm:$0xff] %vm2317_vm2, %v2232_v41  ;;  %2324 = vst.msk [vmem:[#allocation2 + $0x30] sm:$0xff] %vm2317_vm2, %v2234_v5  ;;  %v4504_v55 = vpack.c.bf16 %v4473_v17, %v4472_v57 }
 0xbf1   :  { %2277 = vrot.lane.b32.xlu1 %v9220_v54, %s6402_s7 }
 0xbf2   :  { %3336 = vrot.lane.b32.xlu0 %v9221_v28, %s6403_s8  ;;  %5749 = vmatprep.mubr.msk.bf16.mxu1 %vm146_vm0, %v4504_v55 }
 0xbf3   :  { %v2236_v9 = vpop.permute.xlu0 %2235  ;;  %v3291_v39 = vpop.permute.xlu1 %3290  ;;  %v4475_v38 = vld [vmem:[#allocation2 + $0x18] sm:$0xff] }
 0xbf4   :  { %2325 = vst.msk [vmem:[#allocation2 + $0x38] sm:$0xff] %vm2317_vm2, %v2236_v9  ;;  %v4505_v62 = vpack.c.bf16 %v4475_v38, %v4474_v16 }
 0xbf5   :  { %3383 = vst.msk [vmem:[#allocation2 + $0x20] sm:$0xff] %vm3378_vm3, %v3291_v39  ;;  %2281 = vrot.lane.b32.xlu1 %v9222_v63, %s6402_s7 }
 0xbf6   :  { %2279 = vrot.lane.b32.xlu0 %v9223_v32, %s6402_s7  ;;  %5750 = vmatmul.mubr.msk.bf16.vlgmr.msra.gmra.mxu1 %vm146_vm0, %v4505_v62 }
 0xbf7   :  { %v3293_v37 = vpop.permute.xlu0 %3292  ;;  %v3295_v4 = vpop.permute.xlu1 %3294 }
 0xbf8   :  { %3384 = vst.msk [vmem:[#allocation2 + $0x28] sm:$0xff] %vm3378_vm3, %v3293_v37  ;;  %3385 = vst.msk [vmem:[#allocation2 + $0x30] sm:$0xff] %vm3378_vm3, %v3295_v4 }
 0xbf9   :  { %3338 = vrot.lane.b32.xlu1 %v9224_v31, %s6403_s8 }
 0xbfa   :  { %2283 = vrot.lane.b32.xlu0 %v9225_v59, %s6402_s7 }
 0xbfb   :  { %v3297_v43 = vpop.permute.xlu0 %3296  ;;  %v4352_v30 = vpop.permute.xlu1 %4351 }
 0xbfc   :  { %3386 = vst.msk [vmem:[#allocation2 + $0x38] sm:$0xff] %vm3378_vm3, %v3297_v43 }
 0xbfd   :  { %4444 = vst.msk [vmem:[#allocation2 + $0x20] sm:$0xff] %vm4439_vm4, %v4352_v30 }
 0xbfe   :  { %3340 = vrot.lane.b32.xlu0 %v9226_v51, %s6403_s8 }
 0xbff   :  { %v4354_v34 = vpop.permute.xlu0 %4353  ;;  %v4356_v15 = vpop.permute.xlu1 %4355 }
 0xc00   :  { %4445 = vst.msk [vmem:[#allocation2 + $0x28] sm:$0xff] %vm4439_vm4, %v4354_v34  ;;  %4446 = vst.msk [vmem:[#allocation2 + $0x30] sm:$0xff] %vm4439_vm4, %v4356_v15 }
 0xc03   :  { %v4358_v61 = vpop.permute.xlu0 %4357  ;;  %v2238_v60 = vpop.permute.xlu1 %2237 }
 0xc04   :  { %4447 = vst.msk [vmem:[#allocation2 + $0x38] sm:$0xff] %vm4439_vm4, %v4358_v61  ;;  %v4476_v3 = vld [vmem:[#allocation2 + $0x20] sm:$0xff] }
 0xc05   :  { %2326 = vst.msk [vmem:[#allocation2 + $0x40] sm:$0xff] %vm2317_vm2, %v2238_v60 }
 0xc07   :  { %v2240_v24 = vpop.permute.xlu0 %2239  ;;  %v2242_v42 = vpop.permute.xlu1 %2241  ;;  %v4477_v8 = vld [vmem:[#allocation2 + $0x28] sm:$0xff]  ;;  %v4478_v22 = vld [vmem:[#allocation2 + $0x30] sm:$0xff] }
 0xc08   :  { %2327 = vst.msk [vmem:[#allocation2 + $0x48] sm:$0xff] %vm2317_vm2, %v2240_v24  ;;  %2328 = vst.msk [vmem:[#allocation2 + $0x50] sm:$0xff] %vm2317_vm2, %v2242_v42  ;;  %v4506_v52 = vpack.c.bf16 %v4477_v8, %v4476_v3 }
 0xc0a   :  { %5753 = vmatprep.mubr.msk.bf16.mxu1 %vm146_vm0, %v4506_v52 }
 0xc0b   :  { %v3299_v20 = vpop.permute.xlu1 %3298  ;;  %v4479_v7 = vld [vmem:[#allocation2 + $0x38] sm:$0xff] }
 0xc0c   :  { %v2244_v40 = vpop.permute.xlu0 %2243  ;;  %3387 = vst.msk [vmem:[#allocation2 + $0x40] sm:$0xff] %vm3378_vm3, %v3299_v20  ;;  %v4507_v1 = vpack.c.bf16 %v4479_v7, %v4478_v22 }
 0xc0d   :  { %2329 = vst.msk [vmem:[#allocation2 + $0x58] sm:$0xff] %vm2317_vm2, %v2244_v40 }
 0xc0e   :  { %5754 = vmatmul.mubr.msk.bf16.gmra.mxu1 %vm146_vm0, %v4507_v1 }
 0xc0f   :  { %v3303_v36 = vpop.permute.xlu1 %3302 }
 0xc10   :  { %v3301_v58 = vpop.permute.xlu0 %3300  ;;  %3389 = vst.msk [vmem:[#allocation2 + $0x50] sm:$0xff] %vm3378_vm3, %v3303_v36 }
 0xc11   :  { %3388 = vst.msk [vmem:[#allocation2 + $0x48] sm:$0xff] %vm3378_vm3, %v3301_v58 }
 0xc13   :  { %v4360_v46 = vpop.permute.xlu1 %4359 }
 0xc14   :  { %v3305_v35 = vpop.permute.xlu0 %3304  ;;  %4448 = vst.msk [vmem:[#allocation2 + $0x40] sm:$0xff] %vm4439_vm4, %v4360_v46 }
 0xc15   :  { %3390 = vst.msk [vmem:[#allocation2 + $0x58] sm:$0xff] %vm3378_vm3, %v3305_v35 }
 0xc17   :  { %v4364_v44 = vpop.permute.xlu1 %4363 }
 0xc18   :  { %v4362_v45 = vpop.permute.xlu0 %4361  ;;  %4450 = vst.msk [vmem:[#allocation2 + $0x50] sm:$0xff] %vm4439_vm4, %v4364_v44 }
 0xc19   :  { %4449 = vst.msk [vmem:[#allocation2 + $0x48] sm:$0xff] %vm4439_vm4, %v4362_v45 }
 0xc1b   :  { %v2246_v47 = vpop.permute.xlu1 %2245  ;;  %v4480_v56 = vld [vmem:[#allocation2 + $0x40] sm:$0xff] }
 0xc1c   :  { %v4366_v10 = vpop.permute.xlu0 %4365  ;;  %2330 = vst.msk [vmem:[#allocation2 + $0x60] sm:$0xff] %vm2317_vm2, %v2246_v47 }
 0xc1d   :  { %4451 = vst.msk [vmem:[#allocation2 + $0x58] sm:$0xff] %vm4439_vm4, %v4366_v10 }
 0xc1f   :  { %v2250_v14 = vpop.permute.xlu1 %2249  ;;  %v4482_v13 = vld [vmem:[#allocation2 + $0x50] sm:$0xff] }
 0xc20   :  { %v2248_v33 = vpop.permute.xlu0 %2247  ;;  %2332 = vst.msk [vmem:[#allocation2 + $0x70] sm:$0xff] %vm2317_vm2, %v2250_v14  ;;  %v4481_v19 = vld [vmem:[#allocation2 + $0x48] sm:$0xff] }
 0xc21   :  { %2331 = vst.msk [vmem:[#allocation2 + $0x68] sm:$0xff] %vm2317_vm2, %v2248_v33  ;;  %v4508_v0 = vpack.c.bf16 %v4481_v19, %v4480_v56  ;;  %v9227_v33 = vld [vmem:[#allocation50_spill] sm:$0xff]  ;;  %v9228_v56 = vld [vmem:[#allocation52_spill] sm:$0xff] }
 0xc23   :  { %5757 = vmatprep.mubr.msk.bf16.mxu1 %vm146_vm0, %v4508_v0  ;;  %v3307_v2 = vpop.permute.xlu1 %3306 }
 0xc24   :  { %v2252_v6 = vpop.permute.xlu0 %2251  ;;  %3391 = vst.msk [vmem:[#allocation2 + $0x60] sm:$0xff] %vm3378_vm3, %v3307_v2  ;;  %v4483_v53 = vld [vmem:[#allocation2 + $0x58] sm:$0xff] }
 0xc25   :  { %2333 = vst.msk [vmem:[#allocation2 + $0x78] sm:$0xff] %vm2317_vm2, %v2252_v6  ;;  %v4509_v50 = vpack.c.bf16 %v4483_v53, %v4482_v13  ;;  %v8800_v13 = vld [vmem:[%s8991_s3] ss:$0 sm:$0xff] }
 0xc27   :  { %5758 = vmatmul.mubr.msk.bf16.gmra.mxu1 %vm146_vm0, %v4509_v50  ;;  %v3311_v48 = vpop.permute.xlu1 %3310 }
 0xc28   :  { %v3309_v29 = vpop.permute.xlu0 %3308  ;;  %3393 = vst.msk [vmem:[#allocation2 + $0x70] sm:$0xff] %vm3378_vm3, %v3311_v48 }
 0xc29   :  { %3392 = vst.msk [vmem:[#allocation2 + $0x68] sm:$0xff] %vm3378_vm3, %v3309_v29 }
 0xc2b   :  { %v4368_v11 = vpop.permute.xlu1 %4367 }
 0xc2c   :  { %v3313_v21 = vpop.permute.xlu0 %3312  ;;  %4452 = vst.msk [vmem:[#allocation2 + $0x60] sm:$0xff] %vm4439_vm4, %v4368_v11 }
 0xc2d   :  { %3394 = vst.msk [vmem:[#allocation2 + $0x78] sm:$0xff] %vm3378_vm3, %v3313_v21 }
 0xc2f   :  { %v4372_v12 = vpop.permute.xlu1 %4371 }
 0xc30   :  { %v4370_v18 = vpop.permute.xlu0 %4369  ;;  %4454 = vst.msk [vmem:[#allocation2 + $0x70] sm:$0xff] %vm4439_vm4, %v4372_v12 }
 0xc31   :  { %4453 = vst.msk [vmem:[#allocation2 + $0x68] sm:$0xff] %vm4439_vm4, %v4370_v18 }
 0xc33   :  { %v2254_v49 = vpop.permute.xlu1 %2253  ;;  %v4484_v23 = vld [vmem:[#allocation2 + $0x60] sm:$0xff] }
 0xc34   :  { %v4374_v27 = vpop.permute.xlu0 %4373  ;;  %2334 = vst.msk [vmem:[#allocation2 + $0x80] sm:$0xff] %vm2317_vm2, %v2254_v49 }
 0xc35   :  { %4455 = vst.msk [vmem:[#allocation2 + $0x78] sm:$0xff] %vm4439_vm4, %v4374_v27 }
 0xc37   :  { %v2258_v25 = vpop.permute.xlu1 %2257  ;;  %v4486_v55 = vld [vmem:[#allocation2 + $0x70] sm:$0xff] }
 0xc38   :  { %v2256_v26 = vpop.permute.xlu0 %2255  ;;  %2336 = vst.msk [vmem:[#allocation2 + $0x90] sm:$0xff] %vm2317_vm2, %v2258_v25  ;;  %v4485_v41 = vld [vmem:[#allocation2 + $0x68] sm:$0xff] }
 0xc39   :  { %2335 = vst.msk [vmem:[#allocation2 + $0x88] sm:$0xff] %vm2317_vm2, %v2256_v26  ;;  %v4510_v5 = vpack.c.bf16 %v4485_v41, %v4484_v23 }
 0xc3b   :  { %5761 = vmatprep.mubr.msk.bf16.mxu1 %vm146_vm0, %v4510_v5  ;;  %v3315_v57 = vpop.permute.xlu1 %3314 }
 0xc3c   :  { %v2260_v17 = vpop.permute.xlu0 %2259  ;;  %3395 = vst.msk [vmem:[#allocation2 + $0x80] sm:$0xff] %vm3378_vm3, %v3315_v57  ;;  %v4487_v54 = vld [vmem:[#allocation2 + $0x78] sm:$0xff] }
 0xc3d   :  { %2337 = vst.msk [vmem:[#allocation2 + $0x98] sm:$0xff] %vm2317_vm2, %v2260_v17  ;;  %v4511_v28 = vpack.c.bf16 %v4487_v54, %v4486_v55 }
 0xc3f   :  { %5762 = vmatmul.mubr.msk.bf16.gmra.mxu1 %vm146_vm0, %v4511_v28  ;;  %v3319_v9 = vpop.permute.xlu1 %3318 }
 0xc40   :  { %v3317_v39 = vpop.permute.xlu0 %3316  ;;  %3397 = vst.msk [vmem:[#allocation2 + $0x90] sm:$0xff] %vm3378_vm3, %v3319_v9 }
 0xc41   :  { %3396 = vst.msk [vmem:[#allocation2 + $0x88] sm:$0xff] %vm3378_vm3, %v3317_v39 }
 0xc43   :  { %v2262_v16 = vpop.permute.xlu1 %2261 }
 0xc44   :  { %v3321_v38 = vpop.permute.xlu0 %3320  ;;  %2338 = vst.msk [vmem:[#allocation2 + $0xa0] sm:$0xff] %vm2317_vm2, %v2262_v16 }
 0xc45   :  { %3398 = vst.msk [vmem:[#allocation2 + $0x98] sm:$0xff] %vm3378_vm3, %v3321_v38 }
 0xc47   :  { %v2266_v62 = vpop.permute.xlu1 %2265 }
 0xc48   :  { %v2264_v63 = vpop.permute.xlu0 %2263  ;;  %2340 = vst.msk [vmem:[#allocation2 + $0xb0] sm:$0xff] %vm2317_vm2, %v2266_v62 }
 0xc49   :  { %2339 = vst.msk [vmem:[#allocation2 + $0xa8] sm:$0xff] %vm2317_vm2, %v2264_v63 }
 0xc4b   :  { %v3323_v32 = vpop.permute.xlu1 %3322 }
 0xc4c   :  { %v2268_v37 = vpop.permute.xlu0 %2267  ;;  %3399 = vst.msk [vmem:[#allocation2 + $0xa0] sm:$0xff] %vm3378_vm3, %v3323_v32 }
 0xc4d   :  { %2341 = vst.msk [vmem:[#allocation2 + $0xb8] sm:$0xff] %vm2317_vm2, %v2268_v37 }
 0xc4f   :  { %v3327_v4 = vpop.permute.xlu1 %3326 }
 0xc50   :  { %v3325_v31 = vpop.permute.xlu0 %3324  ;;  %3401 = vst.msk [vmem:[#allocation2 + $0xb0] sm:$0xff] %vm3378_vm3, %v3327_v4 }
 0xc51   :  { %3400 = vst.msk [vmem:[#allocation2 + $0xa8] sm:$0xff] %vm3378_vm3, %v3325_v31 }
 0xc53   :  { %v2270_v59 = vpop.permute.xlu1 %2269 }
 0xc54   :  { %v3329_v43 = vpop.permute.xlu0 %3328  ;;  %2342 = vst.msk [vmem:[#allocation2 + $0xc0] sm:$0xff] %vm2317_vm2, %v2270_v59 }
 0xc55   :  { %3402 = vst.msk [vmem:[#allocation2 + $0xb8] sm:$0xff] %vm3378_vm3, %v3329_v43 }
 0xc57   :  { %v2274_v30 = vpop.permute.xlu1 %2273 }
 0xc58   :  { %v2272_v51 = vpop.permute.xlu0 %2271  ;;  %2344 = vst.msk [vmem:[#allocation2 + $0xd0] sm:$0xff] %vm2317_vm2, %v2274_v30 }
 0xc59   :  { %2343 = vst.msk [vmem:[#allocation2 + $0xc8] sm:$0xff] %vm2317_vm2, %v2272_v51 }
 0xc5b   :  { %v3331_v34 = vpop.permute.xlu1 %3330 }
 0xc5c   :  { %v2276_v15 = vpop.permute.xlu0 %2275  ;;  %3403 = vst.msk [vmem:[#allocation2 + $0xc0] sm:$0xff] %vm3378_vm3, %v3331_v34 }
 0xc5d   :  { %2345 = vst.msk [vmem:[#allocation2 + $0xd8] sm:$0xff] %vm2317_vm2, %v2276_v15 }
 0xc5f   :  { %v3335_v61 = vpop.permute.xlu1 %3334 }
 0xc60   :  { %v3333_v60 = vpop.permute.xlu0 %3332  ;;  %3405 = vst.msk [vmem:[#allocation2 + $0xd0] sm:$0xff] %vm3378_vm3, %v3335_v61 }
 0xc61   :  { %3404 = vst.msk [vmem:[#allocation2 + $0xc8] sm:$0xff] %vm3378_vm3, %v3333_v60 }
 0xc63   :  { %v5731_v24 = vpop.f32.mrf.mxu0  ;;  %v2278_v42 = vpop.permute.xlu1 %2277 }
 0xc64   :  { %v3337_v3 = vpop.permute.xlu0 %3336  ;;  %2346 = vst.msk [vmem:[#allocation2 + $0xe0] sm:$0xff] %vm2317_vm2, %v2278_v42  ;;  %4379 = vrot.lane.b32.xlu1 %v5731_v24, %s6404_s11 }
 0xc65   :  { %3406 = vst.msk [vmem:[#allocation2 + $0xd8] sm:$0xff] %vm3378_vm3, %v3337_v3  ;;  %v4248_v8 = vpop.f32.mrf.mxu0 }
 0xc67   :  { %v5732_v52 = vpop.f32.mrf.mxu0  ;;  %v2282_v20 = vpop.permute.xlu1 %2281 }
 0xc68   :  { %v2280_v22 = vpop.permute.xlu0 %2279  ;;  %2348 = vst.msk [vmem:[#allocation2 + $0xf0] sm:$0xff] %vm2317_vm2, %v2282_v20  ;;  %4375 = vrot.lane.b32.xlu1 %v4248_v8, %s6404_s11  ;;  %4381 = vrot.lane.b32.xlu0 %v5732_v52, %s6404_s11 }
 0xc69   :  { %2347 = vst.msk [vmem:[#allocation2 + $0xe8] sm:$0xff] %vm2317_vm2, %v2280_v22  ;;  %v4251_v7 = vpop.f32.mrf.mxu0 }
 0xc6b   :  { %v5735_v40 = vpop.f32.mrf.mxu0  ;;  %v3339_v1 = vpop.permute.xlu1 %3338 }
 0xc6c   :  { %v2284_v36 = vpop.permute.xlu0 %2283  ;;  %3407 = vst.msk [vmem:[#allocation2 + $0xe0] sm:$0xff] %vm3378_vm3, %v3339_v1  ;;  %4377 = vrot.lane.b32.xlu0 %v4251_v7, %s6404_s11  ;;  %4387 = vrot.lane.b32.xlu1 %v5735_v40, %s6404_s11 }
 0xc6d   :  { %2349 = vst.msk [vmem:[#allocation2 + $0xf8] sm:$0xff] %vm2317_vm2, %v2284_v36  ;;  %v4264_v58 = vpop.f32.mrf.mxu0 }
 0xc6f   :  { %v5736_v46 = vpop.f32.mrf.mxu0 }
 0xc70   :  { %v3341_v35 = vpop.permute.xlu0 %3340  ;;  %4383 = vrot.lane.b32.xlu1 %v4264_v58, %s6404_s11  ;;  %4389 = vrot.lane.b32.xlu0 %v5736_v46, %s6404_s11 }
 0xc71   :  { %3408 = vst.msk [vmem:[#allocation2 + $0xe8] sm:$0xff] %vm3378_vm3, %v3341_v35  ;;  %v4267_v44 = vpop.f32.mrf.mxu0 }
 0xc73   :  { %v5739_v45 = vpop.f32.mrf.mxu0 }
 0xc74   :  { %4385 = vrot.lane.b32.xlu0 %v4267_v44, %s6404_s11  ;;  %4395 = vrot.lane.b32.xlu1 %v5739_v45, %s6404_s11 }
 0xc75   :  { %v4280_v47 = vpop.f32.mrf.mxu0 }
 0xc77   :  { %v5740_v10 = vpop.f32.mrf.mxu0 }
 0xc78   :  { %4391 = vrot.lane.b32.xlu1 %v4280_v47, %s6404_s11  ;;  %4397 = vrot.lane.b32.xlu0 %v5740_v10, %s6404_s11 }
 0xc79   :  { %v4283_v14 = vpop.f32.mrf.mxu0 }
 0xc7c   :  { %3342 = vrot.lane.b32.xlu1 %v9227_v33, %s6403_s8  ;;  %4393 = vrot.lane.b32.xlu0 %v4283_v14, %s6404_s11 }
 0xc80   :  { %3344 = vrot.lane.b32.xlu0 %v9228_v56, %s6403_s8 }
 0xc9f   :  { %v5743_v19 = vpop.f32.mrf.mxu0 }
 0xca1   :  { %v4296_v0 = vpop.f32.mrf.mxu0 }
 0xca2   :  { %4399 = vrot.lane.b32.xlu1 %v4296_v0, %s6404_s11 }
 0xca3   :  { %v5744_v2 = vpop.f32.mrf.mxu0 }
 0xca5   :  { %v4299_v6 = vpop.f32.mrf.mxu0 }
 0xca6   :  { %4403 = vrot.lane.b32.xlu1 %v5743_v19, %s6404_s11  ;;  %4401 = vrot.lane.b32.xlu0 %v4299_v6, %s6404_s11 }
 0xcaa   :  { %4405 = vrot.lane.b32.xlu0 %v5744_v2, %s6404_s11 }
 0xcb6   :  { %v5751_v53 = vpop.f32.mrf.mxu1 }
 0xcb7   :  { %v4634_v50 = vadd.f32 %v5751_v53, %v8800_v13 }
 0xcb8   :  { %v4625_v48 = vpop.f32.mrf.mxu1 }
 0xcb9   :  { %4754 = vst.msk [vmem:[%s8992_s4 + $0x10] sm:$0xff] %vm146_vm0, %v4634_v50  ;;  %v4626_v29 = vadd.f32 %v8800_v13, %v4625_v48 }
 0xcba   :  { %v5752_v11 = vpop.f32.mrf.mxu1 }
 0xcbb   :  { %4752 = vst.msk [vmem:[%s8992_s4] sm:$0xff] %vm146_vm0, %v4626_v29  ;;  %v4637_v21 = vadd.f32 %v5752_v11, %v8800_v13 }
 0xcbc   :  { %v4628_v12 = vpop.f32.mrf.mxu1 }
 0xcbd   :  { %4755 = vst.msk [vmem:[%s8992_s4 + $0x18] sm:$0xff] %vm146_vm0, %v4637_v21  ;;  %v4629_v18 = vadd.f32 %v8800_v13, %v4628_v12 }
 0xcbf   :  { %4753 = vst.msk [vmem:[%s8992_s4 + $0x8] sm:$0xff] %vm146_vm0, %v4629_v18 }
 0xcce   :  { %v5755_v49 = vpop.f32.mrf.mxu1 }
 0xccf   :  { %v4650_v27 = vadd.f32 %v5755_v49, %v8800_v13 }
 0xcd0   :  { %v4641_v25 = vpop.f32.mrf.mxu1 }
 0xcd1   :  { %4758 = vst.msk [vmem:[%s8992_s4 + $0x30] sm:$0xff] %vm146_vm0, %v4650_v27  ;;  %v4642_v26 = vadd.f32 %v8800_v13, %v4641_v25 }
 0xcd2   :  { %v5756_v23 = vpop.f32.mrf.mxu1 }
 0xcd3   :  { %4756 = vst.msk [vmem:[%s8992_s4 + $0x20] sm:$0xff] %vm146_vm0, %v4642_v26  ;;  %v4653_v41 = vadd.f32 %v5756_v23, %v8800_v13 }
 0xcd4   :  { %v4644_v5 = vpop.f32.mrf.mxu1 }
 0xcd5   :  { %4759 = vst.msk [vmem:[%s8992_s4 + $0x38] sm:$0xff] %vm146_vm0, %v4653_v41  ;;  %v4645_v57 = vadd.f32 %v8800_v13, %v4644_v5 }
 0xcd6   :  { %v4380_v17 = vpop.permute.xlu1 %4379 }
 0xcd7   :  { %4757 = vst.msk [vmem:[%s8992_s4 + $0x28] sm:$0xff] %vm146_vm0, %v4645_v57 }
 0xcd8   :  { %4458 = vst.msk [vmem:[#allocation2 + $0x90] sm:$0xff] %vm4439_vm4, %v4380_v17 }
 0xcda   :  { %v4382_v55 = vpop.permute.xlu0 %4381  ;;  %v4376_v54 = vpop.permute.xlu1 %4375 }
 0xcdb   :  { %4459 = vst.msk [vmem:[#allocation2 + $0x98] sm:$0xff] %vm4439_vm4, %v4382_v55  ;;  %4456 = vst.msk [vmem:[#allocation2 + $0x80] sm:$0xff] %vm4439_vm4, %v4376_v54 }
 0xcde   :  { %v4378_v28 = vpop.permute.xlu0 %4377  ;;  %v4388_v9 = vpop.permute.xlu1 %4387 }
 0xcdf   :  { %4457 = vst.msk [vmem:[#allocation2 + $0x88] sm:$0xff] %vm4439_vm4, %v4378_v28  ;;  %4462 = vst.msk [vmem:[#allocation2 + $0xb0] sm:$0xff] %vm4439_vm4, %v4388_v9  ;;  %v4490_v59 = vld [vmem:[#allocation2 + $0x90] sm:$0xff] }
 0xce2   :  { %v4390_v39 = vpop.permute.xlu0 %4389  ;;  %v4384_v16 = vpop.permute.xlu1 %4383  ;;  %v4491_v38 = vld [vmem:[#allocation2 + $0x98] sm:$0xff]  ;;  %v4488_v32 = vld [vmem:[#allocation2 + $0x80] sm:$0xff] }
 0xce3   :  { %4463 = vst.msk [vmem:[#allocation2 + $0xb8] sm:$0xff] %vm4439_vm4, %v4390_v39  ;;  %4460 = vst.msk [vmem:[#allocation2 + $0xa0] sm:$0xff] %vm4439_vm4, %v4384_v16  ;;  %v4513_v30 = vpack.c.bf16 %v4491_v38, %v4490_v59 }
 0xce6   :  { %v4386_v62 = vpop.permute.xlu0 %4385  ;;  %v4396_v63 = vpop.permute.xlu1 %4395  ;;  %v4489_v37 = vld [vmem:[#allocation2 + $0x88] sm:$0xff]  ;;  %v4494_v1 = vld [vmem:[#allocation2 + $0xb0] sm:$0xff] }
 0xce7   :  { %4461 = vst.msk [vmem:[#allocation2 + $0xa8] sm:$0xff] %vm4439_vm4, %v4386_v62  ;;  %v5759_v4 = vpop.f32.mrf.mxu1  ;;  %4466 = vst.msk [vmem:[#allocation2 + $0xd0] sm:$0xff] %vm4439_vm4, %v4396_v63  ;;  %v4512_v31 = vpack.c.bf16 %v4489_v37, %v4488_v32 }
 0xce8   :  { %v4666_v43 = vadd.f32 %v5759_v4, %v8800_v13 }
 0xce9   :  { %v4657_v51 = vpop.f32.mrf.mxu1  ;;  %5765 = vmatprep.mubr.msk.bf16.mxu1 %vm146_vm0, %v4512_v31 }
 0xcea   :  { %4762 = vst.msk [vmem:[%s8992_s4 + $0x50] sm:$0xff] %vm146_vm0, %v4666_v43  ;;  %v4658_v34 = vadd.f32 %v8800_v13, %v4657_v51  ;;  %v4398_v15 = vpop.permute.xlu0 %4397  ;;  %5766 = vmatmul.mubr.msk.bf16.gmra.mxu1 %vm146_vm0, %v4513_v30  ;;  %v4392_v61 = vpop.permute.xlu1 %4391  ;;  %v4495_v3 = vld [vmem:[#allocation2 + $0xb8] sm:$0xff]  ;;  %v4492_v22 = vld [vmem:[#allocation2 + $0xa0] sm:$0xff] }
 0xceb   :  { %4467 = vst.msk [vmem:[#allocation2 + $0xd8] sm:$0xff] %vm4439_vm4, %v4398_v15  ;;  %v5760_v60 = vpop.f32.mrf.mxu1  ;;  %4464 = vst.msk [vmem:[#allocation2 + $0xc0] sm:$0xff] %vm4439_vm4, %v4392_v61  ;;  %v4515_v36 = vpack.c.bf16 %v4495_v3, %v4494_v1 }
 0xcec   :  { %4760 = vst.msk [vmem:[%s8992_s4 + $0x40] sm:$0xff] %vm146_vm0, %v4658_v34  ;;  %v4669_v24 = vadd.f32 %v5760_v60, %v8800_v13 }
 0xced   :  { %v4660_v42 = vpop.f32.mrf.mxu1 }
 0xcee   :  { %4763 = vst.msk [vmem:[%s8992_s4 + $0x58] sm:$0xff] %vm146_vm0, %v4669_v24  ;;  %v4661_v8 = vadd.f32 %v8800_v13, %v4660_v42  ;;  %v4394_v52 = vpop.permute.xlu0 %4393  ;;  %v3343_v20 = vpop.permute.xlu1 %3342  ;;  %v4493_v7 = vld [vmem:[#allocation2 + $0xa8] sm:$0xff]  ;;  %v4498_v47 = vld [vmem:[#allocation2 + $0xd0] sm:$0xff] }
 0xcef   :  { %4465 = vst.msk [vmem:[#allocation2 + $0xc8] sm:$0xff] %vm4439_vm4, %v4394_v52  ;;  %v4514_v40 = vpack.c.bf16 %v4493_v7, %v4492_v22 }
 0xcf0   :  { %3409 = vst.msk [vmem:[#allocation2 + $0xf0] sm:$0xff] %vm3378_vm3, %v3343_v20 }
 0xcf1   :  { %4761 = vst.msk [vmem:[%s8992_s4 + $0x48] sm:$0xff] %vm146_vm0, %v4661_v8  ;;  %5769 = vmatprep.mubr.msk.bf16.mxu1 %vm146_vm0, %v4514_v40 }
 0xcf2   :  { %v3345_v58 = vpop.permute.xlu0 %3344  ;;  %5770 = vmatmul.mubr.msk.bf16.gmra.mxu1 %vm146_vm0, %v4515_v36  ;;  %v4499_v46 = vld [vmem:[#allocation2 + $0xd8] sm:$0xff]  ;;  %v4496_v35 = vld [vmem:[#allocation2 + $0xc0] sm:$0xff] }
 0xcf3   :  { %3410 = vst.msk [vmem:[#allocation2 + $0xf8] sm:$0xff] %vm3378_vm3, %v3345_v58  ;;  %v4517_v10 = vpack.c.bf16 %v4499_v46, %v4498_v47 }
 0xcf6   :  { %v4497_v44 = vld [vmem:[#allocation2 + $0xc8] sm:$0xff] }
 0xcf7   :  { %v4516_v45 = vpack.c.bf16 %v4497_v44, %v4496_v35 }
 0xcf9   :  { %5773 = vmatprep.mubr.msk.bf16.mxu1 %vm146_vm0, %v4516_v45 }
 0xcfa   :  { %5774 = vmatmul.mubr.msk.bf16.gmra.mxu1 %vm146_vm0, %v4517_v10 }
 0xcff   :  { %v5763_v14 = vpop.f32.mrf.mxu1 }
 0xd00   :  { %v4682_v33 = vadd.f32 %v5763_v14, %v8800_v13 }
 0xd01   :  { %v4673_v56 = vpop.f32.mrf.mxu1 }
 0xd02   :  { %4766 = vst.msk [vmem:[%s8992_s4 + $0x70] sm:$0xff] %vm146_vm0, %v4682_v33  ;;  %v4674_v19 = vadd.f32 %v8800_v13, %v4673_v56 }
 0xd03   :  { %v5764_v0 = vpop.f32.mrf.mxu1 }
 0xd04   :  { %4764 = vst.msk [vmem:[%s8992_s4 + $0x60] sm:$0xff] %vm146_vm0, %v4674_v19  ;;  %v4685_v2 = vadd.f32 %v5764_v0, %v8800_v13 }
 0xd05   :  { %v4676_v6 = vpop.f32.mrf.mxu1 }
 0xd06   :  { %4767 = vst.msk [vmem:[%s8992_s4 + $0x78] sm:$0xff] %vm146_vm0, %v4685_v2  ;;  %v4677_v53 = vadd.f32 %v8800_v13, %v4676_v6 }
 0xd08   :  { %4765 = vst.msk [vmem:[%s8992_s4 + $0x68] sm:$0xff] %vm146_vm0, %v4677_v53 }
 0xd14   :  { %v4400_v50 = vpop.permute.xlu1 %4399 }
 0xd15   :  { %4468 = vst.msk [vmem:[#allocation2 + $0xe0] sm:$0xff] %vm4439_vm4, %v4400_v50 }
 0xd18   :  { %v4402_v48 = vpop.permute.xlu0 %4401  ;;  %v4404_v29 = vpop.permute.xlu1 %4403 }
 0xd19   :  { %4469 = vst.msk [vmem:[#allocation2 + $0xe8] sm:$0xff] %vm4439_vm4, %v4402_v48  ;;  %4470 = vst.msk [vmem:[#allocation2 + $0xf0] sm:$0xff] %vm4439_vm4, %v4404_v29 }
 0xd1c   :  { %v4406_v11 = vpop.permute.xlu0 %4405  ;;  %v4500_v21 = vld [vmem:[#allocation2 + $0xe0] sm:$0xff] }
 0xd1d   :  { %4471 = vst.msk [vmem:[#allocation2 + $0xf8] sm:$0xff] %vm4439_vm4, %v4406_v11 }
 0xd20   :  { %v4501_v12 = vld [vmem:[#allocation2 + $0xe8] sm:$0xff]  ;;  %v4502_v49 = vld [vmem:[#allocation2 + $0xf0] sm:$0xff] }
 0xd21   :  { %v4518_v18 = vpack.c.bf16 %v4501_v12, %v4500_v21 }
 0xd23   :  { %5777 = vmatprep.mubr.msk.bf16.mxu1 %vm146_vm0, %v4518_v18 }
 0xd24   :  { %v4503_v27 = vld [vmem:[#allocation2 + $0xf8] sm:$0xff] }
 0xd25   :  { %v4519_v25 = vpack.c.bf16 %v4503_v27, %v4502_v49 }
 0xd27   :  { %5778 = vmatmul.mubr.msk.bf16.gmra.mxu1 %vm146_vm0, %v4519_v25 }
 0xdaa   :  { %v5767_v26 = vpop.f32.mrf.mxu1 }
 0xdab   :  { %v4698_v23 = vadd.f32 %v5767_v26, %v8800_v13 }
 0xdac   :  { %v4689_v41 = vpop.f32.mrf.mxu1 }
 0xdad   :  { %4770 = vst.msk [vmem:[%s8992_s4 + $0x90] sm:$0xff] %vm146_vm0, %v4698_v23  ;;  %v4690_v5 = vadd.f32 %v8800_v13, %v4689_v41 }
 0xdae   :  { %v5768_v57 = vpop.f32.mrf.mxu1 }
 0xdaf   :  { %4768 = vst.msk [vmem:[%s8992_s4 + $0x80] sm:$0xff] %vm146_vm0, %v4690_v5  ;;  %v4701_v17 = vadd.f32 %v5768_v57, %v8800_v13 }
 0xdb0   :  { %v4692_v55 = vpop.f32.mrf.mxu1 }
 0xdb1   :  { %4771 = vst.msk [vmem:[%s8992_s4 + $0x98] sm:$0xff] %vm146_vm0, %v4701_v17  ;;  %v4693_v54 = vadd.f32 %v8800_v13, %v4692_v55 }
 0xdb2   :  { %v5771_v28 = vpop.f32.mrf.mxu1 }
 0xdb3   :  { %4769 = vst.msk [vmem:[%s8992_s4 + $0x88] sm:$0xff] %vm146_vm0, %v4693_v54  ;;  %v4714_v9 = vadd.f32 %v5771_v28, %v8800_v13 }
 0xdb4   :  { %v4705_v39 = vpop.f32.mrf.mxu1 }
 0xdb5   :  { %4774 = vst.msk [vmem:[%s8992_s4 + $0xb0] sm:$0xff] %vm146_vm0, %v4714_v9  ;;  %v4706_v16 = vadd.f32 %v8800_v13, %v4705_v39 }
 0xdb6   :  { %v5772_v38 = vpop.f32.mrf.mxu1 }
 0xdb7   :  { %4772 = vst.msk [vmem:[%s8992_s4 + $0xa0] sm:$0xff] %vm146_vm0, %v4706_v16  ;;  %v4717_v62 = vadd.f32 %v5772_v38, %v8800_v13 }
 0xdb8   :  { %v4708_v63 = vpop.f32.mrf.mxu1 }
 0xdb9   :  { %4775 = vst.msk [vmem:[%s8992_s4 + $0xb8] sm:$0xff] %vm146_vm0, %v4717_v62  ;;  %v4709_v32 = vadd.f32 %v8800_v13, %v4708_v63 }
 0xdba   :  { %v5775_v37 = vpop.f32.mrf.mxu1 }
 0xdbb   :  { %4773 = vst.msk [vmem:[%s8992_s4 + $0xa8] sm:$0xff] %vm146_vm0, %v4709_v32  ;;  %v4730_v4 = vadd.f32 %v5775_v37, %v8800_v13 }
 0xdbc   :  { %v4721_v31 = vpop.f32.mrf.mxu1 }
 0xdbd   :  { %4778 = vst.msk [vmem:[%s8992_s4 + $0xd0] sm:$0xff] %vm146_vm0, %v4730_v4  ;;  %v4722_v59 = vadd.f32 %v8800_v13, %v4721_v31 }
 0xdbe   :  { %v5776_v43 = vpop.f32.mrf.mxu1 }
 0xdbf   :  { %4776 = vst.msk [vmem:[%s8992_s4 + $0xc0] sm:$0xff] %vm146_vm0, %v4722_v59  ;;  %v4733_v30 = vadd.f32 %v5776_v43, %v8800_v13 }
 0xdc0   :  { %v4724_v51 = vpop.f32.mrf.mxu1 }
 0xdc1   :  { %4779 = vst.msk [vmem:[%s8992_s4 + $0xd8] sm:$0xff] %vm146_vm0, %v4733_v30  ;;  %v4725_v34 = vadd.f32 %v8800_v13, %v4724_v51 }
 0xdc3   :  { %4777 = vst.msk [vmem:[%s8992_s4 + $0xc8] sm:$0xff] %vm146_vm0, %v4725_v34 }
 0xde7   :  { %v5779_v15 = vpop.f32.mrf.mxu1 }
 0xde8   :  { %v4746_v61 = vadd.f32 %v5779_v15, %v8800_v13 }
 0xde9   :  { %v4737_v60 = vpop.f32.mrf.mxu1 }
 0xdea   :  { %4782 = vst.msk [vmem:[%s8992_s4 + $0xf0] sm:$0xff] %vm146_vm0, %v4746_v61  ;;  %v4738_v24 = vadd.f32 %v8800_v13, %v4737_v60 }
 0xdeb   :  { %v5780_v42 = vpop.f32.mrf.mxu1 }
 0xdec   :  { %4780 = vst.msk [vmem:[%s8992_s4 + $0xe0] sm:$0xff] %vm146_vm0, %v4738_v24  ;;  %v4749_v3 = vadd.f32 %v5780_v42, %v8800_v13 }
 0xded   :  { %v4740_v8 = vpop.f32.mrf.mxu1 }
 0xdee   :  { %4783 = vst.msk [vmem:[%s8992_s4 + $0xf8] sm:$0xff] %vm146_vm0, %v4749_v3  ;;  %v4741_v52 = vadd.f32 %v8800_v13, %v4740_v8 }
 0xdf0   :  { %4781 = vst.msk [vmem:[%s8992_s4 + $0xe8] sm:$0xff] %vm146_vm0, %v4741_v52 }

</bundles_post_ra>
